<compile_context>
chip_gen: v7x
topology: tpu7x:2x2x1
jax: 0.10.0
libtpu: 0.0.40
codegen_flags: <defaults>
</compile_context>

<pallas_src>
import functools

import numpy as np
import jax
import jax.numpy as jnp
from jax.experimental import pallas as pl
from jax.experimental.pallas import tpu as pltpu


# ----------------------------------------------------------------------------
# Geometry
# ----------------------------------------------------------------------------
# Canvas: NCHW image zero-padded by (3 top, 4 bottom, 2 left, 2 right), flattened
# row-major per channel: canvas[c, y*WP + x], WP = W+4, M = (H+7)*WP.
# True pixels live at canvas rows y in [3, H+2], cols x in [2, W+1].
# Hidden (layer-1) run: lanes r in [0, L1), L1 = (H+3)*WP, canvas flat = 2*WP + r.
# Output (layer-2) run: lanes o in [0, L2), L2 = H*WP; true pixel (iy, ix) sits at
# o = iy*WP + ix and reads hidden lane r = o + WP + 2 (+ tap offsets).
def _conv_geometry(H, W):
    WP = W + 4
    M = (H + 7) * WP
    L1 = (H + 3) * WP
    L2 = H * WP
    S1 = 2 * WP          # canvas lane offset of the hidden-run origin
    T0 = WP + 2          # hidden lane offset of the output-run origin
    return WP, M, L1, L2, S1, T0


def _make_canvas(x_nchw):
    B, C, H, W = x_nchw.shape
    xp = jnp.pad(x_nchw, ((0, 0), (0, 0), (3, 4), (2, 2)))
    return xp.reshape(B, C, (H + 7) * (W + 4)).astype(jnp.bfloat16)


@functools.lru_cache(maxsize=None)
def _interior_mask_np(H, W):
    WP = W + 4
    L1 = (H + 3) * WP
    r = np.arange(L1)
    ry, rx = r // WP, r % WP
    inside = (ry >= 1) & (ry <= H) & (rx >= 2) & (rx <= W + 1)
    return inside.astype(np.float32)[None, :]          # lane-dense (1, L1)


def _interior_mask(H, W):
    return jnp.asarray(_interior_mask_np(H, W))


def _vmem_limit(est_bytes):
    return int(min(max(2 * est_bytes, 32 << 20), 64 << 20))


# ----------------------------------------------------------------------------
# Kernels
# ----------------------------------------------------------------------------
def _lrelu(x):
    return jnp.where(x > 0.0, x, 0.2 * x)


def _conv_pair(x_ref, mask_ref, w1_ref, b1_ref, w2_ref, b2_ref, h_ref,
               *, WP, L1, L2, S1, T0, act1):
    """Two fused 3x3 'same' convs in transposed (channels x flat-space) layout.

    x_ref   : (Cin , M )    bf16 canvas
    mask_ref: (1   , L1)    f32  interior-pixel indicator over the hidden run
    w1_ref  : (hid , 9*Cin) bf16    b1_ref: (hid , 1) f32
    w2_ref  : (cout, 9*hid) bf16    b2_ref: (cout, 1) f32
    h_ref   : (hid , L1)    bf16 VMEM scratch (layer-1 activations)
    Returns (cout, L2) f32 layer-2 pre-activation output run.
    """
    # ---- layer 1: fold the 9 taps into ONE K = 9*Cin matmul ----
    taps = []
    for dh in (-1, 0, 1):
        for dw in (-1, 0, 1):
            off = S1 + dh * WP + dw
            taps.append(x_ref[:, off:off + L1])
    lhs1 = jnp.concatenate(taps, axis=0)                      # (9*Cin, L1) bf16
    h = jnp.dot(w1_ref[...], lhs1, preferred_element_type=jnp.float32)
    h = act1(h + b1_ref[...])                                 # f32 VPU math
    # masking gives exact zero-padding semantics for layer 2; park in VMEM scratch
    h_ref[...] = (h * mask_ref[...]).astype(jnp.bfloat16)

    # ---- layer 2: same fold, reading static ref slices of the scratch ----
    taps2 = []
    for dh in (-1, 0, 1):
        for dw in (-1, 0, 1):
            off = T0 + dh * WP + dw
            taps2.append(h_ref[:, off:off + L2])
    lhs2 = jnp.concatenate(taps2, axis=0)                     # (9*hid, L2) bf16
    return jnp.dot(w2_ref[...], lhs2,
                   preferred_element_type=jnp.float32) + b2_ref[...]


def _generator_kernel(x_ref, mask_ref, w1_ref, b1_ref, w2_ref, b2_ref, o_ref, h_ref,
                      *, WP, L1, L2, S1, T0):
    y = _conv_pair(x_ref, mask_ref, w1_ref, b1_ref, w2_ref, b2_ref, h_ref,
                   WP=WP, L1=L1, L2=L2, S1=S1, T0=T0,
                   act1=lambda v: jnp.maximum(v, 0.0))
    o_ref[...] = jnp.tanh(y)                                  # (cout, L2) lane-dense


def _discriminator_kernel(x_ref, mask_ref, w1_ref, b1_ref, w2_ref, b2_ref, loss_ref,
                          h_ref, *, WP, L1, L2, S1, T0, n_true):
    logits = _conv_pair(x_ref, mask_ref, w1_ref, b1_ref, w2_ref, b2_ref, h_ref,
                        WP=WP, L1=L1, L2=L2, S1=S1, T0=T0, act1=_lrelu)   # (1, L2)
    m2 = mask_ref[:, T0:T0 + L2]             # true-pixel indicator over the output run
    # BCE-with-logits, fused: one softplus, derive the other (softplus(x)=softplus(-x)+x)
    sp_neg = jnp.maximum(-logits, 0.0) + jnp.log1p(jnp.exp(-jnp.abs(logits)))  # vs 1
    sp_pos = sp_neg + logits                                                   # vs 0
    inv_n = 1.0 / float(n_true)
    s_neg = jnp.sum(sp_neg * m2, axis=1, keepdims=True) * inv_n                # (1,1)
    s_pos = jnp.sum(sp_pos * m2, axis=1, keepdims=True) * inv_n
    loss_ref[...] = jnp.concatenate([s_neg, s_pos], axis=1)                    # (1,2)


def _l1_kernel(a_ref, b_ref, o_ref, acc_ref, *, inv_n):
    c = pl.program_id(1)

    @pl.when(c == 0)
    def _():
        acc_ref[...] = jnp.zeros_like(acc_ref)

    acc_ref[...] = acc_ref[...] + jnp.sum(jnp.abs(a_ref[...] - b_ref[...]))

    @pl.when(c == pl.num_programs(1) - 1)
    def _():
        o_ref[...] = acc_ref[...] * inv_n


# ----------------------------------------------------------------------------
# Wrappers (layout glue + pallas_call)
# ----------------------------------------------------------------------------
def _prep_conv_params(params, Cin, hid, cout):
    w1 = params["w1"].reshape(9 * Cin, hid).T.astype(jnp.bfloat16)    # (hid , 9*Cin)
    b1 = params["b1"].reshape(hid, 1).astype(jnp.float32)
    w2 = params["w2"].reshape(9 * hid, cout).T.astype(jnp.bfloat16)   # (cout, 9*hid)
    b2 = params["b2"].reshape(cout, 1).astype(jnp.float32)
    return w1, b1, w2, b2


def _conv_in_specs(Cin, hid, cout, M, L1):
    return [
        pl.BlockSpec((None, Cin, M), lambda b: (b, 0, 0)),      # canvas (per image)
        pl.BlockSpec((1, L1), lambda b: (0, 0)),                # interior mask
        pl.BlockSpec((hid, 9 * Cin), lambda b: (0, 0)),         # w1^T
        pl.BlockSpec((hid, 1), lambda b: (0, 0)),               # b1
        pl.BlockSpec((cout, 9 * hid), lambda b: (0, 0)),        # w2^T
        pl.BlockSpec((cout, 1), lambda b: (0, 0)),              # b2
    ]


def _conv_vmem_bytes(Cin, hid, cout, M, L1, L2):
    bf, f4 = 2, 4
    inputs = Cin * M * bf + L1 * f4 + (hid * 9 * Cin + cout * 9 * hid) * bf \
             + (hid + cout) * f4
    outputs = cout * L2 * f4
    scratch = hid * L1 * bf
    work = (9 * Cin * L1 + 9 * hid * L2) * bf + (hid * L1 + cout * L2) * f4
    return 2 * (inputs + outputs) + scratch + 2 * work


def generator_apply(params, x_nchw):
    """Fused 2-layer generator (conv3x3 -> ReLU -> conv3x3 -> tanh), NCHW -> NCHW."""
    B, Cin, H, W = x_nchw.shape
    hid = params["w1"].shape[-1]
    cout = params["w2"].shape[-1]
    WP, M, L1, L2, S1, T0 = _conv_geometry(H, W)

    x_flat = _make_canvas(x_nchw)
    mask = _interior_mask(H, W)
    w1, b1, w2, b2 = _prep_conv_params(params, Cin, hid, cout)

    out_run = pl.pallas_call(
        functools.partial(_generator_kernel, WP=WP, L1=L1, L2=L2, S1=S1, T0=T0),
        out_shape=jax.ShapeDtypeStruct((B, cout, L2), jnp.float32),
        grid=(B,),
        in_specs=_conv_in_specs(Cin, hid, cout, M, L1),
        out_specs=pl.BlockSpec((None, cout, L2), lambda b: (b, 0, 0)),
        scratch_shapes=[pltpu.VMEM((hid, L1), jnp.bfloat16)],
        compiler_params=pltpu.CompilerParams(
            dimension_semantics=("parallel",),
            vmem_limit_bytes=_vmem_limit(_conv_vmem_bytes(Cin, hid, cout, M, L1, L2))),
    )(x_flat, mask, w1, b1, w2, b2)

    # lane-dense run -> NCHW (drop 4 junk columns per row); one cheap XLA reshape+slice
    return out_run.reshape(B, cout, H, WP)[:, :, :, :W]


def discriminator_apply(params, x_nchw):
    """Fused 2-layer PatchGAN discriminator + BCE-with-logits reductions.

    Returns (B, 1, 2) f32: [:, 0, 0] = mean softplus(-logit)  (BCE vs target 1),
                           [:, 0, 1] = mean softplus(+logit)  (BCE vs target 0).
    """
    B, Cin, H, W = x_nchw.shape
    hid = params["w1"].shape[-1]
    WP, M, L1, L2, S1, T0 = _conv_geometry(H, W)

    x_flat = _make_canvas(x_nchw)
    mask = _interior_mask(H, W)
    w1, b1, w2, b2 = _prep_conv_params(params, Cin, hid, 1)

    return pl.pallas_call(
        functools.partial(_discriminator_kernel, WP=WP, L1=L1, L2=L2, S1=S1, T0=T0,
                          n_true=H * W),
        out_shape=jax.ShapeDtypeStruct((B, 1, 2), jnp.float32),
        grid=(B,),
        in_specs=_conv_in_specs(Cin, hid, 1, M, L1),
        out_specs=pl.BlockSpec((None, 1, 2), lambda b: (b, 0, 0)),
        scratch_shapes=[pltpu.VMEM((hid, L1), jnp.bfloat16)],
        compiler_params=pltpu.CompilerParams(
            dimension_semantics=("parallel",),
            vmem_limit_bytes=_vmem_limit(_conv_vmem_bytes(Cin, hid, 1, M, L1, L2))),
    )(x_flat, mask, w1, b1, w2, b2)


def l1_means(pairs, *, chunk_rows=512):
    """Per-pair mean |a - b| for equally-shaped pairs, one lane-dense chunked call."""
    G = len(pairs)
    n = int(pairs[0][0].size)
    lanes = 128
    rows = -(-n // lanes)
    rows_per_chunk = min(rows, chunk_rows)
    n_chunks = -(-rows // rows_per_chunk)
    rows_pad = n_chunks * rows_per_chunk
    total = rows_pad * lanes

    def prep(x):
        v = x.astype(jnp.float32).reshape(-1)
        v = jnp.pad(v, (0, total - n))            # zero tail: |0 - 0| contributes 0
        return v.reshape(rows_pad, lanes)

    a_all = jnp.stack([prep(a) for a, _ in pairs])
    b_all = jnp.stack([prep(b) for _, b in pairs])

    est = 4 * rows_per_chunk * lanes * 4 * 2      # 2 inputs x 2 buffers x block bytes
    out = pl.pallas_call(
        functools.partial(_l1_kernel, inv_n=1.0 / float(n)),
        out_shape=jax.ShapeDtypeStruct((G, 1, 1), jnp.float32),
        grid=(G, n_chunks),
        in_specs=[pl.BlockSpec((None, rows_per_chunk, lanes), lambda g, c: (g, c, 0)),
                  pl.BlockSpec((None, rows_per_chunk, lanes), lambda g, c: (g, c, 0))],
        out_specs=pl.BlockSpec((None, 1, 1), lambda g, c: (g, 0, 0)),
        scratch_shapes=[pltpu.VMEM((1, 1), jnp.float32)],
        compiler_params=pltpu.CompilerParams(
            dimension_semantics=("parallel", "arbitrary"),
            vmem_limit_bytes=_vmem_limit(est)),
    )(a_all, b_all)
    return out.reshape(G)


# ----------------------------------------------------------------------------
# Parameters
# ----------------------------------------------------------------------------
def init_generator(key, cin, hid):
    k1, k2 = jax.random.split(key)
    return {
        "w1": 0.1 * jax.random.normal(k1, (3, 3, cin, hid), jnp.float32),
        "b1": jnp.zeros((hid,), jnp.float32),
        "w2": 0.1 * jax.random.normal(k2, (3, 3, hid, cin), jnp.float32),
        "b2": jnp.zeros((cin,), jnp.float32),
    }


def init_discriminator(key, cin, hid):
    k1, k2 = jax.random.split(key)
    return {
        "w1": 0.1 * jax.random.normal(k1, (3, 3, cin, hid), jnp.float32),
        "b1": jnp.zeros((hid,), jnp.float32),
        "w2": 0.1 * jax.random.normal(k2, (3, 3, hid, 1), jnp.float32),
        "b2": jnp.zeros((1,), jnp.float32),
    }


# ----------------------------------------------------------------------------
# CycleGAN forward (same composition as the reference module; inputs are NCHW)
# ----------------------------------------------------------------------------
def cyclegan_forward(params, real_monet, real_photo, cycle=10.0):
    real_monet = real_monet.astype(jnp.float32)
    real_photo = real_photo.astype(jnp.float32)
    N = real_monet.shape[0]

    monet_gen, photo_gen = params["monet_gen"], params["photo_gen"]
    monet_dis, photo_dis = params["monet_dis"], params["photo_dis"]

    # Round 1: each generator applied to both real domains in ONE batched call.
    m_out = generator_apply(monet_gen, jnp.concatenate([real_photo, real_monet], axis=0))
    fake_monet, regenerated_monet = m_out[:N], m_out[N:]
    p_out = generator_apply(photo_gen, jnp.concatenate([real_monet, real_photo], axis=0))
    fake_photo, regenerated_photo = p_out[:N], p_out[N:]

    # Round 2: cycle reconstructions (depend on round-1 fakes).
    cycled_monet = generator_apply(monet_gen, fake_photo)
    cycled_photo = generator_apply(photo_gen, fake_monet)

    # Discriminators: real + fake batched per discriminator; BCE reductions fused.
    m_bce = discriminator_apply(monet_dis, jnp.concatenate([real_monet, fake_monet], axis=0))
    p_bce = discriminator_apply(photo_dis, jnp.concatenate([real_photo, fake_photo], axis=0))

    monet_gen_loss = jnp.mean(m_bce[N:, 0, 0])                          # fake vs target 1
    photo_gen_loss = jnp.mean(p_bce[N:, 0, 0])
    monet_dis_loss = 0.5 * (jnp.mean(m_bce[:N, 0, 0]) + jnp.mean(m_bce[N:, 0, 1]))
    photo_dis_loss = 0.5 * (jnp.mean(p_bce[:N, 0, 0]) + jnp.mean(p_bce[N:, 0, 1]))

    # Cycle + identity L1 reductions in one lane-dense kernel.
    l1 = l1_means([(real_monet, cycled_monet), (real_photo, cycled_photo),
                   (real_monet, regenerated_monet), (real_photo, regenerated_photo)])
    total_cycle_loss = cycle * (l1[0] + l1[1])
    identity_monet = 0.5 * cycle * l1[2]
    identity_photo = 0.5 * cycle * l1[3]

    total_monet_gen_loss = monet_gen_loss + total_cycle_loss + identity_monet
    total_photo_gen_loss = photo_gen_loss + total_cycle_loss + identity_photo

    return {
        "monet_gen_loss": total_monet_gen_loss,
        "photo_gen_loss": total_photo_gen_loss,
        "monet_dis_loss": monet_dis_loss,
        "photo_dis_loss": photo_dis_loss,
    }


# ----------------------------------------------------------------------------
# Main
# ----------------------------------------------------------------------------
if __name__ == "__main__":
    N, C, H, W = 2, 4, 16, 16
    HID = 8

    key = jax.random.PRNGKey(0)
    k_monet, k_photo, k_p1, k_p2, k_p3, k_p4 = jax.random.split(key, 6)

    # Inputs in tanh range, NCHW like the PyTorch module expects.
    real_monet = jnp.tanh(jax.random.normal(k_monet, (N, C, H, W), jnp.float32))
    real_photo = jnp.tanh(jax.random.normal(k_photo, (N, C, H, W), jnp.float32))

    params = {
        "monet_gen": init_generator(k_p1, C, HID),
        "photo_gen": init_generator(k_p2, C, HID),
        "monet_dis": init_discriminator(k_p3, C, HID),
        "photo_dis": init_discriminator(k_p4, C, HID),
    }

    fwd = jax.jit(functools.partial(cyclegan_forward, cycle=10.0))
    out = jax.block_until_ready(fwd(params, real_monet, real_photo))

    assert set(out.keys()) == {"monet_gen_loss", "photo_gen_loss",
                               "monet_dis_loss", "photo_dis_loss"}
    assert all(bool(jnp.isfinite(v)) for v in out.values())
    print("KERNEL_OK")
</pallas_src>

<mosaic_0001>
module attributes {stable_mosaic.version = 11 : i64} {
  func.func @_generator_kernel(%arg0: i32, %arg1: memref<1x4x460xbf16, #tpu.memory_space<vmem>>, %arg2: memref<1x380xf32, #tpu.memory_space<vmem>>, %arg3: memref<8x36xbf16, #tpu.memory_space<vmem>>, %arg4: memref<8x1xf32, #tpu.memory_space<vmem>>, %arg5: memref<4x72xbf16, #tpu.memory_space<vmem>>, %arg6: memref<4x1xf32, #tpu.memory_space<vmem>>, %arg7: memref<1x4x320xf32, #tpu.memory_space<vmem>>, %arg8: memref<8x380xbf16, #tpu.memory_space<vmem>>) attributes {dimension_semantics = [#tpu.dimension_semantics<parallel>], iteration_bounds = array<i64: 4>, scalar_prefetch = 0 : i64, scratch_operands = 1 : i64, tpu.core_type = #tpu.core_type<tc>, window_params = [{transform_indices = @transform_0, window_bounds = array<i64: 1, 4, 460>}, {pipeline_mode = #tpu.pipeline_mode<synchronous>, transform_indices = @transform_1, window_bounds = array<i64: 1, 380>}, {pipeline_mode = #tpu.pipeline_mode<synchronous>, transform_indices = @transform_2, window_bounds = array<i64: 8, 36>}, {pipeline_mode = #tpu.pipeline_mode<synchronous>, transform_indices = @transform_3, window_bounds = array<i64: 8, 1>}, {pipeline_mode = #tpu.pipeline_mode<synchronous>, transform_indices = @transform_4, window_bounds = array<i64: 4, 72>}, {pipeline_mode = #tpu.pipeline_mode<synchronous>, transform_indices = @transform_5, window_bounds = array<i64: 4, 1>}, {transform_indices = @transform_6, window_bounds = array<i64: 1, 4, 320>}]} {
    %c0 = arith.constant 0 : index
    %c0_0 = arith.constant 0 : index
    %c19 = arith.constant 19 : index
    %0 = vector.load %arg1[%c0, %c0_0, %c19] : memref<1x4x460xbf16, #tpu.memory_space<vmem>>, vector<1x4x380xbf16>
    %1 = vector.shape_cast %0 : vector<1x4x380xbf16> to vector<4x380xbf16>
    %c0_1 = arith.constant 0 : index
    %c0_2 = arith.constant 0 : index
    %c20 = arith.constant 20 : index
    %2 = vector.load %arg1[%c0_1, %c0_2, %c20] : memref<1x4x460xbf16, #tpu.memory_space<vmem>>, vector<1x4x380xbf16>
    %3 = vector.shape_cast %2 : vector<1x4x380xbf16> to vector<4x380xbf16>
    %c0_3 = arith.constant 0 : index
    %c0_4 = arith.constant 0 : index
    %c21 = arith.constant 21 : index
    %4 = vector.load %arg1[%c0_3, %c0_4, %c21] : memref<1x4x460xbf16, #tpu.memory_space<vmem>>, vector<1x4x380xbf16>
    %5 = vector.shape_cast %4 : vector<1x4x380xbf16> to vector<4x380xbf16>
    %c0_5 = arith.constant 0 : index
    %c0_6 = arith.constant 0 : index
    %c39 = arith.constant 39 : index
    %6 = vector.load %arg1[%c0_5, %c0_6, %c39] : memref<1x4x460xbf16, #tpu.memory_space<vmem>>, vector<1x4x380xbf16>
    %7 = vector.shape_cast %6 : vector<1x4x380xbf16> to vector<4x380xbf16>
    %c0_7 = arith.constant 0 : index
    %c0_8 = arith.constant 0 : index
    %c40 = arith.constant 40 : index
    %8 = vector.load %arg1[%c0_7, %c0_8, %c40] : memref<1x4x460xbf16, #tpu.memory_space<vmem>>, vector<1x4x380xbf16>
    %9 = vector.shape_cast %8 : vector<1x4x380xbf16> to vector<4x380xbf16>
    %c0_9 = arith.constant 0 : index
    %c0_10 = arith.constant 0 : index
    %c41 = arith.constant 41 : index
    %10 = vector.load %arg1[%c0_9, %c0_10, %c41] : memref<1x4x460xbf16, #tpu.memory_space<vmem>>, vector<1x4x380xbf16>
    %11 = vector.shape_cast %10 : vector<1x4x380xbf16> to vector<4x380xbf16>
    %c0_11 = arith.constant 0 : index
    %c0_12 = arith.constant 0 : index
    %c59 = arith.constant 59 : index
    %12 = vector.load %arg1[%c0_11, %c0_12, %c59] : memref<1x4x460xbf16, #tpu.memory_space<vmem>>, vector<1x4x380xbf16>
    %13 = vector.shape_cast %12 : vector<1x4x380xbf16> to vector<4x380xbf16>
    %c0_13 = arith.constant 0 : index
    %c0_14 = arith.constant 0 : index
    %c60 = arith.constant 60 : index
    %14 = vector.load %arg1[%c0_13, %c0_14, %c60] : memref<1x4x460xbf16, #tpu.memory_space<vmem>>, vector<1x4x380xbf16>
    %15 = vector.shape_cast %14 : vector<1x4x380xbf16> to vector<4x380xbf16>
    %c0_15 = arith.constant 0 : index
    %c0_16 = arith.constant 0 : index
    %c61 = arith.constant 61 : index
    %16 = vector.load %arg1[%c0_15, %c0_16, %c61] : memref<1x4x460xbf16, #tpu.memory_space<vmem>>, vector<1x4x380xbf16>
    %17 = vector.shape_cast %16 : vector<1x4x380xbf16> to vector<4x380xbf16>
    %18 = tpu.concatenate %1, %3, %5, %7, %9, %11, %13, %15, %17 in 0 : vector<4x380xbf16>, vector<4x380xbf16>, vector<4x380xbf16>, vector<4x380xbf16>, vector<4x380xbf16>, vector<4x380xbf16>, vector<4x380xbf16>, vector<4x380xbf16>, vector<4x380xbf16> -> vector<36x380xbf16>
    %c0_17 = arith.constant 0 : index
    %c0_18 = arith.constant 0 : index
    %19 = vector.load %arg3[%c0_17, %c0_18] : memref<8x36xbf16, #tpu.memory_space<vmem>>, vector<8x36xbf16>
    %cst = arith.constant dense<0.000000e+00> : vector<8x380xf32>
    %20 = tpu.matmul %19, %18, %cst {dimension_numbers = #tpu.dot_dimension_numbers<[1], [0], [0], [1], [0, 0, 1, 1], [], []>} : vector<8x36xbf16>, vector<36x380xbf16>, vector<8x380xf32> -> vector<8x380xf32>
    %c0_19 = arith.constant 0 : index
    %c0_20 = arith.constant 0 : index
    %21 = vector.load %arg4[%c0_19, %c0_20] : memref<8x1xf32, #tpu.memory_space<vmem>>, vector<8x1xf32>
    %22 = vector.broadcast %21 : vector<8x1xf32> to vector<8x380xf32>
    %23 = arith.addf %20, %22 : vector<8x380xf32>
    %cst_21 = arith.constant 0.000000e+00 : f32
    %24 = vector.broadcast %cst_21 : f32 to vector<8x380xf32>
    %25 = arith.maximumf %23, %24 : vector<8x380xf32>
    %c0_22 = arith.constant 0 : index
    %c0_23 = arith.constant 0 : index
    %26 = vector.load %arg2[%c0_22, %c0_23] : memref<1x380xf32, #tpu.memory_space<vmem>>, vector<1x380xf32>
    %27 = vector.broadcast %26 : vector<1x380xf32> to vector<8x380xf32>
    %28 = arith.mulf %25, %27 : vector<8x380xf32>
    %29 = arith.truncf %28 : vector<8x380xf32> to vector<8x380xbf16>
    %c0_24 = arith.constant 0 : index
    %c0_25 = arith.constant 0 : index
    %30 = vector.load %arg8[%c0_24, %c0_25] : memref<8x380xbf16, #tpu.memory_space<vmem>>, vector<8x380xbf16>
    tpu.vector_store %arg8[%c0_24, %c0_25], %29 {strides = array<i32>} : memref<8x380xbf16, #tpu.memory_space<vmem>>, vector<8x380xbf16>,
    %c0_26 = arith.constant 0 : index
    %c1 = arith.constant 1 : index
    %31 = vector.load %arg8[%c0_26, %c1] : memref<8x380xbf16, #tpu.memory_space<vmem>>, vector<8x320xbf16>
    %c0_27 = arith.constant 0 : index
    %c2 = arith.constant 2 : index
    %32 = vector.load %arg8[%c0_27, %c2] : memref<8x380xbf16, #tpu.memory_space<vmem>>, vector<8x320xbf16>
    %c0_28 = arith.constant 0 : index
    %c3 = arith.constant 3 : index
    %33 = vector.load %arg8[%c0_28, %c3] : memref<8x380xbf16, #tpu.memory_space<vmem>>, vector<8x320xbf16>
    %c0_29 = arith.constant 0 : index
    %c21_30 = arith.constant 21 : index
    %34 = vector.load %arg8[%c0_29, %c21_30] : memref<8x380xbf16, #tpu.memory_space<vmem>>, vector<8x320xbf16>
    %c0_31 = arith.constant 0 : index
    %c22 = arith.constant 22 : index
    %35 = vector.load %arg8[%c0_31, %c22] : memref<8x380xbf16, #tpu.memory_space<vmem>>, vector<8x320xbf16>
    %c0_32 = arith.constant 0 : index
    %c23 = arith.constant 23 : index
    %36 = vector.load %arg8[%c0_32, %c23] : memref<8x380xbf16, #tpu.memory_space<vmem>>, vector<8x320xbf16>
    %c0_33 = arith.constant 0 : index
    %c41_34 = arith.constant 41 : index
    %37 = vector.load %arg8[%c0_33, %c41_34] : memref<8x380xbf16, #tpu.memory_space<vmem>>, vector<8x320xbf16>
    %c0_35 = arith.constant 0 : index
    %c42 = arith.constant 42 : index
    %38 = vector.load %arg8[%c0_35, %c42] : memref<8x380xbf16, #tpu.memory_space<vmem>>, vector<8x320xbf16>
    %c0_36 = arith.constant 0 : index
    %c43 = arith.constant 43 : index
    %39 = vector.load %arg8[%c0_36, %c43] : memref<8x380xbf16, #tpu.memory_space<vmem>>, vector<8x320xbf16>
    %40 = tpu.concatenate %31, %32, %33, %34, %35, %36, %37, %38, %39 in 0 : vector<8x320xbf16>, vector<8x320xbf16>, vector<8x320xbf16>, vector<8x320xbf16>, vector<8x320xbf16>, vector<8x320xbf16>, vector<8x320xbf16>, vector<8x320xbf16>, vector<8x320xbf16> -> vector<72x320xbf16>
    %c0_37 = arith.constant 0 : index
    %c0_38 = arith.constant 0 : index
    %41 = vector.load %arg5[%c0_37, %c0_38] : memref<4x72xbf16, #tpu.memory_space<vmem>>, vector<4x72xbf16>
    %cst_39 = arith.constant dense<0.000000e+00> : vector<4x320xf32>
    %42 = tpu.matmul %41, %40, %cst_39 {dimension_numbers = #tpu.dot_dimension_numbers<[1], [0], [0], [1], [0, 0, 1, 1], [], []>} : vector<4x72xbf16>, vector<72x320xbf16>, vector<4x320xf32> -> vector<4x320xf32>
    %c0_40 = arith.constant 0 : index
    %c0_41 = arith.constant 0 : index
    %43 = vector.load %arg6[%c0_40, %c0_41] : memref<4x1xf32, #tpu.memory_space<vmem>>, vector<4x1xf32>
    %44 = vector.broadcast %43 : vector<4x1xf32> to vector<4x320xf32>
    %45 = arith.addf %42, %44 : vector<4x320xf32>
    %46 = math.tanh %45 : vector<4x320xf32>
    %c0_42 = arith.constant 0 : index
    %c0_43 = arith.constant 0 : index
    %c0_44 = arith.constant 0 : index
    %47 = vector.load %arg7[%c0_42, %c0_43, %c0_44] : memref<1x4x320xf32, #tpu.memory_space<vmem>>, vector<1x4x320xf32>
    %48 = vector.shape_cast %47 : vector<1x4x320xf32> to vector<4x320xf32>
    %49 = vector.shape_cast %46 : vector<4x320xf32> to vector<1x4x320xf32>
    tpu.vector_store %arg7[%c0_42, %c0_43, %c0_44], %49 {strides = array<i32>} : memref<1x4x320xf32, #tpu.memory_space<vmem>>, vector<1x4x320xf32>,
    return
  }
  func.func @transform_0(%arg0: i32) -> (i32, i32, i32) {
    %c0_i32 = arith.constant 0 : i32
    %c0_i32_0 = arith.constant 0 : i32
    %c0_i32_1 = arith.constant 0 : i32
    return %arg0, %c0_i32, %c0_i32_0 : i32, i32, i32
  }
  func.func @transform_1(%arg0: i32) -> (i32, i32) {
    %c0_i32 = arith.constant 0 : i32
    %c0_i32_0 = arith.constant 0 : i32
    %c0_i32_1 = arith.constant 0 : i32
    return %c0_i32, %c0_i32_0 : i32, i32
  }
  func.func @transform_2(%arg0: i32) -> (i32, i32) {
    %c0_i32 = arith.constant 0 : i32
    %c0_i32_0 = arith.constant 0 : i32
    %c0_i32_1 = arith.constant 0 : i32
    return %c0_i32, %c0_i32_0 : i32, i32
  }
  func.func @transform_3(%arg0: i32) -> (i32, i32) {
    %c0_i32 = arith.constant 0 : i32
    %c0_i32_0 = arith.constant 0 : i32
    %c0_i32_1 = arith.constant 0 : i32
    return %c0_i32, %c0_i32_0 : i32, i32
  }
  func.func @transform_4(%arg0: i32) -> (i32, i32) {
    %c0_i32 = arith.constant 0 : i32
    %c0_i32_0 = arith.constant 0 : i32
    %c0_i32_1 = arith.constant 0 : i32
    return %c0_i32, %c0_i32_0 : i32, i32
  }
  func.func @transform_5(%arg0: i32) -> (i32, i32) {
    %c0_i32 = arith.constant 0 : i32
    %c0_i32_0 = arith.constant 0 : i32
    %c0_i32_1 = arith.constant 0 : i32
    return %c0_i32, %c0_i32_0 : i32, i32
  }
  func.func @transform_6(%arg0: i32) -> (i32, i32, i32) {
    %c0_i32 = arith.constant 0 : i32
    %c0_i32_0 = arith.constant 0 : i32
    %c0_i32_1 = arith.constant 0 : i32
    return %arg0, %c0_i32, %c0_i32_0 : i32, i32, i32
  }
}

module attributes {stable_mosaic.version = 11 : i64} {
  func.func @_generator_kernel(%arg0: i32, %arg1: memref<1x4x460xbf16, #tpu.memory_space<vmem>>, %arg2: memref<1x380xf32, #tpu.memory_space<vmem>>, %arg3: memref<8x36xbf16, #tpu.memory_space<vmem>>, %arg4: memref<8x1xf32, #tpu.memory_space<vmem>>, %arg5: memref<4x72xbf16, #tpu.memory_space<vmem>>, %arg6: memref<4x1xf32, #tpu.memory_space<vmem>>, %arg7: memref<1x4x320xf32, #tpu.memory_space<vmem>>, %arg8: memref<8x380xbf16, #tpu.memory_space<vmem>>) attributes {dimension_semantics = [#tpu.dimension_semantics<parallel>], iteration_bounds = array<i64: 2>, scalar_prefetch = 0 : i64, scratch_operands = 1 : i64, tpu.core_type = #tpu.core_type<tc>, window_params = [{transform_indices = @transform_0, window_bounds = array<i64: 1, 4, 460>}, {pipeline_mode = #tpu.pipeline_mode<synchronous>, transform_indices = @transform_1, window_bounds = array<i64: 1, 380>}, {pipeline_mode = #tpu.pipeline_mode<synchronous>, transform_indices = @transform_2, window_bounds = array<i64: 8, 36>}, {pipeline_mode = #tpu.pipeline_mode<synchronous>, transform_indices = @transform_3, window_bounds = array<i64: 8, 1>}, {pipeline_mode = #tpu.pipeline_mode<synchronous>, transform_indices = @transform_4, window_bounds = array<i64: 4, 72>}, {pipeline_mode = #tpu.pipeline_mode<synchronous>, transform_indices = @transform_5, window_bounds = array<i64: 4, 1>}, {transform_indices = @transform_6, window_bounds = array<i64: 1, 4, 320>}]} {
    %c0 = arith.constant 0 : index
    %c0_0 = arith.constant 0 : index
    %c19 = arith.constant 19 : index
    %0 = vector.load %arg1[%c0, %c0_0, %c19] : memref<1x4x460xbf16, #tpu.memory_space<vmem>>, vector<1x4x380xbf16>
    %1 = vector.shape_cast %0 : vector<1x4x380xbf16> to vector<4x380xbf16>
    %c0_1 = arith.constant 0 : index
    %c0_2 = arith.constant 0 : index
    %c20 = arith.constant 20 : index
    %2 = vector.load %arg1[%c0_1, %c0_2, %c20] : memref<1x4x460xbf16, #tpu.memory_space<vmem>>, vector<1x4x380xbf16>
    %3 = vector.shape_cast %2 : vector<1x4x380xbf16> to vector<4x380xbf16>
    %c0_3 = arith.constant 0 : index
    %c0_4 = arith.constant 0 : index
    %c21 = arith.constant 21 : index
    %4 = vector.load %arg1[%c0_3, %c0_4, %c21] : memref<1x4x460xbf16, #tpu.memory_space<vmem>>, vector<1x4x380xbf16>
    %5 = vector.shape_cast %4 : vector<1x4x380xbf16> to vector<4x380xbf16>
    %c0_5 = arith.constant 0 : index
    %c0_6 = arith.constant 0 : index
    %c39 = arith.constant 39 : index
    %6 = vector.load %arg1[%c0_5, %c0_6, %c39] : memref<1x4x460xbf16, #tpu.memory_space<vmem>>, vector<1x4x380xbf16>
    %7 = vector.shape_cast %6 : vector<1x4x380xbf16> to vector<4x380xbf16>
    %c0_7 = arith.constant 0 : index
    %c0_8 = arith.constant 0 : index
    %c40 = arith.constant 40 : index
    %8 = vector.load %arg1[%c0_7, %c0_8, %c40] : memref<1x4x460xbf16, #tpu.memory_space<vmem>>, vector<1x4x380xbf16>
    %9 = vector.shape_cast %8 : vector<1x4x380xbf16> to vector<4x380xbf16>
    %c0_9 = arith.constant 0 : index
    %c0_10 = arith.constant 0 : index
    %c41 = arith.constant 41 : index
    %10 = vector.load %arg1[%c0_9, %c0_10, %c41] : memref<1x4x460xbf16, #tpu.memory_space<vmem>>, vector<1x4x380xbf16>
    %11 = vector.shape_cast %10 : vector<1x4x380xbf16> to vector<4x380xbf16>
    %c0_11 = arith.constant 0 : index
    %c0_12 = arith.constant 0 : index
    %c59 = arith.constant 59 : index
    %12 = vector.load %arg1[%c0_11, %c0_12, %c59] : memref<1x4x460xbf16, #tpu.memory_space<vmem>>, vector<1x4x380xbf16>
    %13 = vector.shape_cast %12 : vector<1x4x380xbf16> to vector<4x380xbf16>
    %c0_13 = arith.constant 0 : index
    %c0_14 = arith.constant 0 : index
    %c60 = arith.constant 60 : index
    %14 = vector.load %arg1[%c0_13, %c0_14, %c60] : memref<1x4x460xbf16, #tpu.memory_space<vmem>>, vector<1x4x380xbf16>
    %15 = vector.shape_cast %14 : vector<1x4x380xbf16> to vector<4x380xbf16>
    %c0_15 = arith.constant 0 : index
    %c0_16 = arith.constant 0 : index
    %c61 = arith.constant 61 : index
    %16 = vector.load %arg1[%c0_15, %c0_16, %c61] : memref<1x4x460xbf16, #tpu.memory_space<vmem>>, vector<1x4x380xbf16>
    %17 = vector.shape_cast %16 : vector<1x4x380xbf16> to vector<4x380xbf16>
    %18 = tpu.concatenate %1, %3, %5, %7, %9, %11, %13, %15, %17 in 0 : vector<4x380xbf16>, vector<4x380xbf16>, vector<4x380xbf16>, vector<4x380xbf16>, vector<4x380xbf16>, vector<4x380xbf16>, vector<4x380xbf16>, vector<4x380xbf16>, vector<4x380xbf16> -> vector<36x380xbf16>
    %c0_17 = arith.constant 0 : index
    %c0_18 = arith.constant 0 : index
    %19 = vector.load %arg3[%c0_17, %c0_18] : memref<8x36xbf16, #tpu.memory_space<vmem>>, vector<8x36xbf16>
    %cst = arith.constant dense<0.000000e+00> : vector<8x380xf32>
    %20 = tpu.matmul %19, %18, %cst {dimension_numbers = #tpu.dot_dimension_numbers<[1], [0], [0], [1], [0, 0, 1, 1], [], []>} : vector<8x36xbf16>, vector<36x380xbf16>, vector<8x380xf32> -> vector<8x380xf32>
    %c0_19 = arith.constant 0 : index
    %c0_20 = arith.constant 0 : index
    %21 = vector.load %arg4[%c0_19, %c0_20] : memref<8x1xf32, #tpu.memory_space<vmem>>, vector<8x1xf32>
    %22 = vector.broadcast %21 : vector<8x1xf32> to vector<8x380xf32>
    %23 = arith.addf %20, %22 : vector<8x380xf32>
    %cst_21 = arith.constant 0.000000e+00 : f32
    %24 = vector.broadcast %cst_21 : f32 to vector<8x380xf32>
    %25 = arith.maximumf %23, %24 : vector<8x380xf32>
    %c0_22 = arith.constant 0 : index
    %c0_23 = arith.constant 0 : index
    %26 = vector.load %arg2[%c0_22, %c0_23] : memref<1x380xf32, #tpu.memory_space<vmem>>, vector<1x380xf32>
    %27 = vector.broadcast %26 : vector<1x380xf32> to vector<8x380xf32>
    %28 = arith.mulf %25, %27 : vector<8x380xf32>
    %29 = arith.truncf %28 : vector<8x380xf32> to vector<8x380xbf16>
    %c0_24 = arith.constant 0 : index
    %c0_25 = arith.constant 0 : index
    %30 = vector.load %arg8[%c0_24, %c0_25] : memref<8x380xbf16, #tpu.memory_space<vmem>>, vector<8x380xbf16>
    tpu.vector_store %arg8[%c0_24, %c0_25], %29 {strides = array<i32>} : memref<8x380xbf16, #tpu.memory_space<vmem>>, vector<8x380xbf16>,
    %c0_26 = arith.constant 0 : index
    %c1 = arith.constant 1 : index
    %31 = vector.load %arg8[%c0_26, %c1] : memref<8x380xbf16, #tpu.memory_space<vmem>>, vector<8x320xbf16>
    %c0_27 = arith.constant 0 : index
    %c2 = arith.constant 2 : index
    %32 = vector.load %arg8[%c0_27, %c2] : memref<8x380xbf16, #tpu.memory_space<vmem>>, vector<8x320xbf16>
    %c0_28 = arith.constant 0 : index
    %c3 = arith.constant 3 : index
    %33 = vector.load %arg8[%c0_28, %c3] : memref<8x380xbf16, #tpu.memory_space<vmem>>, vector<8x320xbf16>
    %c0_29 = arith.constant 0 : index
    %c21_30 = arith.constant 21 : index
    %34 = vector.load %arg8[%c0_29, %c21_30] : memref<8x380xbf16, #tpu.memory_space<vmem>>, vector<8x320xbf16>
    %c0_31 = arith.constant 0 : index
    %c22 = arith.constant 22 : index
    %35 = vector.load %arg8[%c0_31, %c22] : memref<8x380xbf16, #tpu.memory_space<vmem>>, vector<8x320xbf16>
    %c0_32 = arith.constant 0 : index
    %c23 = arith.constant 23 : index
    %36 = vector.load %arg8[%c0_32, %c23] : memref<8x380xbf16, #tpu.memory_space<vmem>>, vector<8x320xbf16>
    %c0_33 = arith.constant 0 : index
    %c41_34 = arith.constant 41 : index
    %37 = vector.load %arg8[%c0_33, %c41_34] : memref<8x380xbf16, #tpu.memory_space<vmem>>, vector<8x320xbf16>
    %c0_35 = arith.constant 0 : index
    %c42 = arith.constant 42 : index
    %38 = vector.load %arg8[%c0_35, %c42] : memref<8x380xbf16, #tpu.memory_space<vmem>>, vector<8x320xbf16>
    %c0_36 = arith.constant 0 : index
    %c43 = arith.constant 43 : index
    %39 = vector.load %arg8[%c0_36, %c43] : memref<8x380xbf16, #tpu.memory_space<vmem>>, vector<8x320xbf16>
    %40 = tpu.concatenate %31, %32, %33, %34, %35, %36, %37, %38, %39 in 0 : vector<8x320xbf16>, vector<8x320xbf16>, vector<8x320xbf16>, vector<8x320xbf16>, vector<8x320xbf16>, vector<8x320xbf16>, vector<8x320xbf16>, vector<8x320xbf16>, vector<8x320xbf16> -> vector<72x320xbf16>
    %c0_37 = arith.constant 0 : index
    %c0_38 = arith.constant 0 : index
    %41 = vector.load %arg5[%c0_37, %c0_38] : memref<4x72xbf16, #tpu.memory_space<vmem>>, vector<4x72xbf16>
    %cst_39 = arith.constant dense<0.000000e+00> : vector<4x320xf32>
    %42 = tpu.matmul %41, %40, %cst_39 {dimension_numbers = #tpu.dot_dimension_numbers<[1], [0], [0], [1], [0, 0, 1, 1], [], []>} : vector<4x72xbf16>, vector<72x320xbf16>, vector<4x320xf32> -> vector<4x320xf32>
    %c0_40 = arith.constant 0 : index
    %c0_41 = arith.constant 0 : index
    %43 = vector.load %arg6[%c0_40, %c0_41] : memref<4x1xf32, #tpu.memory_space<vmem>>, vector<4x1xf32>
    %44 = vector.broadcast %43 : vector<4x1xf32> to vector<4x320xf32>
    %45 = arith.addf %42, %44 : vector<4x320xf32>
    %46 = math.tanh %45 : vector<4x320xf32>
    %c0_42 = arith.constant 0 : index
    %c0_43 = arith.constant 0 : index
    %c0_44 = arith.constant 0 : index
    %47 = vector.load %arg7[%c0_42, %c0_43, %c0_44] : memref<1x4x320xf32, #tpu.memory_space<vmem>>, vector<1x4x320xf32>
    %48 = vector.shape_cast %47 : vector<1x4x320xf32> to vector<4x320xf32>
    %49 = vector.shape_cast %46 : vector<4x320xf32> to vector<1x4x320xf32>
    tpu.vector_store %arg7[%c0_42, %c0_43, %c0_44], %49 {strides = array<i32>} : memref<1x4x320xf32, #tpu.memory_space<vmem>>, vector<1x4x320xf32>,
    return
  }
  func.func @transform_0(%arg0: i32) -> (i32, i32, i32) {
    %c0_i32 = arith.constant 0 : i32
    %c0_i32_0 = arith.constant 0 : i32
    %c0_i32_1 = arith.constant 0 : i32
    return %arg0, %c0_i32, %c0_i32_0 : i32, i32, i32
  }
  func.func @transform_1(%arg0: i32) -> (i32, i32) {
    %c0_i32 = arith.constant 0 : i32
    %c0_i32_0 = arith.constant 0 : i32
    %c0_i32_1 = arith.constant 0 : i32
    return %c0_i32, %c0_i32_0 : i32, i32
  }
  func.func @transform_2(%arg0: i32) -> (i32, i32) {
    %c0_i32 = arith.constant 0 : i32
    %c0_i32_0 = arith.constant 0 : i32
    %c0_i32_1 = arith.constant 0 : i32
    return %c0_i32, %c0_i32_0 : i32, i32
  }
  func.func @transform_3(%arg0: i32) -> (i32, i32) {
    %c0_i32 = arith.constant 0 : i32
    %c0_i32_0 = arith.constant 0 : i32
    %c0_i32_1 = arith.constant 0 : i32
    return %c0_i32, %c0_i32_0 : i32, i32
  }
  func.func @transform_4(%arg0: i32) -> (i32, i32) {
    %c0_i32 = arith.constant 0 : i32
    %c0_i32_0 = arith.constant 0 : i32
    %c0_i32_1 = arith.constant 0 : i32
    return %c0_i32, %c0_i32_0 : i32, i32
  }
  func.func @transform_5(%arg0: i32) -> (i32, i32) {
    %c0_i32 = arith.constant 0 : i32
    %c0_i32_0 = arith.constant 0 : i32
    %c0_i32_1 = arith.constant 0 : i32
    return %c0_i32, %c0_i32_0 : i32, i32
  }
  func.func @transform_6(%arg0: i32) -> (i32, i32, i32) {
    %c0_i32 = arith.constant 0 : i32
    %c0_i32_0 = arith.constant 0 : i32
    %c0_i32_1 = arith.constant 0 : i32
    return %arg0, %c0_i32, %c0_i32_0 : i32, i32, i32
  }
}

module attributes {stable_mosaic.version = 11 : i64} {
  func.func @_discriminator_kernel(%arg0: i32, %arg1: memref<1x4x460xbf16, #tpu.memory_space<vmem>>, %arg2: memref<1x380xf32, #tpu.memory_space<vmem>>, %arg3: memref<8x36xbf16, #tpu.memory_space<vmem>>, %arg4: memref<8x1xf32, #tpu.memory_space<vmem>>, %arg5: memref<1x72xbf16, #tpu.memory_space<vmem>>, %arg6: memref<1x1xf32, #tpu.memory_space<vmem>>, %arg7: memref<1x1x2xf32, #tpu.memory_space<vmem>>, %arg8: memref<8x380xbf16, #tpu.memory_space<vmem>>) attributes {dimension_semantics = [#tpu.dimension_semantics<parallel>], iteration_bounds = array<i64: 4>, scalar_prefetch = 0 : i64, scratch_operands = 1 : i64, tpu.core_type = #tpu.core_type<tc>, window_params = [{transform_indices = @transform_0, window_bounds = array<i64: 1, 4, 460>}, {pipeline_mode = #tpu.pipeline_mode<synchronous>, transform_indices = @transform_1, window_bounds = array<i64: 1, 380>}, {pipeline_mode = #tpu.pipeline_mode<synchronous>, transform_indices = @transform_2, window_bounds = array<i64: 8, 36>}, {pipeline_mode = #tpu.pipeline_mode<synchronous>, transform_indices = @transform_3, window_bounds = array<i64: 8, 1>}, {pipeline_mode = #tpu.pipeline_mode<synchronous>, transform_indices = @transform_4, window_bounds = array<i64: 1, 72>}, {pipeline_mode = #tpu.pipeline_mode<synchronous>, transform_indices = @transform_5, window_bounds = array<i64: 1, 1>}, {transform_indices = @transform_6, window_bounds = array<i64: 1, 1, 2>}]} {
    %c0 = arith.constant 0 : index
    %c0_0 = arith.constant 0 : index
    %c19 = arith.constant 19 : index
    %0 = vector.load %arg1[%c0, %c0_0, %c19] : memref<1x4x460xbf16, #tpu.memory_space<vmem>>, vector<1x4x380xbf16>
    %1 = vector.shape_cast %0 : vector<1x4x380xbf16> to vector<4x380xbf16>
    %c0_1 = arith.constant 0 : index
    %c0_2 = arith.constant 0 : index
    %c20 = arith.constant 20 : index
    %2 = vector.load %arg1[%c0_1, %c0_2, %c20] : memref<1x4x460xbf16, #tpu.memory_space<vmem>>, vector<1x4x380xbf16>
    %3 = vector.shape_cast %2 : vector<1x4x380xbf16> to vector<4x380xbf16>
    %c0_3 = arith.constant 0 : index
    %c0_4 = arith.constant 0 : index
    %c21 = arith.constant 21 : index
    %4 = vector.load %arg1[%c0_3, %c0_4, %c21] : memref<1x4x460xbf16, #tpu.memory_space<vmem>>, vector<1x4x380xbf16>
    %5 = vector.shape_cast %4 : vector<1x4x380xbf16> to vector<4x380xbf16>
    %c0_5 = arith.constant 0 : index
    %c0_6 = arith.constant 0 : index
    %c39 = arith.constant 39 : index
    %6 = vector.load %arg1[%c0_5, %c0_6, %c39] : memref<1x4x460xbf16, #tpu.memory_space<vmem>>, vector<1x4x380xbf16>
    %7 = vector.shape_cast %6 : vector<1x4x380xbf16> to vector<4x380xbf16>
    %c0_7 = arith.constant 0 : index
    %c0_8 = arith.constant 0 : index
    %c40 = arith.constant 40 : index
    %8 = vector.load %arg1[%c0_7, %c0_8, %c40] : memref<1x4x460xbf16, #tpu.memory_space<vmem>>, vector<1x4x380xbf16>
    %9 = vector.shape_cast %8 : vector<1x4x380xbf16> to vector<4x380xbf16>
    %c0_9 = arith.constant 0 : index
    %c0_10 = arith.constant 0 : index
    %c41 = arith.constant 41 : index
    %10 = vector.load %arg1[%c0_9, %c0_10, %c41] : memref<1x4x460xbf16, #tpu.memory_space<vmem>>, vector<1x4x380xbf16>
    %11 = vector.shape_cast %10 : vector<1x4x380xbf16> to vector<4x380xbf16>
    %c0_11 = arith.constant 0 : index
    %c0_12 = arith.constant 0 : index
    %c59 = arith.constant 59 : index
    %12 = vector.load %arg1[%c0_11, %c0_12, %c59] : memref<1x4x460xbf16, #tpu.memory_space<vmem>>, vector<1x4x380xbf16>
    %13 = vector.shape_cast %12 : vector<1x4x380xbf16> to vector<4x380xbf16>
    %c0_13 = arith.constant 0 : index
    %c0_14 = arith.constant 0 : index
    %c60 = arith.constant 60 : index
    %14 = vector.load %arg1[%c0_13, %c0_14, %c60] : memref<1x4x460xbf16, #tpu.memory_space<vmem>>, vector<1x4x380xbf16>
    %15 = vector.shape_cast %14 : vector<1x4x380xbf16> to vector<4x380xbf16>
    %c0_15 = arith.constant 0 : index
    %c0_16 = arith.constant 0 : index
    %c61 = arith.constant 61 : index
    %16 = vector.load %arg1[%c0_15, %c0_16, %c61] : memref<1x4x460xbf16, #tpu.memory_space<vmem>>, vector<1x4x380xbf16>
    %17 = vector.shape_cast %16 : vector<1x4x380xbf16> to vector<4x380xbf16>
    %18 = tpu.concatenate %1, %3, %5, %7, %9, %11, %13, %15, %17 in 0 : vector<4x380xbf16>, vector<4x380xbf16>, vector<4x380xbf16>, vector<4x380xbf16>, vector<4x380xbf16>, vector<4x380xbf16>, vector<4x380xbf16>, vector<4x380xbf16>, vector<4x380xbf16> -> vector<36x380xbf16>
    %c0_17 = arith.constant 0 : index
    %c0_18 = arith.constant 0 : index
    %19 = vector.load %arg3[%c0_17, %c0_18] : memref<8x36xbf16, #tpu.memory_space<vmem>>, vector<8x36xbf16>
    %cst = arith.constant dense<0.000000e+00> : vector<8x380xf32>
    %20 = tpu.matmul %19, %18, %cst {dimension_numbers = #tpu.dot_dimension_numbers<[1], [0], [0], [1], [0, 0, 1, 1], [], []>} : vector<8x36xbf16>, vector<36x380xbf16>, vector<8x380xf32> -> vector<8x380xf32>
    %c0_19 = arith.constant 0 : index
    %c0_20 = arith.constant 0 : index
    %21 = vector.load %arg4[%c0_19, %c0_20] : memref<8x1xf32, #tpu.memory_space<vmem>>, vector<8x1xf32>
    %22 = vector.broadcast %21 : vector<8x1xf32> to vector<8x380xf32>
    %23 = arith.addf %20, %22 : vector<8x380xf32>
    %cst_21 = arith.constant 0.000000e+00 : f32
    %24 = vector.broadcast %cst_21 : f32 to vector<8x380xf32>
    %25 = arith.cmpf ogt, %23, %24 : vector<8x380xf32>
    %cst_22 = arith.constant 2.000000e-01 : f32
    %26 = vector.broadcast %cst_22 : f32 to vector<8x380xf32>
    %27 = arith.mulf %26, %23 : vector<8x380xf32>
    %28 = arith.select %25, %23, %27 : vector<8x380xi1>, vector<8x380xf32>
    %c0_23 = arith.constant 0 : index
    %c0_24 = arith.constant 0 : index
    %29 = vector.load %arg2[%c0_23, %c0_24] : memref<1x380xf32, #tpu.memory_space<vmem>>, vector<1x380xf32>
    %30 = vector.broadcast %29 : vector<1x380xf32> to vector<8x380xf32>
    %31 = arith.mulf %28, %30 : vector<8x380xf32>
    %32 = arith.truncf %31 : vector<8x380xf32> to vector<8x380xbf16>
    %c0_25 = arith.constant 0 : index
    %c0_26 = arith.constant 0 : index
    %33 = vector.load %arg8[%c0_25, %c0_26] : memref<8x380xbf16, #tpu.memory_space<vmem>>, vector<8x380xbf16>
    tpu.vector_store %arg8[%c0_25, %c0_26], %32 {strides = array<i32>} : memref<8x380xbf16, #tpu.memory_space<vmem>>, vector<8x380xbf16>,
    %c0_27 = arith.constant 0 : index
    %c1 = arith.constant 1 : index
    %34 = vector.load %arg8[%c0_27, %c1] : memref<8x380xbf16, #tpu.memory_space<vmem>>, vector<8x320xbf16>
    %c0_28 = arith.constant 0 : index
    %c2 = arith.constant 2 : index
    %35 = vector.load %arg8[%c0_28, %c2] : memref<8x380xbf16, #tpu.memory_space<vmem>>, vector<8x320xbf16>
    %c0_29 = arith.constant 0 : index
    %c3 = arith.constant 3 : index
    %36 = vector.load %arg8[%c0_29, %c3] : memref<8x380xbf16, #tpu.memory_space<vmem>>, vector<8x320xbf16>
    %c0_30 = arith.constant 0 : index
    %c21_31 = arith.constant 21 : index
    %37 = vector.load %arg8[%c0_30, %c21_31] : memref<8x380xbf16, #tpu.memory_space<vmem>>, vector<8x320xbf16>
    %c0_32 = arith.constant 0 : index
    %c22 = arith.constant 22 : index
    %38 = vector.load %arg8[%c0_32, %c22] : memref<8x380xbf16, #tpu.memory_space<vmem>>, vector<8x320xbf16>
    %c0_33 = arith.constant 0 : index
    %c23 = arith.constant 23 : index
    %39 = vector.load %arg8[%c0_33, %c23] : memref<8x380xbf16, #tpu.memory_space<vmem>>, vector<8x320xbf16>
    %c0_34 = arith.constant 0 : index
    %c41_35 = arith.constant 41 : index
    %40 = vector.load %arg8[%c0_34, %c41_35] : memref<8x380xbf16, #tpu.memory_space<vmem>>, vector<8x320xbf16>
    %c0_36 = arith.constant 0 : index
    %c42 = arith.constant 42 : index
    %41 = vector.load %arg8[%c0_36, %c42] : memref<8x380xbf16, #tpu.memory_space<vmem>>, vector<8x320xbf16>
    %c0_37 = arith.constant 0 : index
    %c43 = arith.constant 43 : index
    %42 = vector.load %arg8[%c0_37, %c43] : memref<8x380xbf16, #tpu.memory_space<vmem>>, vector<8x320xbf16>
    %43 = tpu.concatenate %34, %35, %36, %37, %38, %39, %40, %41, %42 in 0 : vector<8x320xbf16>, vector<8x320xbf16>, vector<8x320xbf16>, vector<8x320xbf16>, vector<8x320xbf16>, vector<8x320xbf16>, vector<8x320xbf16>, vector<8x320xbf16>, vector<8x320xbf16> -> vector<72x320xbf16>
    %c0_38 = arith.constant 0 : index
    %c0_39 = arith.constant 0 : index
    %44 = vector.load %arg5[%c0_38, %c0_39] : memref<1x72xbf16, #tpu.memory_space<vmem>>, vector<1x72xbf16>
    %cst_40 = arith.constant dense<0.000000e+00> : vector<1x320xf32>
    %45 = tpu.matmul %44, %43, %cst_40 {dimension_numbers = #tpu.dot_dimension_numbers<[1], [0], [0], [1], [0, 0, 1, 1], [], []>} : vector<1x72xbf16>, vector<72x320xbf16>, vector<1x320xf32> -> vector<1x320xf32>
    %c0_41 = arith.constant 0 : index
    %c0_42 = arith.constant 0 : index
    %46 = vector.load %arg6[%c0_41, %c0_42] : memref<1x1xf32, #tpu.memory_space<vmem>>, vector<1x1xf32>
    %47 = vector.broadcast %46 : vector<1x1xf32> to vector<1x320xf32>
    %48 = arith.addf %45, %47 : vector<1x320xf32>
    %c0_43 = arith.constant 0 : index
    %c22_44 = arith.constant 22 : index
    %49 = vector.load %arg2[%c0_43, %c22_44] : memref<1x380xf32, #tpu.memory_space<vmem>>, vector<1x320xf32>
    %cst_45 = arith.constant 0.000000e+00 : f32
    %50 = vector.broadcast %cst_45 : f32 to vector<1x320xf32>
    %51 = arith.subf %50, %48 : vector<1x320xf32>
    %cst_46 = arith.constant 0.000000e+00 : f32
    %52 = vector.broadcast %cst_46 : f32 to vector<1x320xf32>
    %53 = arith.maximumf %51, %52 : vector<1x320xf32>
    %54 = math.absf %48 : vector<1x320xf32>
    %cst_47 = arith.constant 0.000000e+00 : f32
    %55 = vector.broadcast %cst_47 : f32 to vector<1x320xf32>
    %56 = arith.subf %55, %54 : vector<1x320xf32>
    %57 = math.exp %56 : vector<1x320xf32>
    %58 = math.log1p %57 : vector<1x320xf32>
    %59 = arith.addf %53, %58 : vector<1x320xf32>
    %60 = arith.addf %59, %48 : vector<1x320xf32>
    %61 = arith.mulf %59, %49 : vector<1x320xf32>
    %cst_48 = arith.constant dense<0.000000e+00> : vector<1xf32>
    %62 = vector.multi_reduction <add>, %61, %cst_48 [1] : vector<1x320xf32> to vector<1xf32>
    %63 = vector.shape_cast %62 : vector<1xf32> to vector<1x1xf32>
    %cst_49 = arith.constant 3.906250e-03 : f32
    %64 = vector.broadcast %cst_49 : f32 to vector<1x1xf32>
    %65 = arith.mulf %63, %64 : vector<1x1xf32>
    %66 = arith.mulf %60, %49 : vector<1x320xf32>
    %cst_50 = arith.constant dense<0.000000e+00> : vector<1xf32>
    %67 = vector.multi_reduction <add>, %66, %cst_50 [1] : vector<1x320xf32> to vector<1xf32>
    %68 = vector.shape_cast %67 : vector<1xf32> to vector<1x1xf32>
    %cst_51 = arith.constant 3.906250e-03 : f32
    %69 = vector.broadcast %cst_51 : f32 to vector<1x1xf32>
    %70 = arith.mulf %68, %69 : vector<1x1xf32>
    %71 = tpu.concatenate %65, %70 in 1 : vector<1x1xf32>, vector<1x1xf32> -> vector<1x2xf32>
    %c0_52 = arith.constant 0 : index
    %c0_53 = arith.constant 0 : index
    %c0_54 = arith.constant 0 : index
    %72 = vector.load %arg7[%c0_52, %c0_53, %c0_54] : memref<1x1x2xf32, #tpu.memory_space<vmem>>, vector<1x1x2xf32>
    %73 = vector.shape_cast %72 : vector<1x1x2xf32> to vector<1x2xf32>
    %74 = vector.shape_cast %71 : vector<1x2xf32> to vector<1x1x2xf32>
    tpu.vector_store %arg7[%c0_52, %c0_53, %c0_54], %74 {strides = array<i32>} : memref<1x1x2xf32, #tpu.memory_space<vmem>>, vector<1x1x2xf32>,
    return
  }
  func.func @transform_0(%arg0: i32) -> (i32, i32, i32) {
    %c0_i32 = arith.constant 0 : i32
    %c0_i32_0 = arith.constant 0 : i32
    %c0_i32_1 = arith.constant 0 : i32
    return %arg0, %c0_i32, %c0_i32_0 : i32, i32, i32
  }
  func.func @transform_1(%arg0: i32) -> (i32, i32) {
    %c0_i32 = arith.constant 0 : i32
    %c0_i32_0 = arith.constant 0 : i32
    %c0_i32_1 = arith.constant 0 : i32
    return %c0_i32, %c0_i32_0 : i32, i32
  }
  func.func @transform_2(%arg0: i32) -> (i32, i32) {
    %c0_i32 = arith.constant 0 : i32
    %c0_i32_0 = arith.constant 0 : i32
    %c0_i32_1 = arith.constant 0 : i32
    return %c0_i32, %c0_i32_0 : i32, i32
  }
  func.func @transform_3(%arg0: i32) -> (i32, i32) {
    %c0_i32 = arith.constant 0 : i32
    %c0_i32_0 = arith.constant 0 : i32
    %c0_i32_1 = arith.constant 0 : i32
    return %c0_i32, %c0_i32_0 : i32, i32
  }
  func.func @transform_4(%arg0: i32) -> (i32, i32) {
    %c0_i32 = arith.constant 0 : i32
    %c0_i32_0 = arith.constant 0 : i32
    %c0_i32_1 = arith.constant 0 : i32
    return %c0_i32, %c0_i32_0 : i32, i32
  }
  func.func @transform_5(%arg0: i32) -> (i32, i32) {
    %c0_i32 = arith.constant 0 : i32
    %c0_i32_0 = arith.constant 0 : i32
    %c0_i32_1 = arith.constant 0 : i32
    return %c0_i32, %c0_i32_0 : i32, i32
  }
  func.func @transform_6(%arg0: i32) -> (i32, i32, i32) {
    %c0_i32 = arith.constant 0 : i32
    %c0_i32_0 = arith.constant 0 : i32
    %c0_i32_1 = arith.constant 0 : i32
    return %arg0, %c0_i32, %c0_i32_0 : i32, i32, i32
  }
}

module attributes {stable_mosaic.version = 11 : i64} {
  func.func @_l1_kernel(%arg0: i32, %arg1: i32, %arg2: memref<1x16x128xf32, #tpu.memory_space<vmem>>, %arg3: memref<1x16x128xf32, #tpu.memory_space<vmem>>, %arg4: memref<1x1x1xf32, #tpu.memory_space<vmem>>, %arg5: memref<1x1xf32, #tpu.memory_space<vmem>>) attributes {dimension_semantics = [#tpu.dimension_semantics<parallel>, #tpu.dimension_semantics<arbitrary>], iteration_bounds = array<i64: 4, 1>, scalar_prefetch = 0 : i64, scratch_operands = 1 : i64, tpu.core_type = #tpu.core_type<tc>, window_params = [{transform_indices = @transform_0, window_bounds = array<i64: 1, 16, 128>}, {transform_indices = @transform_1, window_bounds = array<i64: 1, 16, 128>}, {transform_indices = @transform_2, window_bounds = array<i64: 1, 1, 1>}]} {
    %c0_i32 = arith.constant 0 : i32
    %0 = arith.cmpi eq, %arg1, %c0_i32 : i32
    %1 = arith.extui %0 : i1 to i32
    %c0_i32_0 = arith.constant 0 : i32
    %2 = arith.cmpi ne, %1, %c0_i32_0 : i32
    scf.if %2 {
      %cst_12 = arith.constant 0.000000e+00 : f32
      %20 = vector.broadcast %cst_12 : f32 to vector<1x1xf32>
      %c0_13 = arith.constant 0 : index
      %c0_14 = arith.constant 0 : index
      %21 = vector.load %arg5[%c0_13, %c0_14] : memref<1x1xf32, #tpu.memory_space<vmem>>, vector<1x1xf32>
      tpu.vector_store %arg5[%c0_13, %c0_14], %20 {strides = array<i32>} : memref<1x1xf32, #tpu.memory_space<vmem>>, vector<1x1xf32>,
    } else {
    }
    %c0 = arith.constant 0 : index
    %c0_1 = arith.constant 0 : index
    %3 = vector.load %arg5[%c0, %c0_1] : memref<1x1xf32, #tpu.memory_space<vmem>>, vector<1x1xf32>
    %c0_2 = arith.constant 0 : index
    %c0_3 = arith.constant 0 : index
    %c0_4 = arith.constant 0 : index
    %4 = vector.load %arg2[%c0_2, %c0_3, %c0_4] : memref<1x16x128xf32, #tpu.memory_space<vmem>>, vector<1x16x128xf32>
    %5 = vector.shape_cast %4 : vector<1x16x128xf32> to vector<16x128xf32>
    %c0_5 = arith.constant 0 : index
    %c0_6 = arith.constant 0 : index
    %c0_7 = arith.constant 0 : index
    %6 = vector.load %arg3[%c0_5, %c0_6, %c0_7] : memref<1x16x128xf32, #tpu.memory_space<vmem>>, vector<1x16x128xf32>
    %7 = vector.shape_cast %6 : vector<1x16x128xf32> to vector<16x128xf32>
    %8 = arith.subf %5, %7 : vector<16x128xf32>
    %9 = math.absf %8 : vector<16x128xf32>
    %10 = vector.shape_cast %9 : vector<16x128xf32> to vector<1x16x128xf32>
    %cst = arith.constant dense<0.000000e+00> : vector<1xf32>
    %11 = vector.multi_reduction <add>, %10, %cst [1, 2] : vector<1x16x128xf32> to vector<1xf32>
    %12 = vector.shape_cast %11 : vector<1xf32> to vector<1x1x1xf32>
    %13 = vector.extract %12[0, 0, 0] : f32 from vector<1x1x1xf32>
    %14 = vector.broadcast %13 : f32 to vector<1x1xf32>
    %15 = arith.addf %3, %14 : vector<1x1xf32>
    %c0_8 = arith.constant 0 : index
    %c0_9 = arith.constant 0 : index
    %16 = vector.load %arg5[%c0_8, %c0_9] : memref<1x1xf32, #tpu.memory_space<vmem>>, vector<1x1xf32>
    tpu.vector_store %arg5[%c0_8, %c0_9], %15 {strides = array<i32>} : memref<1x1xf32, #tpu.memory_space<vmem>>, vector<1x1xf32>,
    %c0_i32_10 = arith.constant 0 : i32
    %17 = arith.cmpi eq, %arg1, %c0_i32_10 : i32
    %18 = arith.extui %17 : i1 to i32
    %c0_i32_11 = arith.constant 0 : i32
    %19 = arith.cmpi ne, %18, %c0_i32_11 : i32
    scf.if %19 {
      %c0_12 = arith.constant 0 : index
      %c0_13 = arith.constant 0 : index
      %20 = vector.load %arg5[%c0_12, %c0_13] : memref<1x1xf32, #tpu.memory_space<vmem>>, vector<1x1xf32>
      %cst_14 = arith.constant 4.8828125E-4 : f32
      %21 = vector.broadcast %cst_14 : f32 to vector<1x1xf32>
      %22 = arith.mulf %20, %21 : vector<1x1xf32>
      %c0_15 = arith.constant 0 : index
      %c0_16 = arith.constant 0 : index
      %c0_17 = arith.constant 0 : index
      %23 = vector.load %arg4[%c0_15, %c0_16, %c0_17] : memref<1x1x1xf32, #tpu.memory_space<vmem>>, vector<1x1x1xf32>
      %24 = vector.shape_cast %23 : vector<1x1x1xf32> to vector<1x1xf32>
      %25 = vector.shape_cast %22 : vector<1x1xf32> to vector<1x1x1xf32>
      tpu.vector_store %arg4[%c0_15, %c0_16, %c0_17], %25 {strides = array<i32>} : memref<1x1x1xf32, #tpu.memory_space<vmem>>, vector<1x1x1xf32>,
    } else {
    }
    return
  }
  func.func @transform_0(%arg0: i32, %arg1: i32) -> (i32, i32, i32) {
    %c0_i32 = arith.constant 0 : i32
    %c0_i32_0 = arith.constant 0 : i32
    return %arg0, %arg1, %c0_i32 : i32, i32, i32
  }
  func.func @transform_1(%arg0: i32, %arg1: i32) -> (i32, i32, i32) {
    %c0_i32 = arith.constant 0 : i32
    %c0_i32_0 = arith.constant 0 : i32
    return %arg0, %arg1, %c0_i32 : i32, i32, i32
  }
  func.func @transform_2(%arg0: i32, %arg1: i32) -> (i32, i32, i32) {
    %c0_i32 = arith.constant 0 : i32
    %c0_i32_0 = arith.constant 0 : i32
    %c0_i32_1 = arith.constant 0 : i32
    return %arg0, %c0_i32, %c0_i32_0 : i32, i32, i32
  }
}

</mosaic_0001>

<bundles_post_ra>
// kernel: cyclegan_forward.8
= control target key start
LH: loop header
LB: loop body
LE: loop exit
PB: predicated region body
PF: predicated region fallthrough
CT: control target
= control target key end

     0   :  { %s1116_s21 = smov 0   ;;  %s1412_s0 = inlined_call_operand.vmem [shape: bf16[4,4,460], index: 0, kind: input, shape index: {}]   ;;  %s1413_s1 = inlined_call_operand.vmem [shape: f32[1,380], index: 1, kind: input, shape index: {}]   ;;  %s1414_s2 = inlined_call_operand.vmem [shape: bf16[8,36], index: 2, kind: input, shape index: {}]   ;;  %s1415_s3 = inlined_call_operand.vmem [shape: f32[8,1], index: 3, kind: input, shape index: {}]   ;;  %s1416_s4 = inlined_call_operand.vmem [shape: bf16[4,72], index: 4, kind: input, shape index: {}]   ;;  %s1417_s5 = inlined_call_operand.vmem [shape: f32[4,1], index: 5, kind: input, shape index: {}]   ;;  %s1418_s6 = inlined_call_operand.vmem [shape: f32[4,4,320], index: 6, kind: output, shape index: {}]  }
   0x1 LB: > { %s967_s22 = sadd.s32 4294967295, %s1066_s21   ;;  %p971_p0 = scmp.ge.s32.totalorder %s1066_s21, 1  ;;  %s1066_s21 = sphi %s1116_s21, %s16_s21  }
   0x2   : > { %p212_p1 = scmp.lt.s32.totalorder %s1066_s21, 5 }
   0x4   : > { %p213_p2 = pnand %p971_p0, %p212_p1 }
   0x5   : > { %p242_p3 = scmp.lt.s32.totalorder (!%p213_p2), %s967_s22, 3  ;;  %v259_v0 = vlaneseq (!%p213_p2)  ;;  %v1068_v1 = vmov (!%p213_p2), 1983009808   ;;  %s1069_s27 = smov (!%p213_p2), 127   ;;  %v1077_v25 = vmov (!%p213_p2), 0.0   ;;  %vm380_vm0 = vcmask (!%p213_p2), 1041408  }
   0x6   : > { %216 = sbr.rel (%p213_p2) target bundleno = 1074 (0x432), region = 44  ;;  %v257_v2 = vunpack.c.l.s4 (!%p213_p2), %v1068_v1  ;;  %s1070_s28 = smov (!%p213_p2), 126   ;;  %1001 = vmatprep.subr.bf16.mxu1 (!%p213_p2), %v1077_v25  ;;  %vm289_vm1 = vcmask (!%p213_p2), 1039360   ;;  %vm393_vm2 = vcmask (!%p213_p2), 1043456   ;;  %vm402_vm3 = vcmask (!%p213_p2), 1045504  }
   0x7   : > { %v1126_v3 = vshrl.u32 (!%p213_p2), %v259_v0, 7  ;;  %s1071_s29 = smov (!%p213_p2), 108   ;;  %s1072_s30 = smov (!%p213_p2), 107   ;;  %vm303_vm4 = vcmask (!%p213_p2), 1031168   ;;  %vm316_vm5 = vcmask (!%p213_p2), 883712   ;;  %vm340_vm6 = vcmask (!%p213_p2), 867328  }
   0x8   : > { %v258_v4 = vunpack.c.0.s8 (!%p213_p2), %v257_v2  ;;  %s1073_s7 = smov (!%p213_p2), 106   ;;  %s1074_s8 = smov (!%p213_p2), 88   ;;  %vm352_vm7 = vcmask (!%p213_p2), 719872   ;;  %vm328_vm8 = vcmask (!%p213_p2), 875520   ;;  %vm364_vm9 = vcmask (!%p213_p2), 711680  }
   0x9   : > { %s1075_s9 = smov (!%p213_p2), 87   ;;  %s1076_s10 = smov (!%p213_p2), 86   ;;  %vm376_vm10 = vcmask (!%p213_p2), 703488   ;;  %vm1080_vm11 = vmmov (!%p213_p2), 0   ;;  %vm478_vm12 = vcmask (!%p213_p2), 891904   ;;  %vm494_vm13 = vcmask (!%p213_p2), 293888  }
   0xa   : > { %v261_v5 = vsub.s32 (!%p213_p2), %v258_v4, %v1126_v3  ;;  %s1078_s11 = smov (!%p213_p2), 109   ;;  %1007 = vmatprep.mubr.msk.bf16.mxu1 (!%p213_p2), %vm1080_vm11, %v1077_v25  ;;  %vm625_vm14 = vcmask (!%p213_p2), 1010688   ;;  %vm808_vm15 = vcmask (!%p213_p2), 588800  }
   0xd   : > { %s1420_s22 = smov (!%p242_p3, %s967_s22), 3 }
   0xe   : > { %s988_s23 = sshll.u32 %s1420_s22, 3  ;;  %s1025_s24 = smul.u32 12, %s1420_s22 }
   0xf   : > { %s246_s26 = scalar_lea.vmem %s1412_s0, %s988_s23 }
  0x10   : > { %v253_v6 = vld [vmem:[%s246_s26] sm:$0xff] }
  0x11   : > { %v1133_v7 = vrot.slane %v253_v6, %v261_v5  ;;  %v272_v8 = vcombine.low %v253_v6, %v253_v6  ;;  %v255_v10 = vcombine.high %v253_v6, %v253_v6 }
  0x13   : > { %285 = vrot.lane.b32.xlu0 %v1133_v7, %s1069_s27  ;;  %v1139_v9 = vcombine.high %v1133_v7, %v1133_v7  ;;  %v279_v11 = vrot.slane %v272_v8, %v261_v5  ;;  %v1145_v12 = vrot.slane %v255_v10, %v261_v5  ;;  %v293_v13 = vcombine.low %v1133_v7, %v1133_v7 }
  0x15   : > { %287 = vrot.lane.b32.xlu1 %v1139_v9, %s1069_s27  ;;  %v280_v14 = vcombine.high %v279_v11, %v279_v11  ;;  %v294_v15 = vcombine.low %v1145_v12, %v1145_v12  ;;  %v307_v16 = vcombine.low %v279_v11, %v279_v11  ;;  %v271_v17 = vcombine.high %v1145_v12, %v1145_v12 }
  0x17   : > { %297 = vrot.lane.b32.xlu0 %v1133_v7, %s1070_s28 }
  0x19   : > { %281 = vrot.lane.b32.xlu1 %v279_v11, %s1069_s27 }
  0x1b   : > { %301 = vrot.lane.b32.xlu0 %v1145_v12, %s1070_s28 }
  0x1d   : > { %295 = vrot.lane.b32.xlu1 %v293_v13, %s1070_s28 }
  0x1f   : > { %283 = vrot.lane.b32.xlu0 %v280_v14, %s1069_s27 }
  0x21   : > { %299 = vrot.lane.b32.xlu1 %v294_v15, %s1070_s28 }
  0x23   : > { %310 = vrot.lane.b32.xlu0 %v279_v11, %s1071_s29 }
  0x25   : > { %312 = vrot.lane.b32.xlu1 %v293_v13, %s1071_s29 }
  0x27   : > { %314 = vrot.lane.b32.xlu0 %v1133_v7, %s1071_s29 }
  0x29   : > { %308 = vrot.lane.b32.xlu1 %v307_v16, %s1071_s29 }
  0x2b   : > { %322 = vrot.lane.b32.xlu0 %v1139_v9, %s1072_s30 }
  0x2d   : > { %324 = vrot.lane.b32.xlu1 %v1145_v12, %s1072_s30 }
  0x2f   : > { %326 = vrot.lane.b32.xlu0 %v271_v17, %s1072_s30 }
  0x31   : > { %334 = vrot.lane.b32.xlu1 %v280_v14, %s1073_s7 }
  0x33   : > { %336 = vrot.lane.b32.xlu0 %v1133_v7, %s1073_s7 }
  0x35   : > { %338 = vrot.lane.b32.xlu1 %v1139_v9, %s1073_s7 }
  0x37   : > { %320 = vrot.lane.b32.xlu0 %v1133_v7, %s1072_s30 }
  0x39   : > { %332 = vrot.lane.b32.xlu1 %v279_v11, %s1073_s7 }
  0x3b   : > { %346 = vrot.lane.b32.xlu0 %v1133_v7, %s1074_s8 }
  0x3d   : > { %348 = vrot.lane.b32.xlu1 %v294_v15, %s1074_s8 }
  0x3f   : > { %350 = vrot.lane.b32.xlu0 %v1145_v12, %s1074_s8 }
  0x41   : > { %344 = vrot.lane.b32.xlu1 %v293_v13, %s1074_s8 }
  0x43   : > { %358 = vrot.lane.b32.xlu0 %v279_v11, %s1075_s9 }
  0x45   : > { %360 = vrot.lane.b32.xlu1 %v293_v13, %s1075_s9 }
  0x47   : > { %362 = vrot.lane.b32.xlu0 %v1133_v7, %s1075_s9 }
  0x49   : > { %356 = vrot.lane.b32.xlu1 %v307_v16, %s1075_s9 }
  0x4b   : > { %368 = vrot.lane.b32.xlu0 %v1133_v7, %s1076_s10 }
  0x4d   : > { %370 = vrot.lane.b32.xlu1 %v1139_v9, %s1076_s10 }
  0x4f   : > { %372 = vrot.lane.b32.xlu0 %v1145_v12, %s1076_s10 }
  0x51   : > { %374 = vrot.lane.b32.xlu1 %v271_v17, %s1076_s10 }
  0x85   : > { %v286_v18 = vpop.permute.xlu0 %285 }
  0x87   : > { %v288_v19 = vpop.permute.xlu1 %287 }
  0x88   : > { %v392_v29 = vsel %vm380_vm0, %v271_v17, %v288_v19  ;;  %v292_v30 = vsel %vm289_vm1, %v286_v18, %v288_v19 }
  0x89   : > { %v1195_v20 = vpop.permute.xlu0 %297  ;;  %v389_v37 = vsel %vm380_vm0, %v1145_v12, %v292_v30 }
  0x8b   : > { %v1197_v21 = vpop.permute.xlu1 %281 }
  0x8d   : > { %v302_v22 = vpop.permute.xlu0 %301 }
  0x8e   : > { %v401_v31 = vsel %vm393_vm2, %v392_v29, %v302_v22  ;;  %v1079_v29 = vmov 0  }
  0x8f   : > { %v1199_v23 = vpop.permute.xlu1 %295  ;;  %539 = vmatprep.mubr.bf16.mxu0 %v1079_v29  ;;  %1047 = vset.pattern.permute.xlu0 %v1079_v29 }
  0x90   : > { %1048 = vset.pattern.permute.xlu1 %v1079_v29 }
  0x91   : > { %v1201_v24 = vpop.permute.xlu0 %283 }
  0x92   : > { %v291_v0 = vsel %vm289_vm1, %v1201_v24, %v286_v18  ;;  %v290_v11 = vsel %vm289_vm1, %v1197_v21, %v1201_v24  ;;  %v304_v18 = vsel %vm303_vm4, %v1199_v23, %v1195_v20 }
  0x93   : > { %v300_v26 = vpop.permute.xlu1 %299  ;;  %v386_v6 = vsel %vm380_vm0, %v1139_v9, %v291_v0  ;;  %v383_v15 = vsel %vm380_vm0, %v1133_v7, %v290_v11  ;;  %v603_v0 = vsub.s32 2, %v1126_v3 }
  0x94   : > { %v306_v33 = vsel %vm303_vm4, %v300_v26, %v302_v22  ;;  %v305_v8 = vsel %vm303_vm4, %v1195_v20, %v300_v26  ;;  %v395_v22 = vsel %vm393_vm2, %v383_v15, %v304_v18 }
  0x95   : > { %v1204_v27 = vpop.permute.xlu0 %310  ;;  %v399_v39 = vsel %vm393_vm2, %v389_v37, %v306_v33  ;;  %v397_v9 = vsel %vm393_vm2, %v386_v6, %v305_v8 }
  0x97   : > { %v313_v28 = vpop.permute.xlu1 %312 }
  0x98   : > { %v318_v12 = vsel %vm316_vm5, %v1204_v27, %v313_v28 }
  0x99   : > { %v315_v32 = vpop.permute.xlu0 %314  ;;  %v406_v16 = vsel %vm402_vm3, %v397_v9, %v318_v12 }
  0x9a   : > { %v410_v34 = vsel %vm402_vm3, %v401_v31, %v315_v32  ;;  %v319_v35 = vsel %vm316_vm5, %v313_v28, %v315_v32 }
  0x9b   : > { %v309_v36 = vpop.permute.xlu1 %308  ;;  %460 = vrot.lane.b32.xlu1 %v410_v34, %s1078_s11  ;;  %v408_v40 = vsel %vm402_vm3, %v399_v39, %v319_v35 }
  0x9c   : > { %v317_v17 = vsel %vm316_vm5, %v309_v36, %v1204_v27 }
  0x9d   : > { %v1215_v38 = vpop.permute.xlu0 %322  ;;  %v404_v24 = vsel %vm402_vm3, %v395_v22, %v317_v17 }
  0x9f   : > { %v325_v41 = vpop.permute.xlu1 %324  ;;  %458 = vrot.lane.b32.xlu1 %v408_v40, %s1078_s11 }
  0xa0   : > { %v330_v26 = vsel %vm328_vm8, %v1215_v38, %v325_v41 }
  0xa1   : > { %v327_v42 = vpop.permute.xlu0 %326 }
  0xa2   : > { %v331_v60 = vsel %vm328_vm8, %v325_v41, %v327_v42 }
  0xa3   : > { %v335_v43 = vpop.permute.xlu1 %334 }
  0xa5   : > { %v337_v44 = vpop.permute.xlu0 %336 }
  0xa6   : > { %v342_v21 = vsel %vm340_vm6, %v335_v43, %v337_v44 }
  0xa7   : > { %v339_v45 = vpop.permute.xlu1 %338  ;;  %v416_v20 = vsel %vm380_vm0, %v330_v26, %v342_v21 }
  0xa8   : > { %v422_v54 = vsel %vm380_vm0, %v327_v42, %v339_v45  ;;  %v343_v55 = vsel %vm340_vm6, %v337_v44, %v339_v45 }
  0xa9   : > { %v1220_v46 = vpop.permute.xlu0 %320  ;;  %v419_v63 = vsel %vm380_vm0, %v331_v60, %v343_v55 }
  0xaa   : > { %v329_v32 = vsel %vm328_vm8, %v1220_v46, %v1215_v38  ;;  %v440_v38 = vld [vmem:[%s1415_s3] sm:$0xff] }
  0xab   : > { %v333_v47 = vpop.permute.xlu1 %332 }
  0xac   : > { %v341_v23 = vsel %vm340_vm6, %v333_v47, %v335_v43 }
  0xad   : > { %v347_v48 = vpop.permute.xlu0 %346  ;;  %v413_v34 = vsel %vm380_vm0, %v329_v32, %v341_v23 }
  0xaf   : > { %v349_v49 = vpop.permute.xlu1 %348 }
  0xb0   : > { %v354_v7 = vsel %vm352_vm7, %v347_v48, %v349_v49 }
  0xb1   : > { %v351_v50 = vpop.permute.xlu0 %350  ;;  %v426_v28 = vsel %vm393_vm2, %v416_v20, %v354_v7 }
  0xb2   : > { %v430_v56 = vsel %vm393_vm2, %v422_v54, %v351_v50  ;;  %v355_v58 = vsel %vm352_vm7, %v349_v49, %v351_v50 }
  0xb3   : > { %v345_v51 = vpop.permute.xlu1 %344  ;;  %v428_v2 = vsel %vm393_vm2, %v419_v63, %v355_v58  ;;  %v595_v63 = vsub.s32 0, %v1126_v3 }
  0xb4   : > { %v353_v30 = vsel %vm352_vm7, %v345_v51, %v347_v48 }
  0xb5   : > { %v359_v52 = vpop.permute.xlu0 %358  ;;  %v424_v35 = vsel %vm393_vm2, %v413_v34, %v353_v30 }
  0xb7   : > { %v361_v53 = vpop.permute.xlu1 %360 }
  0xb8   : > { %v366_v27 = vsel %vm364_vm9, %v359_v52, %v361_v53 }
  0xb9   : > { %v363_v57 = vpop.permute.xlu0 %362  ;;  %v434_v31 = vsel %vm402_vm3, %v426_v28, %v366_v27 }
  0xba   : > { %v438_v59 = vsel %vm402_vm3, %v430_v56, %v363_v57  ;;  %v367_v61 = vsel %vm364_vm9, %v361_v53, %v363_v57 }
  0xbb   : > { %v357_v62 = vpop.permute.xlu1 %356  ;;  %468 = vrot.lane.b32.xlu1 %v438_v59, %s1078_s11  ;;  %v436_v4 = vsel %vm402_vm3, %v428_v2, %v367_v61  ;;  %v591_v2 = vld [vmem:[%s1413_s1] sm:$0x7] }
  0xbc   : > { %v365_v33 = vsel %vm364_vm9, %v357_v62, %v359_v52  ;;  %v439_v62 = vld [vmem:[%s1414_s2] sm:$0xf]  ;;  %v604_v12 = vrot.slane %v591_v2, %v603_v0 }
  0xbd   : > { %v369_v1 = vpop.permute.xlu0 %368  ;;  %v432_v36 = vsel %vm402_vm3, %v424_v35, %v365_v33 }
  0xbf   : > { %v371_v5 = vpop.permute.xlu1 %370  ;;  %466 = vrot.lane.b32.xlu1 %v436_v4, %s1078_s11  ;;  %v599_v4 = vsub.s32 1, %v1126_v3 }
  0xc0   : > { %v377_v10 = vsel %vm376_vm10, %v369_v1, %v371_v5 }
  0xc1   : > { %470 = vrot.lane.b32.xlu0 %v377_v10, %s1078_s11  ;;  %v373_v13 = vpop.permute.xlu0 %372  ;;  %v596_v10 = vrot.slane %v591_v2, %v595_v63  ;;  %v600_v15 = vrot.slane %v591_v2, %v599_v4 }
  0xc2   : > { %v378_v14 = vsel %vm376_vm10, %v371_v5, %v373_v13 }
  0xc3   : > { %472 = vrot.lane.b32.xlu1 %v378_v14, %s1078_s11  ;;  %v375_v19 = vpop.permute.xlu1 %374 }
  0xc4   : > { %v379_v37 = vsel %vm376_vm10, %v373_v13, %v375_v19 }
  0xc5   : > { %456 = vrot.lane.b32.xlu0 %v406_v16, %s1078_s11 }
  0xc7   : > { %476 = vrot.lane.b32.xlu1 %v375_v19, %s1078_s11 }
  0xc9   : > { %454 = vrot.lane.b32.xlu0 %v404_v24, %s1078_s11 }
  0xcd   : > { %464 = vrot.lane.b32.xlu0 %v434_v31, %s1078_s11 }
  0xd1   : > { %462 = vrot.lane.b32.xlu0 %v432_v36, %s1078_s11 }
  0xd5   : > { %474 = vrot.lane.b32.xlu0 %v379_v37, %s1078_s11 }
  0xd9   : > { %443 = vperm.xlu0 %1047, %v440_v38  }
 0x10d   : > { %v461_v39 = vpop.permute.xlu1 %460 }
 0x111   : > { %v459_v40 = vpop.permute.xlu1 %458 }
 0x112   : > { %v481_v41 = vsel %vm478_vm12, %v459_v40, %v461_v39 }
 0x113   : > { %1002 = vmatpush3.bf16.msra.mxu1 %v481_v41 }
 0x114   : > { %1003 = vmatprep.subr.bf16.mxu1 %v1077_v25 }
 0x12d   : > { %v469_v42 = vpop.permute.xlu1 %468 }
 0x131   : > { %v467_v43 = vpop.permute.xlu1 %466 }
 0x132   : > { %v484_v44 = vsel %vm478_vm12, %v467_v43, %v469_v42 }
 0x133   : > { %v471_v45 = vpop.permute.xlu0 %470  ;;  %1004 = vmatpush3.bf16.msra.mxu1 %v484_v44 }
 0x134   : > { %1005 = vmatprep.subr.bf16.mxu1 %v1077_v25 }
 0x135   : > { %v473_v52 = vpop.permute.xlu1 %472 }
 0x136   : > { %v485_v56 = vsel %vm478_vm12, %v471_v45, %v473_v52 }
 0x137   : > { %v457_v46 = vpop.permute.xlu0 %456  ;;  %v499_v60 = vsel %vm380_vm0, %v485_v56, 0 }
 0x138   : > { %v480_v47 = vsel %vm478_vm12, %v457_v46, %v459_v40 }
 0x139   : > { %507 = vmatprep.subr.bf16.mxu0 %v480_v47  ;;  %v477_v55 = vpop.permute.xlu1 %476 }
 0x13b   : > { %v455_v48 = vpop.permute.xlu0 %454 }
 0x13c   : > { %v479_v49 = vsel %vm478_vm12, %v455_v48, %v457_v46 }
 0x13d   : > { %508 = vmatpush1.bf16.msra.mxu0 %v479_v49 }
 0x13f   : > { %v465_v50 = vpop.permute.xlu0 %464 }
 0x140   : > { %v483_v51 = vsel %vm478_vm12, %v465_v50, %v467_v43 }
 0x141   : > { %509 = vmatprep.subr.bf16.mxu0 %v483_v51 }
 0x143   : > { %v463_v53 = vpop.permute.xlu0 %462 }
 0x144   : > { %v482_v54 = vsel %vm478_vm12, %v463_v53, %v465_v50 }
 0x145   : > { %510 = vmatpush1.bf16.msra.mxu0 %v482_v54 }
 0x147   : > { %v475_v57 = vpop.permute.xlu0 %474 }
 0x148   : > { %v486_v58 = vsel %vm478_vm12, %v473_v52, %v475_v57  ;;  %v487_v59 = vsel %vm478_vm12, %v475_v57, %v477_v55 }
 0x149   : > { %975 = vmatprep.subr.msk.bf16.mxu0 %vm380_vm0, %v486_v58  ;;  %v505_v61 = vsel %vm380_vm0, %v487_v59, 0  ;;  %vm910_vm0 = vcmask 519168  }
 0x14a   : > { %512 = vmatpush1.bf16.msra.mxu0 %v499_v60  ;;  %1006 = vmatpush3.bf16.msra.mxu1 %v505_v61 }
 0x14b   : > { %1011 = vmatprep.subr.bf16.mxu1 %v1077_v25 }
 0x14d   : > { %976 = vmatmul.mubr.msk.bf16.vlgmr.msra.gmra.mrb[0].mxu0 %vm494_vm13, %v439_v62  ;;  %1008 = vmatmul.mubr.msk.bf16.vlgmr.msra.gmra.mrb[0].mxu1 %vm494_vm13, %v439_v62 }
 0x14e   : > { %853 = vmatprep.mubr.bf16.mxu0 %v1079_v29  ;;  %1021 = vmatprep.mubr.msk.bf16.mxu1 %vm1080_vm11, %v1077_v25 }
 0x158   : > { %v444_v1 = vpop.permute.xlu0 %443 }
 0x220   : > { %v541_v5 = vpop.f32.mrb[0].mxu0  ;;  %v582_v6 = vpop.f32.mrb[0].mxu1 }
 0x221   : > { %v542_v8 = vadd.f32 %v541_v5, %v444_v1  ;;  %v583_v11 = vadd.f32 %v582_v6, %v444_v1  ;;  %v543_v13 = vpop.f32.mrb[1].mxu0  ;;  %v1009_v14 = vpop.f32.mrb[1].mxu1 }
 0x222   : > { %v544_v9 = vadd.f32 %v543_v13, %v444_v1  ;;  %v545_v16 = vpop.f32.mrb[2].mxu0  ;;  %v585_v17 = vpop.f32.mrb[2].mxu1 }
 0x223   : > { %v588_v18 = vmax.f32 %v542_v8, 0.0  ;;  %v590_v19 = vmax.f32 %v583_v11, 0.0  ;;  %v546_v21 = vpop.f32.mrb[3].mxu0  ;;  %v1010_v22 = vpop.f32.mrb[3].mxu1 }
 0x224   : > { %v589_v7 = vmax.f32 %v544_v9, 0.0 }
 0x225   : > { %v608_v24 = vmul.f32 %v596_v10, %v588_v18  ;;  %v610_v26 = vmul.f32 %v604_v12, %v590_v19  ;;  %v738_v19 = vld [vmem:[%s1417_s5] sm:$0xf] }
 0x226   : > { %v609_v3 = vmul.f32 %v600_v15, %v589_v7 }
 0x227   : > { %v990_v27 = vpack.c.bf16 %v610_v26, %v610_v26  ;;  %v1059_v28 = vpack.c.bf16 %v608_v24, %v608_v24 }
 0x228   : > { %v1058_v23 = vpack.c.bf16 %v609_v3, %v609_v3 }
 0x229   : > { %626 = vst.msk [vmem:[#allocation2 + $0x8] sm:$0xf] %vm625_vm14, %v990_v27 }
 0x230   : > { %v1051_v20 = vld [vmem:[#allocation2 + $0x8] ss:$0 sps:$4 sm:$0xff]  }
 0x231   : > { %649 = vrot.lane.b32.xlu0 %v1051_v20, %s1070_s28  ;;  %641 = vrot.lane.b32.xlu1 %v1051_v20, %s1069_s27 }
 0x235   : > { %657 = vrot.lane.b32.xlu0 %v1051_v20, %s1071_s29  ;;  %639 = vrot.lane.b32.xlu1 %v1058_v23, %s1069_s27 }
 0x239   : > { %665 = vrot.lane.b32.xlu0 %v1051_v20, %s1072_s30  ;;  %647 = vrot.lane.b32.xlu1 %v1058_v23, %s1070_s28 }
 0x23d   : > { %673 = vrot.lane.b32.xlu0 %v1051_v20, %s1073_s7  ;;  %655 = vrot.lane.b32.xlu1 %v1058_v23, %s1071_s29 }
 0x241   : > { %681 = vrot.lane.b32.xlu0 %v1051_v20, %s1074_s8  ;;  %645 = vrot.lane.b32.xlu1 %v1059_v28, %s1070_s28 }
 0x245   : > { %689 = vrot.lane.b32.xlu0 %v1051_v20, %s1075_s9  ;;  %663 = vrot.lane.b32.xlu1 %v1058_v23, %s1072_s30 }
 0x249   : > { %637 = vrot.lane.b32.xlu0 %v1059_v28, %s1069_s27  ;;  %671 = vrot.lane.b32.xlu1 %v1058_v23, %s1073_s7 }
 0x24d   : > { %653 = vrot.lane.b32.xlu0 %v1059_v28, %s1071_s29  ;;  %661 = vrot.lane.b32.xlu1 %v1059_v28, %s1072_s30 }
 0x251   : > { %669 = vrot.lane.b32.xlu0 %v1059_v28, %s1073_s7  ;;  %679 = vrot.lane.b32.xlu1 %v1058_v23, %s1074_s8 }
 0x255   : > { %685 = vrot.lane.b32.xlu0 %v1059_v28, %s1075_s9  ;;  %687 = vrot.lane.b32.xlu1 %v1058_v23, %s1075_s9 }
 0x259   : > { %695 = vrot.lane.b32.xlu0 %v1058_v23, %s1076_s10  ;;  %677 = vrot.lane.b32.xlu1 %v1059_v28, %s1074_s8 }
 0x25d   : > { %693 = vrot.lane.b32.xlu1 %v1059_v28, %s1076_s10 }
 0x261   : > { %697 = vrot.lane.b32.xlu1 %v1051_v20, %s1076_s10 }
 0x2a3   : > { %v650_v29 = vpop.permute.xlu0 %649  ;;  %v642_v30 = vpop.permute.xlu1 %641 }
 0x2a4   : > { %v709_v31 = vsel %vm393_vm2, %v1051_v20, %v642_v30 }
 0x2a5   : > { %760 = vrot.lane.b32.xlu1 %v709_v31, %s1069_s27 }
 0x2a7   : > { %v658_v32 = vpop.permute.xlu0 %657  ;;  %v640_v33 = vpop.permute.xlu1 %639 }
 0x2a8   : > { %v718_v34 = vsel %vm393_vm2, %v650_v29, %v658_v32  ;;  %v644_v48 = vsel %vm289_vm1, %v640_v33, %v642_v30 }
 0x2a9   : > { %766 = vrot.lane.b32.xlu0 %v718_v34, %s1069_s27  ;;  %v706_v51 = vsel %vm393_vm2, %v1058_v23, %v644_v48 }
 0x2ab   : > { %v666_v35 = vpop.permute.xlu0 %665  ;;  %v648_v36 = vpop.permute.xlu1 %647 }
 0x2ac   : > { %v652_v41 = vsel %vm303_vm4, %v648_v36, %v650_v29 }
 0x2af   : > { %v674_v37 = vpop.permute.xlu0 %673  ;;  %v656_v38 = vpop.permute.xlu1 %655 }
 0x2b0   : > { %v727_v39 = vsel %vm393_vm2, %v666_v35, %v674_v37  ;;  %v660_v40 = vsel %vm316_vm5, %v656_v38, %v658_v32 }
 0x2b1   : > { %772 = vrot.lane.b32.xlu1 %v727_v39, %s1069_s27  ;;  %v715_v44 = vsel %vm393_vm2, %v652_v41, %v660_v40 }
 0x2b3   : > { %v682_v42 = vpop.permute.xlu0 %681  ;;  %v646_v43 = vpop.permute.xlu1 %645 }
 0x2b4   : > { %v651_v55 = vsel %vm303_vm4, %v646_v43, %v648_v36 }
 0x2b5   : > { %764 = vrot.lane.b32.xlu1 %v715_v44, %s1069_s27 }
 0x2b7   : > { %v690_v45 = vpop.permute.xlu0 %689  ;;  %v664_v46 = vpop.permute.xlu1 %663 }
 0x2b8   : > { %v736_v47 = vsel %vm393_vm2, %v682_v42, %v690_v45  ;;  %v668_v60 = vsel %vm328_vm8, %v664_v46, %v666_v35 }
 0x2b9   : > { %778 = vrot.lane.b32.xlu0 %v736_v47, %s1069_s27 }
 0x2bb   : > { %v638_v49 = vpop.permute.xlu0 %637  ;;  %v672_v50 = vpop.permute.xlu1 %671 }
 0x2bc   : > { %v643_v52 = vsel %vm289_vm1, %v638_v49, %v640_v33  ;;  %v676_v58 = vsel %vm340_vm6, %v672_v50, %v674_v37 }
 0x2bd   : > { %758 = vrot.lane.b32.xlu0 %v706_v51, %s1069_s27  ;;  %v703_v57 = vsel %vm393_vm2, %v1059_v28, %v643_v52  ;;  %v724_v63 = vsel %vm393_vm2, %v668_v60, %v676_v58 }
 0x2bf   : > { %v654_v53 = vpop.permute.xlu0 %653  ;;  %v662_v54 = vpop.permute.xlu1 %661 }
 0x2c0   : > { %v659_v56 = vsel %vm316_vm5, %v654_v53, %v656_v38  ;;  %v667_v1 = vsel %vm328_vm8, %v662_v54, %v664_v46 }
 0x2c1   : > { %756 = vrot.lane.b32.xlu0 %v703_v57, %s1069_s27  ;;  %v712_v59 = vsel %vm393_vm2, %v651_v55, %v659_v56 }
 0x2c2   : > { %762 = vrot.lane.b32.xlu1 %v712_v59, %s1069_s27 }
 0x2c3   : > { %v670_v61 = vpop.permute.xlu0 %669  ;;  %v680_v62 = vpop.permute.xlu1 %679 }
 0x2c4   : > { %v675_v0 = vsel %vm340_vm6, %v670_v61, %v672_v50  ;;  %v684_v4 = vsel %vm352_vm7, %v680_v62, %v682_v42 }
 0x2c5   : > { %770 = vrot.lane.b32.xlu0 %v724_v63, %s1069_s27  ;;  %v721_v6 = vsel %vm393_vm2, %v667_v1, %v675_v0 }
 0x2c7   : > { %v688_v2 = vpop.permute.xlu1 %687  ;;  %v686_v8 = vpop.permute.xlu0 %685 }
 0x2c8   : > { %v692_v5 = vsel %vm364_vm9, %v688_v2, %v690_v45  ;;  %v691_v12 = vsel %vm364_vm9, %v686_v8, %v688_v2  ;;  %v737_v45 = vld [vmem:[%s1416_s4] sm:$0x3] }
 0x2c9   : > { %768 = vrot.lane.b32.xlu0 %v721_v6, %s1069_s27  ;;  %v733_v10 = vsel %vm393_vm2, %v684_v4, %v692_v5 }
 0x2ca   : > { %776 = vrot.lane.b32.xlu1 %v733_v10, %s1069_s27 }
 0x2cb   : > { %v678_v11 = vpop.permute.xlu1 %677  ;;  %v696_v9 = vpop.permute.xlu0 %695 }
 0x2cc   : > { %v683_v13 = vsel %vm352_vm7, %v678_v11, %v680_v62 }
 0x2cd   : > { %v730_v14 = vsel %vm393_vm2, %v683_v13, %v691_v12 }
 0x2ce   : > { %774 = vrot.lane.b32.xlu1 %v730_v14, %s1069_s27 }
 0x2cf   : > { %v694_v15 = vpop.permute.xlu1 %693 }
 0x2d0   : > { %v699_v16 = vsel %vm376_vm10, %v694_v15, %v696_v9 }
 0x2d1   : > { %780 = vrot.lane.b32.xlu0 %v699_v16, %s1069_s27 }
 0x2d3   : > { %v698_v17 = vpop.permute.xlu1 %697 }
 0x2d4   : > { %v700_v18 = vsel %vm376_vm10, %v696_v9, %v698_v17 }
 0x2d5   : > { %782 = vrot.lane.b32.xlu1 %v700_v18, %s1069_s27  ;;  %784 = vrot.lane.b32.xlu0 %v698_v17, %s1069_s27  ;;  %s251_s27 = scalar_lea.vmem %s1418_s6, %s1025_s24 }
 0x2d9   : > { %741 = vperm.xlu1 %1048, %v738_v19  }
 0x317   : > { %v761_v21 = vpop.permute.xlu1 %760 }
 0x318   : > { %1012 = vmatpush3.bf16.msra.mxu1 %v761_v21 }
 0x319   : > { %1013 = vmatprep.subr.bf16.mxu1 %v1077_v25 }
 0x31b   : > { %v767_v22 = vpop.permute.xlu0 %766 }
 0x31c   : > { %1014 = vmatpush3.bf16.msra.mxu1 %v767_v22 }
 0x31d   : > { %1015 = vmatprep.subr.bf16.mxu1 %v1077_v25 }
 0x323   : > { %v773_v7 = vpop.permute.xlu1 %772 }
 0x324   : > { %1016 = vmatpush3.bf16.msra.mxu1 %v773_v7 }
 0x325   : > { %1017 = vmatprep.subr.bf16.mxu1 %v1077_v25 }
 0x327   : > { %v765_v27 = vpop.permute.xlu1 %764 }
 0x328   : > { %v789_v29 = vsel %vm289_vm1, %v765_v27, %v767_v22 }
 0x32b   : > { %v779_v24 = vpop.permute.xlu0 %778 }
 0x32c   : > { %1018 = vmatpush3.bf16.msra.mxu1 %v779_v24 }
 0x32d   : > { %1019 = vmatprep.subr.bf16.mxu1 %v1077_v25 }
 0x32f   : > { %v759_v26 = vpop.permute.xlu0 %758 }
 0x330   : > { %v787_v3 = vsel %vm289_vm1, %v759_v26, %v761_v21 }
 0x331   : > { %821 = vmatprep.subr.bf16.mxu0 %v787_v3 }
 0x333   : > { %v757_v20 = vpop.permute.xlu0 %756 }
 0x334   : > { %v786_v23 = vsel %vm289_vm1, %v757_v20, %v759_v26  ;;  %v763_v28 = vpop.permute.xlu1 %762 }
 0x335   : > { %822 = vmatpush1.bf16.msra.mxu0 %v786_v23  ;;  %v788_v31 = vsel %vm289_vm1, %v763_v28, %v765_v27 }
 0x336   : > { %823 = vmatprep.subr.bf16.mxu0 %v789_v29 }
 0x337   : > { %v771_v30 = vpop.permute.xlu0 %770 }
 0x338   : > { %v791_v32 = vsel %vm289_vm1, %v771_v30, %v773_v7 }
 0x339   : > { %824 = vmatpush1.bf16.msra.mxu0 %v788_v31 }
 0x33a   : > { %825 = vmatprep.subr.bf16.mxu0 %v791_v32 }
 0x33b   : > { %v769_v25 = vpop.permute.xlu0 %768 }
 0x33c   : > { %v790_v33 = vsel %vm289_vm1, %v769_v25, %v771_v30  ;;  %v777_v34 = vpop.permute.xlu1 %776 }
 0x33d   : > { %826 = vmatpush1.bf16.msra.mxu0 %v790_v33  ;;  %v793_v35 = vsel %vm289_vm1, %v777_v34, %v779_v24 }
 0x33e   : > { %827 = vmatprep.subr.bf16.mxu0 %v793_v35 }
 0x340   : > { %v775_v36 = vpop.permute.xlu1 %774 }
 0x341   : > { %v792_v37 = vsel %vm289_vm1, %v775_v36, %v777_v34 }
 0x342   : > { %828 = vmatpush1.bf16.msra.mxu0 %v792_v37 }
 0x343   : > { %v781_v38 = vpop.permute.xlu0 %780 }
 0x347   : > { %v785_v39 = vpop.permute.xlu0 %784  ;;  %v783_v40 = vpop.permute.xlu1 %782 }
 0x348   : > { %v819_v41 = vsel %vm393_vm2, %v785_v39, 0  ;;  %v794_v42 = vsel %vm289_vm1, %v781_v38, %v783_v40  ;;  %v795_v43 = vsel %vm289_vm1, %v783_v40, %v785_v39 }
 0x349   : > { %v813_v44 = vsel %vm393_vm2, %v794_v42, 0  ;;  %983 = vmatprep.subr.msk.bf16.mxu0 %vm393_vm2, %v795_v43  ;;  %1020 = vmatpush3.bf16.msra.mxu1 %v819_v41 }
 0x34a   : > { %830 = vmatpush1.bf16.msra.mxu0 %v813_v44 }
 0x34c   : > { %1022 = vmatmul.mubr.msk.bf16.vlgmr.msra.gmra.mrb[4].mxu1 %vm808_vm15, %v737_v45 }
 0x34d   : > { %984 = vmatmul.mubr.msk.bf16.vlgmr.msra.gmra.mrb[4].mxu0 %vm808_vm15, %v737_v45 }
 0x358   : > { %v742_v46 = vpop.permute.xlu1 %741 }
 0x41f   : > { %v896_v47 = vpop.f32.mrb[4].mxu1 }
 0x420   : > { %v855_v48 = vpop.f32.mrb[4].mxu0  ;;  %v897_v49 = vadd.f32 %v896_v47, %v742_v46  ;;  %v1023_v50 = vpop.f32.mrb[5].mxu1 }
 0x421   : > { %v856_v51 = vadd.f32 %v855_v48, %v742_v46  ;;  %v857_v52 = vpop.f32.mrb[5].mxu0  ;;  %v899_v53 = vpop.f32.mrb[6].mxu1 }
 0x422   : > { %1052 = vtanh.f32 %v897_v49  ;;  %v858_v54 = vadd.f32 %v857_v52, %v742_v46  ;;  %v859_v55 = vpop.f32.mrb[6].mxu0  ;;  %v1024_v56 = vpop.f32.mrb[7].mxu1 }
 0x423   : > { %1054 = vtanh.f32 %v856_v51  ;;  %v860_v57 = vpop.f32.mrb[7].mxu0 }
 0x424   : > { %1056 = vtanh.f32 %v858_v54 }
 0x42c   : > { %v1053_v58 = vpop.eup %1052 }
 0x42d   : > { %v1055_v59 = vpop.eup %1054  ;;  %911 = vst.msk [vmem:[%s251_s27 + $0x8] sm:$0xf] %vm910_vm0, %v1053_v58 }
 0x42e   : > { %v1057_v60 = vpop.eup %1056 }
 0x42f   : > { %v907_v61 = vcombine.low %v1055_v59, %v1057_v60 }
 0x431   : > { %909 = vst [vmem:[%s251_s27] sm:$0xff] %v907_v61 }
 0x432 PF: > { %s16_s21 = sadd.s32 1, %s1066_s21  }
 0x433   : > { %p13_p4 = scmp.ge.s32.totalorder %s16_s21, 6  }
 0x435   :  { %15 = sbr.rel (!%p13_p4) target bundleno = 1 (0x1), region = 74 }

// kernel: cyclegan_forward.10
= control target key start
LH: loop header
LB: loop body
LE: loop exit
PB: predicated region body
PF: predicated region fallthrough
CT: control target
= control target key end

     0   :  { %s1116_s21 = smov 0   ;;  %s1412_s0 = inlined_call_operand.vmem [shape: bf16[2,4,460], index: 0, kind: input, shape index: {}]   ;;  %s1413_s1 = inlined_call_operand.vmem [shape: f32[1,380], index: 1, kind: input, shape index: {}]   ;;  %s1414_s2 = inlined_call_operand.vmem [shape: bf16[8,36], index: 2, kind: input, shape index: {}]   ;;  %s1415_s3 = inlined_call_operand.vmem [shape: f32[8,1], index: 3, kind: input, shape index: {}]   ;;  %s1416_s4 = inlined_call_operand.vmem [shape: bf16[4,72], index: 4, kind: input, shape index: {}]   ;;  %s1417_s5 = inlined_call_operand.vmem [shape: f32[4,1], index: 5, kind: input, shape index: {}]   ;;  %s1418_s6 = inlined_call_operand.vmem [shape: f32[2,4,320], index: 6, kind: output, shape index: {}]  }
   0x1 LB: > { %s967_s22 = sadd.s32 4294967295, %s1066_s21   ;;  %p971_p0 = scmp.ge.s32.totalorder %s1066_s21, 1  ;;  %s1066_s21 = sphi %s1116_s21, %s16_s21  }
   0x2   : > { %p212_p1 = scmp.lt.s32.totalorder %s1066_s21, 3 }
   0x4   : > { %p213_p2 = pnand %p971_p0, %p212_p1 }
   0x5   : > { %p242_p3 = scmp.lt.s32.totalorder (!%p213_p2), %s967_s22, 1  ;;  %v259_v0 = vlaneseq (!%p213_p2)  ;;  %v1068_v1 = vmov (!%p213_p2), 1983009808   ;;  %s1069_s27 = smov (!%p213_p2), 127   ;;  %v1077_v25 = vmov (!%p213_p2), 0.0   ;;  %vm380_vm0 = vcmask (!%p213_p2), 1041408  }
   0x6   : > { %216 = sbr.rel (%p213_p2) target bundleno = 1074 (0x432), region = 44  ;;  %v257_v2 = vunpack.c.l.s4 (!%p213_p2), %v1068_v1  ;;  %s1070_s28 = smov (!%p213_p2), 126   ;;  %1001 = vmatprep.subr.bf16.mxu1 (!%p213_p2), %v1077_v25  ;;  %vm289_vm1 = vcmask (!%p213_p2), 1039360   ;;  %vm393_vm2 = vcmask (!%p213_p2), 1043456   ;;  %vm402_vm3 = vcmask (!%p213_p2), 1045504  }
   0x7   : > { %v1126_v3 = vshrl.u32 (!%p213_p2), %v259_v0, 7  ;;  %s1071_s29 = smov (!%p213_p2), 108   ;;  %s1072_s30 = smov (!%p213_p2), 107   ;;  %vm303_vm4 = vcmask (!%p213_p2), 1031168   ;;  %vm316_vm5 = vcmask (!%p213_p2), 883712   ;;  %vm340_vm6 = vcmask (!%p213_p2), 867328  }
   0x8   : > { %v258_v4 = vunpack.c.0.s8 (!%p213_p2), %v257_v2  ;;  %s1073_s7 = smov (!%p213_p2), 106   ;;  %s1074_s8 = smov (!%p213_p2), 88   ;;  %vm352_vm7 = vcmask (!%p213_p2), 719872   ;;  %vm328_vm8 = vcmask (!%p213_p2), 875520   ;;  %vm364_vm9 = vcmask (!%p213_p2), 711680  }
   0x9   : > { %s1075_s9 = smov (!%p213_p2), 87   ;;  %s1076_s10 = smov (!%p213_p2), 86   ;;  %vm376_vm10 = vcmask (!%p213_p2), 703488   ;;  %vm1080_vm11 = vmmov (!%p213_p2), 0   ;;  %vm478_vm12 = vcmask (!%p213_p2), 891904   ;;  %vm494_vm13 = vcmask (!%p213_p2), 293888  }
   0xa   : > { %v261_v5 = vsub.s32 (!%p213_p2), %v258_v4, %v1126_v3  ;;  %s1078_s11 = smov (!%p213_p2), 109   ;;  %1007 = vmatprep.mubr.msk.bf16.mxu1 (!%p213_p2), %vm1080_vm11, %v1077_v25  ;;  %vm625_vm14 = vcmask (!%p213_p2), 1010688   ;;  %vm808_vm15 = vcmask (!%p213_p2), 588800  }
   0xd   : > { %s1420_s22 = smov (!%p242_p3, %s967_s22), 1 }
   0xe   : > { %s988_s23 = sshll.u32 %s1420_s22, 3  ;;  %s1025_s24 = smul.u32 12, %s1420_s22 }
   0xf   : > { %s246_s26 = scalar_lea.vmem %s1412_s0, %s988_s23 }
  0x10   : > { %v253_v6 = vld [vmem:[%s246_s26] sm:$0xff] }
  0x11   : > { %v1133_v7 = vrot.slane %v253_v6, %v261_v5  ;;  %v272_v8 = vcombine.low %v253_v6, %v253_v6  ;;  %v255_v10 = vcombine.high %v253_v6, %v253_v6 }
  0x13   : > { %285 = vrot.lane.b32.xlu0 %v1133_v7, %s1069_s27  ;;  %v1139_v9 = vcombine.high %v1133_v7, %v1133_v7  ;;  %v279_v11 = vrot.slane %v272_v8, %v261_v5  ;;  %v1145_v12 = vrot.slane %v255_v10, %v261_v5  ;;  %v293_v13 = vcombine.low %v1133_v7, %v1133_v7 }
  0x15   : > { %287 = vrot.lane.b32.xlu1 %v1139_v9, %s1069_s27  ;;  %v280_v14 = vcombine.high %v279_v11, %v279_v11  ;;  %v294_v15 = vcombine.low %v1145_v12, %v1145_v12  ;;  %v307_v16 = vcombine.low %v279_v11, %v279_v11  ;;  %v271_v17 = vcombine.high %v1145_v12, %v1145_v12 }
  0x17   : > { %297 = vrot.lane.b32.xlu0 %v1133_v7, %s1070_s28 }
  0x19   : > { %281 = vrot.lane.b32.xlu1 %v279_v11, %s1069_s27 }
  0x1b   : > { %301 = vrot.lane.b32.xlu0 %v1145_v12, %s1070_s28 }
  0x1d   : > { %295 = vrot.lane.b32.xlu1 %v293_v13, %s1070_s28 }
  0x1f   : > { %283 = vrot.lane.b32.xlu0 %v280_v14, %s1069_s27 }
  0x21   : > { %299 = vrot.lane.b32.xlu1 %v294_v15, %s1070_s28 }
  0x23   : > { %310 = vrot.lane.b32.xlu0 %v279_v11, %s1071_s29 }
  0x25   : > { %312 = vrot.lane.b32.xlu1 %v293_v13, %s1071_s29 }
  0x27   : > { %314 = vrot.lane.b32.xlu0 %v1133_v7, %s1071_s29 }
  0x29   : > { %308 = vrot.lane.b32.xlu1 %v307_v16, %s1071_s29 }
  0x2b   : > { %322 = vrot.lane.b32.xlu0 %v1139_v9, %s1072_s30 }
  0x2d   : > { %324 = vrot.lane.b32.xlu1 %v1145_v12, %s1072_s30 }
  0x2f   : > { %326 = vrot.lane.b32.xlu0 %v271_v17, %s1072_s30 }
  0x31   : > { %334 = vrot.lane.b32.xlu1 %v280_v14, %s1073_s7 }
  0x33   : > { %336 = vrot.lane.b32.xlu0 %v1133_v7, %s1073_s7 }
  0x35   : > { %338 = vrot.lane.b32.xlu1 %v1139_v9, %s1073_s7 }
  0x37   : > { %320 = vrot.lane.b32.xlu0 %v1133_v7, %s1072_s30 }
  0x39   : > { %332 = vrot.lane.b32.xlu1 %v279_v11, %s1073_s7 }
  0x3b   : > { %346 = vrot.lane.b32.xlu0 %v1133_v7, %s1074_s8 }
  0x3d   : > { %348 = vrot.lane.b32.xlu1 %v294_v15, %s1074_s8 }
  0x3f   : > { %350 = vrot.lane.b32.xlu0 %v1145_v12, %s1074_s8 }
  0x41   : > { %344 = vrot.lane.b32.xlu1 %v293_v13, %s1074_s8 }
  0x43   : > { %358 = vrot.lane.b32.xlu0 %v279_v11, %s1075_s9 }
  0x45   : > { %360 = vrot.lane.b32.xlu1 %v293_v13, %s1075_s9 }
  0x47   : > { %362 = vrot.lane.b32.xlu0 %v1133_v7, %s1075_s9 }
  0x49   : > { %356 = vrot.lane.b32.xlu1 %v307_v16, %s1075_s9 }
  0x4b   : > { %368 = vrot.lane.b32.xlu0 %v1133_v7, %s1076_s10 }
  0x4d   : > { %370 = vrot.lane.b32.xlu1 %v1139_v9, %s1076_s10 }
  0x4f   : > { %372 = vrot.lane.b32.xlu0 %v1145_v12, %s1076_s10 }
  0x51   : > { %374 = vrot.lane.b32.xlu1 %v271_v17, %s1076_s10 }
  0x85   : > { %v286_v18 = vpop.permute.xlu0 %285 }
  0x87   : > { %v288_v19 = vpop.permute.xlu1 %287 }
  0x88   : > { %v392_v29 = vsel %vm380_vm0, %v271_v17, %v288_v19  ;;  %v292_v30 = vsel %vm289_vm1, %v286_v18, %v288_v19 }
  0x89   : > { %v1195_v20 = vpop.permute.xlu0 %297  ;;  %v389_v37 = vsel %vm380_vm0, %v1145_v12, %v292_v30 }
  0x8b   : > { %v1197_v21 = vpop.permute.xlu1 %281 }
  0x8d   : > { %v302_v22 = vpop.permute.xlu0 %301 }
  0x8e   : > { %v401_v31 = vsel %vm393_vm2, %v392_v29, %v302_v22  ;;  %v1079_v29 = vmov 0  }
  0x8f   : > { %v1199_v23 = vpop.permute.xlu1 %295  ;;  %539 = vmatprep.mubr.bf16.mxu0 %v1079_v29  ;;  %1047 = vset.pattern.permute.xlu0 %v1079_v29 }
  0x90   : > { %1048 = vset.pattern.permute.xlu1 %v1079_v29 }
  0x91   : > { %v1201_v24 = vpop.permute.xlu0 %283 }
  0x92   : > { %v291_v0 = vsel %vm289_vm1, %v1201_v24, %v286_v18  ;;  %v290_v11 = vsel %vm289_vm1, %v1197_v21, %v1201_v24  ;;  %v304_v18 = vsel %vm303_vm4, %v1199_v23, %v1195_v20 }
  0x93   : > { %v300_v26 = vpop.permute.xlu1 %299  ;;  %v386_v6 = vsel %vm380_vm0, %v1139_v9, %v291_v0  ;;  %v383_v15 = vsel %vm380_vm0, %v1133_v7, %v290_v11  ;;  %v603_v0 = vsub.s32 2, %v1126_v3 }
  0x94   : > { %v306_v33 = vsel %vm303_vm4, %v300_v26, %v302_v22  ;;  %v305_v8 = vsel %vm303_vm4, %v1195_v20, %v300_v26  ;;  %v395_v22 = vsel %vm393_vm2, %v383_v15, %v304_v18 }
  0x95   : > { %v1204_v27 = vpop.permute.xlu0 %310  ;;  %v399_v39 = vsel %vm393_vm2, %v389_v37, %v306_v33  ;;  %v397_v9 = vsel %vm393_vm2, %v386_v6, %v305_v8 }
  0x97   : > { %v313_v28 = vpop.permute.xlu1 %312 }
  0x98   : > { %v318_v12 = vsel %vm316_vm5, %v1204_v27, %v313_v28 }
  0x99   : > { %v315_v32 = vpop.permute.xlu0 %314  ;;  %v406_v16 = vsel %vm402_vm3, %v397_v9, %v318_v12 }
  0x9a   : > { %v410_v34 = vsel %vm402_vm3, %v401_v31, %v315_v32  ;;  %v319_v35 = vsel %vm316_vm5, %v313_v28, %v315_v32 }
  0x9b   : > { %v309_v36 = vpop.permute.xlu1 %308  ;;  %460 = vrot.lane.b32.xlu1 %v410_v34, %s1078_s11  ;;  %v408_v40 = vsel %vm402_vm3, %v399_v39, %v319_v35 }
  0x9c   : > { %v317_v17 = vsel %vm316_vm5, %v309_v36, %v1204_v27 }
  0x9d   : > { %v1215_v38 = vpop.permute.xlu0 %322  ;;  %v404_v24 = vsel %vm402_vm3, %v395_v22, %v317_v17 }
  0x9f   : > { %v325_v41 = vpop.permute.xlu1 %324  ;;  %458 = vrot.lane.b32.xlu1 %v408_v40, %s1078_s11 }
  0xa0   : > { %v330_v26 = vsel %vm328_vm8, %v1215_v38, %v325_v41 }
  0xa1   : > { %v327_v42 = vpop.permute.xlu0 %326 }
  0xa2   : > { %v331_v60 = vsel %vm328_vm8, %v325_v41, %v327_v42 }
  0xa3   : > { %v335_v43 = vpop.permute.xlu1 %334 }
  0xa5   : > { %v337_v44 = vpop.permute.xlu0 %336 }
  0xa6   : > { %v342_v21 = vsel %vm340_vm6, %v335_v43, %v337_v44 }
  0xa7   : > { %v339_v45 = vpop.permute.xlu1 %338  ;;  %v416_v20 = vsel %vm380_vm0, %v330_v26, %v342_v21 }
  0xa8   : > { %v422_v54 = vsel %vm380_vm0, %v327_v42, %v339_v45  ;;  %v343_v55 = vsel %vm340_vm6, %v337_v44, %v339_v45 }
  0xa9   : > { %v1220_v46 = vpop.permute.xlu0 %320  ;;  %v419_v63 = vsel %vm380_vm0, %v331_v60, %v343_v55 }
  0xaa   : > { %v329_v32 = vsel %vm328_vm8, %v1220_v46, %v1215_v38  ;;  %v440_v38 = vld [vmem:[%s1415_s3] sm:$0xff] }
  0xab   : > { %v333_v47 = vpop.permute.xlu1 %332 }
  0xac   : > { %v341_v23 = vsel %vm340_vm6, %v333_v47, %v335_v43 }
  0xad   : > { %v347_v48 = vpop.permute.xlu0 %346  ;;  %v413_v34 = vsel %vm380_vm0, %v329_v32, %v341_v23 }
  0xaf   : > { %v349_v49 = vpop.permute.xlu1 %348 }
  0xb0   : > { %v354_v7 = vsel %vm352_vm7, %v347_v48, %v349_v49 }
  0xb1   : > { %v351_v50 = vpop.permute.xlu0 %350  ;;  %v426_v28 = vsel %vm393_vm2, %v416_v20, %v354_v7 }
  0xb2   : > { %v430_v56 = vsel %vm393_vm2, %v422_v54, %v351_v50  ;;  %v355_v58 = vsel %vm352_vm7, %v349_v49, %v351_v50 }
  0xb3   : > { %v345_v51 = vpop.permute.xlu1 %344  ;;  %v428_v2 = vsel %vm393_vm2, %v419_v63, %v355_v58  ;;  %v595_v63 = vsub.s32 0, %v1126_v3 }
  0xb4   : > { %v353_v30 = vsel %vm352_vm7, %v345_v51, %v347_v48 }
  0xb5   : > { %v359_v52 = vpop.permute.xlu0 %358  ;;  %v424_v35 = vsel %vm393_vm2, %v413_v34, %v353_v30 }
  0xb7   : > { %v361_v53 = vpop.permute.xlu1 %360 }
  0xb8   : > { %v366_v27 = vsel %vm364_vm9, %v359_v52, %v361_v53 }
  0xb9   : > { %v363_v57 = vpop.permute.xlu0 %362  ;;  %v434_v31 = vsel %vm402_vm3, %v426_v28, %v366_v27 }
  0xba   : > { %v438_v59 = vsel %vm402_vm3, %v430_v56, %v363_v57  ;;  %v367_v61 = vsel %vm364_vm9, %v361_v53, %v363_v57 }
  0xbb   : > { %v357_v62 = vpop.permute.xlu1 %356  ;;  %468 = vrot.lane.b32.xlu1 %v438_v59, %s1078_s11  ;;  %v436_v4 = vsel %vm402_vm3, %v428_v2, %v367_v61  ;;  %v591_v2 = vld [vmem:[%s1413_s1] sm:$0x7] }
  0xbc   : > { %v365_v33 = vsel %vm364_vm9, %v357_v62, %v359_v52  ;;  %v439_v62 = vld [vmem:[%s1414_s2] sm:$0xf]  ;;  %v604_v12 = vrot.slane %v591_v2, %v603_v0 }
  0xbd   : > { %v369_v1 = vpop.permute.xlu0 %368  ;;  %v432_v36 = vsel %vm402_vm3, %v424_v35, %v365_v33 }
  0xbf   : > { %v371_v5 = vpop.permute.xlu1 %370  ;;  %466 = vrot.lane.b32.xlu1 %v436_v4, %s1078_s11  ;;  %v599_v4 = vsub.s32 1, %v1126_v3 }
  0xc0   : > { %v377_v10 = vsel %vm376_vm10, %v369_v1, %v371_v5 }
  0xc1   : > { %470 = vrot.lane.b32.xlu0 %v377_v10, %s1078_s11  ;;  %v373_v13 = vpop.permute.xlu0 %372  ;;  %v596_v10 = vrot.slane %v591_v2, %v595_v63  ;;  %v600_v15 = vrot.slane %v591_v2, %v599_v4 }
  0xc2   : > { %v378_v14 = vsel %vm376_vm10, %v371_v5, %v373_v13 }
  0xc3   : > { %472 = vrot.lane.b32.xlu1 %v378_v14, %s1078_s11  ;;  %v375_v19 = vpop.permute.xlu1 %374 }
  0xc4   : > { %v379_v37 = vsel %vm376_vm10, %v373_v13, %v375_v19 }
  0xc5   : > { %456 = vrot.lane.b32.xlu0 %v406_v16, %s1078_s11 }
  0xc7   : > { %476 = vrot.lane.b32.xlu1 %v375_v19, %s1078_s11 }
  0xc9   : > { %454 = vrot.lane.b32.xlu0 %v404_v24, %s1078_s11 }
  0xcd   : > { %464 = vrot.lane.b32.xlu0 %v434_v31, %s1078_s11 }
  0xd1   : > { %462 = vrot.lane.b32.xlu0 %v432_v36, %s1078_s11 }
  0xd5   : > { %474 = vrot.lane.b32.xlu0 %v379_v37, %s1078_s11 }
  0xd9   : > { %443 = vperm.xlu0 %1047, %v440_v38  }
 0x10d   : > { %v461_v39 = vpop.permute.xlu1 %460 }
 0x111   : > { %v459_v40 = vpop.permute.xlu1 %458 }
 0x112   : > { %v481_v41 = vsel %vm478_vm12, %v459_v40, %v461_v39 }
 0x113   : > { %1002 = vmatpush3.bf16.msra.mxu1 %v481_v41 }
 0x114   : > { %1003 = vmatprep.subr.bf16.mxu1 %v1077_v25 }
 0x12d   : > { %v469_v42 = vpop.permute.xlu1 %468 }
 0x131   : > { %v467_v43 = vpop.permute.xlu1 %466 }
 0x132   : > { %v484_v44 = vsel %vm478_vm12, %v467_v43, %v469_v42 }
 0x133   : > { %v471_v45 = vpop.permute.xlu0 %470  ;;  %1004 = vmatpush3.bf16.msra.mxu1 %v484_v44 }
 0x134   : > { %1005 = vmatprep.subr.bf16.mxu1 %v1077_v25 }
 0x135   : > { %v473_v52 = vpop.permute.xlu1 %472 }
 0x136   : > { %v485_v56 = vsel %vm478_vm12, %v471_v45, %v473_v52 }
 0x137   : > { %v457_v46 = vpop.permute.xlu0 %456  ;;  %v499_v60 = vsel %vm380_vm0, %v485_v56, 0 }
 0x138   : > { %v480_v47 = vsel %vm478_vm12, %v457_v46, %v459_v40 }
 0x139   : > { %507 = vmatprep.subr.bf16.mxu0 %v480_v47  ;;  %v477_v55 = vpop.permute.xlu1 %476 }
 0x13b   : > { %v455_v48 = vpop.permute.xlu0 %454 }
 0x13c   : > { %v479_v49 = vsel %vm478_vm12, %v455_v48, %v457_v46 }
 0x13d   : > { %508 = vmatpush1.bf16.msra.mxu0 %v479_v49 }
 0x13f   : > { %v465_v50 = vpop.permute.xlu0 %464 }
 0x140   : > { %v483_v51 = vsel %vm478_vm12, %v465_v50, %v467_v43 }
 0x141   : > { %509 = vmatprep.subr.bf16.mxu0 %v483_v51 }
 0x143   : > { %v463_v53 = vpop.permute.xlu0 %462 }
 0x144   : > { %v482_v54 = vsel %vm478_vm12, %v463_v53, %v465_v50 }
 0x145   : > { %510 = vmatpush1.bf16.msra.mxu0 %v482_v54 }
 0x147   : > { %v475_v57 = vpop.permute.xlu0 %474 }
 0x148   : > { %v486_v58 = vsel %vm478_vm12, %v473_v52, %v475_v57  ;;  %v487_v59 = vsel %vm478_vm12, %v475_v57, %v477_v55 }
 0x149   : > { %975 = vmatprep.subr.msk.bf16.mxu0 %vm380_vm0, %v486_v58  ;;  %v505_v61 = vsel %vm380_vm0, %v487_v59, 0  ;;  %vm910_vm0 = vcmask 519168  }
 0x14a   : > { %512 = vmatpush1.bf16.msra.mxu0 %v499_v60  ;;  %1006 = vmatpush3.bf16.msra.mxu1 %v505_v61 }
 0x14b   : > { %1011 = vmatprep.subr.bf16.mxu1 %v1077_v25 }
 0x14d   : > { %976 = vmatmul.mubr.msk.bf16.vlgmr.msra.gmra.mrb[0].mxu0 %vm494_vm13, %v439_v62  ;;  %1008 = vmatmul.mubr.msk.bf16.vlgmr.msra.gmra.mrb[0].mxu1 %vm494_vm13, %v439_v62 }
 0x14e   : > { %853 = vmatprep.mubr.bf16.mxu0 %v1079_v29  ;;  %1021 = vmatprep.mubr.msk.bf16.mxu1 %vm1080_vm11, %v1077_v25 }
 0x158   : > { %v444_v1 = vpop.permute.xlu0 %443 }
 0x220   : > { %v541_v5 = vpop.f32.mrb[0].mxu0  ;;  %v582_v6 = vpop.f32.mrb[0].mxu1 }
 0x221   : > { %v542_v8 = vadd.f32 %v541_v5, %v444_v1  ;;  %v583_v11 = vadd.f32 %v582_v6, %v444_v1  ;;  %v543_v13 = vpop.f32.mrb[1].mxu0  ;;  %v1009_v14 = vpop.f32.mrb[1].mxu1 }
 0x222   : > { %v544_v9 = vadd.f32 %v543_v13, %v444_v1  ;;  %v545_v16 = vpop.f32.mrb[2].mxu0  ;;  %v585_v17 = vpop.f32.mrb[2].mxu1 }
 0x223   : > { %v588_v18 = vmax.f32 %v542_v8, 0.0  ;;  %v590_v19 = vmax.f32 %v583_v11, 0.0  ;;  %v546_v21 = vpop.f32.mrb[3].mxu0  ;;  %v1010_v22 = vpop.f32.mrb[3].mxu1 }
 0x224   : > { %v589_v7 = vmax.f32 %v544_v9, 0.0 }
 0x225   : > { %v608_v24 = vmul.f32 %v596_v10, %v588_v18  ;;  %v610_v26 = vmul.f32 %v604_v12, %v590_v19  ;;  %v738_v19 = vld [vmem:[%s1417_s5] sm:$0xf] }
 0x226   : > { %v609_v3 = vmul.f32 %v600_v15, %v589_v7 }
 0x227   : > { %v990_v27 = vpack.c.bf16 %v610_v26, %v610_v26  ;;  %v1059_v28 = vpack.c.bf16 %v608_v24, %v608_v24 }
 0x228   : > { %v1058_v23 = vpack.c.bf16 %v609_v3, %v609_v3 }
 0x229   : > { %626 = vst.msk [vmem:[#allocation2 + $0x8] sm:$0xf] %vm625_vm14, %v990_v27 }
 0x230   : > { %v1051_v20 = vld [vmem:[#allocation2 + $0x8] ss:$0 sps:$4 sm:$0xff]  }
 0x231   : > { %649 = vrot.lane.b32.xlu0 %v1051_v20, %s1070_s28  ;;  %641 = vrot.lane.b32.xlu1 %v1051_v20, %s1069_s27 }
 0x235   : > { %657 = vrot.lane.b32.xlu0 %v1051_v20, %s1071_s29  ;;  %639 = vrot.lane.b32.xlu1 %v1058_v23, %s1069_s27 }
 0x239   : > { %665 = vrot.lane.b32.xlu0 %v1051_v20, %s1072_s30  ;;  %647 = vrot.lane.b32.xlu1 %v1058_v23, %s1070_s28 }
 0x23d   : > { %673 = vrot.lane.b32.xlu0 %v1051_v20, %s1073_s7  ;;  %655 = vrot.lane.b32.xlu1 %v1058_v23, %s1071_s29 }
 0x241   : > { %681 = vrot.lane.b32.xlu0 %v1051_v20, %s1074_s8  ;;  %645 = vrot.lane.b32.xlu1 %v1059_v28, %s1070_s28 }
 0x245   : > { %689 = vrot.lane.b32.xlu0 %v1051_v20, %s1075_s9  ;;  %663 = vrot.lane.b32.xlu1 %v1058_v23, %s1072_s30 }
 0x249   : > { %637 = vrot.lane.b32.xlu0 %v1059_v28, %s1069_s27  ;;  %671 = vrot.lane.b32.xlu1 %v1058_v23, %s1073_s7 }
 0x24d   : > { %653 = vrot.lane.b32.xlu0 %v1059_v28, %s1071_s29  ;;  %661 = vrot.lane.b32.xlu1 %v1059_v28, %s1072_s30 }
 0x251   : > { %669 = vrot.lane.b32.xlu0 %v1059_v28, %s1073_s7  ;;  %679 = vrot.lane.b32.xlu1 %v1058_v23, %s1074_s8 }
 0x255   : > { %685 = vrot.lane.b32.xlu0 %v1059_v28, %s1075_s9  ;;  %687 = vrot.lane.b32.xlu1 %v1058_v23, %s1075_s9 }
 0x259   : > { %695 = vrot.lane.b32.xlu0 %v1058_v23, %s1076_s10  ;;  %677 = vrot.lane.b32.xlu1 %v1059_v28, %s1074_s8 }
 0x25d   : > { %693 = vrot.lane.b32.xlu1 %v1059_v28, %s1076_s10 }
 0x261   : > { %697 = vrot.lane.b32.xlu1 %v1051_v20, %s1076_s10 }
 0x2a3   : > { %v650_v29 = vpop.permute.xlu0 %649  ;;  %v642_v30 = vpop.permute.xlu1 %641 }
 0x2a4   : > { %v709_v31 = vsel %vm393_vm2, %v1051_v20, %v642_v30 }
 0x2a5   : > { %760 = vrot.lane.b32.xlu1 %v709_v31, %s1069_s27 }
 0x2a7   : > { %v658_v32 = vpop.permute.xlu0 %657  ;;  %v640_v33 = vpop.permute.xlu1 %639 }
 0x2a8   : > { %v718_v34 = vsel %vm393_vm2, %v650_v29, %v658_v32  ;;  %v644_v48 = vsel %vm289_vm1, %v640_v33, %v642_v30 }
 0x2a9   : > { %766 = vrot.lane.b32.xlu0 %v718_v34, %s1069_s27  ;;  %v706_v51 = vsel %vm393_vm2, %v1058_v23, %v644_v48 }
 0x2ab   : > { %v666_v35 = vpop.permute.xlu0 %665  ;;  %v648_v36 = vpop.permute.xlu1 %647 }
 0x2ac   : > { %v652_v41 = vsel %vm303_vm4, %v648_v36, %v650_v29 }
 0x2af   : > { %v674_v37 = vpop.permute.xlu0 %673  ;;  %v656_v38 = vpop.permute.xlu1 %655 }
 0x2b0   : > { %v727_v39 = vsel %vm393_vm2, %v666_v35, %v674_v37  ;;  %v660_v40 = vsel %vm316_vm5, %v656_v38, %v658_v32 }
 0x2b1   : > { %772 = vrot.lane.b32.xlu1 %v727_v39, %s1069_s27  ;;  %v715_v44 = vsel %vm393_vm2, %v652_v41, %v660_v40 }
 0x2b3   : > { %v682_v42 = vpop.permute.xlu0 %681  ;;  %v646_v43 = vpop.permute.xlu1 %645 }
 0x2b4   : > { %v651_v55 = vsel %vm303_vm4, %v646_v43, %v648_v36 }
 0x2b5   : > { %764 = vrot.lane.b32.xlu1 %v715_v44, %s1069_s27 }
 0x2b7   : > { %v690_v45 = vpop.permute.xlu0 %689  ;;  %v664_v46 = vpop.permute.xlu1 %663 }
 0x2b8   : > { %v736_v47 = vsel %vm393_vm2, %v682_v42, %v690_v45  ;;  %v668_v60 = vsel %vm328_vm8, %v664_v46, %v666_v35 }
 0x2b9   : > { %778 = vrot.lane.b32.xlu0 %v736_v47, %s1069_s27 }
 0x2bb   : > { %v638_v49 = vpop.permute.xlu0 %637  ;;  %v672_v50 = vpop.permute.xlu1 %671 }
 0x2bc   : > { %v643_v52 = vsel %vm289_vm1, %v638_v49, %v640_v33  ;;  %v676_v58 = vsel %vm340_vm6, %v672_v50, %v674_v37 }
 0x2bd   : > { %758 = vrot.lane.b32.xlu0 %v706_v51, %s1069_s27  ;;  %v703_v57 = vsel %vm393_vm2, %v1059_v28, %v643_v52  ;;  %v724_v63 = vsel %vm393_vm2, %v668_v60, %v676_v58 }
 0x2bf   : > { %v654_v53 = vpop.permute.xlu0 %653  ;;  %v662_v54 = vpop.permute.xlu1 %661 }
 0x2c0   : > { %v659_v56 = vsel %vm316_vm5, %v654_v53, %v656_v38  ;;  %v667_v1 = vsel %vm328_vm8, %v662_v54, %v664_v46 }
 0x2c1   : > { %756 = vrot.lane.b32.xlu0 %v703_v57, %s1069_s27  ;;  %v712_v59 = vsel %vm393_vm2, %v651_v55, %v659_v56 }
 0x2c2   : > { %762 = vrot.lane.b32.xlu1 %v712_v59, %s1069_s27 }
 0x2c3   : > { %v670_v61 = vpop.permute.xlu0 %669  ;;  %v680_v62 = vpop.permute.xlu1 %679 }
 0x2c4   : > { %v675_v0 = vsel %vm340_vm6, %v670_v61, %v672_v50  ;;  %v684_v4 = vsel %vm352_vm7, %v680_v62, %v682_v42 }
 0x2c5   : > { %770 = vrot.lane.b32.xlu0 %v724_v63, %s1069_s27  ;;  %v721_v6 = vsel %vm393_vm2, %v667_v1, %v675_v0 }
 0x2c7   : > { %v688_v2 = vpop.permute.xlu1 %687  ;;  %v686_v8 = vpop.permute.xlu0 %685 }
 0x2c8   : > { %v692_v5 = vsel %vm364_vm9, %v688_v2, %v690_v45  ;;  %v691_v12 = vsel %vm364_vm9, %v686_v8, %v688_v2  ;;  %v737_v45 = vld [vmem:[%s1416_s4] sm:$0x3] }
 0x2c9   : > { %768 = vrot.lane.b32.xlu0 %v721_v6, %s1069_s27  ;;  %v733_v10 = vsel %vm393_vm2, %v684_v4, %v692_v5 }
 0x2ca   : > { %776 = vrot.lane.b32.xlu1 %v733_v10, %s1069_s27 }
 0x2cb   : > { %v678_v11 = vpop.permute.xlu1 %677  ;;  %v696_v9 = vpop.permute.xlu0 %695 }
 0x2cc   : > { %v683_v13 = vsel %vm352_vm7, %v678_v11, %v680_v62 }
 0x2cd   : > { %v730_v14 = vsel %vm393_vm2, %v683_v13, %v691_v12 }
 0x2ce   : > { %774 = vrot.lane.b32.xlu1 %v730_v14, %s1069_s27 }
 0x2cf   : > { %v694_v15 = vpop.permute.xlu1 %693 }
 0x2d0   : > { %v699_v16 = vsel %vm376_vm10, %v694_v15, %v696_v9 }
 0x2d1   : > { %780 = vrot.lane.b32.xlu0 %v699_v16, %s1069_s27 }
 0x2d3   : > { %v698_v17 = vpop.permute.xlu1 %697 }
 0x2d4   : > { %v700_v18 = vsel %vm376_vm10, %v696_v9, %v698_v17 }
 0x2d5   : > { %782 = vrot.lane.b32.xlu1 %v700_v18, %s1069_s27  ;;  %784 = vrot.lane.b32.xlu0 %v698_v17, %s1069_s27  ;;  %s251_s27 = scalar_lea.vmem %s1418_s6, %s1025_s24 }
 0x2d9   : > { %741 = vperm.xlu1 %1048, %v738_v19  }
 0x317   : > { %v761_v21 = vpop.permute.xlu1 %760 }
 0x318   : > { %1012 = vmatpush3.bf16.msra.mxu1 %v761_v21 }
 0x319   : > { %1013 = vmatprep.subr.bf16.mxu1 %v1077_v25 }
 0x31b   : > { %v767_v22 = vpop.permute.xlu0 %766 }
 0x31c   : > { %1014 = vmatpush3.bf16.msra.mxu1 %v767_v22 }
 0x31d   : > { %1015 = vmatprep.subr.bf16.mxu1 %v1077_v25 }
 0x323   : > { %v773_v7 = vpop.permute.xlu1 %772 }
 0x324   : > { %1016 = vmatpush3.bf16.msra.mxu1 %v773_v7 }
 0x325   : > { %1017 = vmatprep.subr.bf16.mxu1 %v1077_v25 }
 0x327   : > { %v765_v27 = vpop.permute.xlu1 %764 }
 0x328   : > { %v789_v29 = vsel %vm289_vm1, %v765_v27, %v767_v22 }
 0x32b   : > { %v779_v24 = vpop.permute.xlu0 %778 }
 0x32c   : > { %1018 = vmatpush3.bf16.msra.mxu1 %v779_v24 }
 0x32d   : > { %1019 = vmatprep.subr.bf16.mxu1 %v1077_v25 }
 0x32f   : > { %v759_v26 = vpop.permute.xlu0 %758 }
 0x330   : > { %v787_v3 = vsel %vm289_vm1, %v759_v26, %v761_v21 }
 0x331   : > { %821 = vmatprep.subr.bf16.mxu0 %v787_v3 }
 0x333   : > { %v757_v20 = vpop.permute.xlu0 %756 }
 0x334   : > { %v786_v23 = vsel %vm289_vm1, %v757_v20, %v759_v26  ;;  %v763_v28 = vpop.permute.xlu1 %762 }
 0x335   : > { %822 = vmatpush1.bf16.msra.mxu0 %v786_v23  ;;  %v788_v31 = vsel %vm289_vm1, %v763_v28, %v765_v27 }
 0x336   : > { %823 = vmatprep.subr.bf16.mxu0 %v789_v29 }
 0x337   : > { %v771_v30 = vpop.permute.xlu0 %770 }
 0x338   : > { %v791_v32 = vsel %vm289_vm1, %v771_v30, %v773_v7 }
 0x339   : > { %824 = vmatpush1.bf16.msra.mxu0 %v788_v31 }
 0x33a   : > { %825 = vmatprep.subr.bf16.mxu0 %v791_v32 }
 0x33b   : > { %v769_v25 = vpop.permute.xlu0 %768 }
 0x33c   : > { %v790_v33 = vsel %vm289_vm1, %v769_v25, %v771_v30  ;;  %v777_v34 = vpop.permute.xlu1 %776 }
 0x33d   : > { %826 = vmatpush1.bf16.msra.mxu0 %v790_v33  ;;  %v793_v35 = vsel %vm289_vm1, %v777_v34, %v779_v24 }
 0x33e   : > { %827 = vmatprep.subr.bf16.mxu0 %v793_v35 }
 0x340   : > { %v775_v36 = vpop.permute.xlu1 %774 }
 0x341   : > { %v792_v37 = vsel %vm289_vm1, %v775_v36, %v777_v34 }
 0x342   : > { %828 = vmatpush1.bf16.msra.mxu0 %v792_v37 }
 0x343   : > { %v781_v38 = vpop.permute.xlu0 %780 }
 0x347   : > { %v785_v39 = vpop.permute.xlu0 %784  ;;  %v783_v40 = vpop.permute.xlu1 %782 }
 0x348   : > { %v819_v41 = vsel %vm393_vm2, %v785_v39, 0  ;;  %v794_v42 = vsel %vm289_vm1, %v781_v38, %v783_v40  ;;  %v795_v43 = vsel %vm289_vm1, %v783_v40, %v785_v39 }
 0x349   : > { %v813_v44 = vsel %vm393_vm2, %v794_v42, 0  ;;  %983 = vmatprep.subr.msk.bf16.mxu0 %vm393_vm2, %v795_v43  ;;  %1020 = vmatpush3.bf16.msra.mxu1 %v819_v41 }
 0x34a   : > { %830 = vmatpush1.bf16.msra.mxu0 %v813_v44 }
 0x34c   : > { %1022 = vmatmul.mubr.msk.bf16.vlgmr.msra.gmra.mrb[4].mxu1 %vm808_vm15, %v737_v45 }
 0x34d   : > { %984 = vmatmul.mubr.msk.bf16.vlgmr.msra.gmra.mrb[4].mxu0 %vm808_vm15, %v737_v45 }
 0x358   : > { %v742_v46 = vpop.permute.xlu1 %741 }
 0x41f   : > { %v896_v47 = vpop.f32.mrb[4].mxu1 }
 0x420   : > { %v855_v48 = vpop.f32.mrb[4].mxu0  ;;  %v897_v49 = vadd.f32 %v896_v47, %v742_v46  ;;  %v1023_v50 = vpop.f32.mrb[5].mxu1 }
 0x421   : > { %v856_v51 = vadd.f32 %v855_v48, %v742_v46  ;;  %v857_v52 = vpop.f32.mrb[5].mxu0  ;;  %v899_v53 = vpop.f32.mrb[6].mxu1 }
 0x422   : > { %1052 = vtanh.f32 %v897_v49  ;;  %v858_v54 = vadd.f32 %v857_v52, %v742_v46  ;;  %v859_v55 = vpop.f32.mrb[6].mxu0  ;;  %v1024_v56 = vpop.f32.mrb[7].mxu1 }
 0x423   : > { %1054 = vtanh.f32 %v856_v51  ;;  %v860_v57 = vpop.f32.mrb[7].mxu0 }
 0x424   : > { %1056 = vtanh.f32 %v858_v54 }
 0x42c   : > { %v1053_v58 = vpop.eup %1052 }
 0x42d   : > { %v1055_v59 = vpop.eup %1054  ;;  %911 = vst.msk [vmem:[%s251_s27 + $0x8] sm:$0xf] %vm910_vm0, %v1053_v58 }
 0x42e   : > { %v1057_v60 = vpop.eup %1056 }
 0x42f   : > { %v907_v61 = vcombine.low %v1055_v59, %v1057_v60 }
 0x431   : > { %909 = vst [vmem:[%s251_s27] sm:$0xff] %v907_v61 }
 0x432 PF: > { %s16_s21 = sadd.s32 1, %s1066_s21  }
 0x433   : > { %p13_p4 = scmp.ge.s32.totalorder %s16_s21, 4  }
 0x435   :  { %15 = sbr.rel (!%p13_p4) target bundleno = 1 (0x1), region = 74 }

// kernel: cyclegan_forward.13
= control target key start
LH: loop header
LB: loop body
LE: loop exit
PB: predicated region body
PF: predicated region fallthrough
CT: control target
= control target key end

     0   :  { %s398_s9 = smov 0   ;;  %s400_s10 = smov 0   ;;  %s441_s0 = inlined_call_operand.vmem [shape: f32[4,16,128], index: 0, kind: input, shape index: {}]   ;;  %s442_s1 = inlined_call_operand.vmem [shape: f32[4,16,128], index: 1, kind: input, shape index: {}]   ;;  %s443_s2 = inlined_call_operand.vmem [shape: f32[4,1,1], index: 2, kind: output, shape index: {}]  }
   0x1   :  { %s402_s11 = smov 0  }
   0x2 LB: > { %s24_s12 = sadd.s32 1, %s376_s10  ;;  %p322_p0 = scmp.ge.s32.totalorder %s380_s11, 1  ;;  %s380_s11 = sphi %s402_s11, %s12_s11   ;;  %s376_s10 = sphi %s400_s10, %s445_s10   ;;  %s372_s9 = sphi %s398_s9, %s444_s9  }
   0x3   : > { %p26_p1 = scmp.ge.s32.totalorder %s24_s12, 4  ;;  %p148_p2 = scmp.lt.s32.totalorder %s380_s11, 5 }
   0x5   : > { %s447_s12 = smov (%p26_p1, %s24_s12), 0  ;;  %p149_p3 = pnand %p322_p0, %p148_p2 }
   0x6   : > { %p182_p4 = scmp.lt.s32.totalorder (!%p149_p3), %s372_s9, 3  ;;  %vm208_vm0 = vcmask (!%p149_p3), 0   ;;  %v382_v9 = vmov (!%p149_p3), 0.0  }
   0x7   : > { %152 = sbr.rel (%p149_p3) target bundleno = 243 (0xf3), region = 28  ;;  %209 = vst.msk [vmem:[#allocation2] sm:$0x1] (!%p149_p3), %vm208_vm0, %v382_v9 }
   0xe   : > { %s449_s9 = smov (!%p182_p4, %s372_s9), 3  ;;  %v210_v17 = vld [vmem:[#allocation2] sm:$0x1] }
   0xf   : > { %s329_s13 = sshll.u32 %s449_s9, 4  ;;  %s203_s23 = scalar_lea.vmem %s443_s2, %s449_s9 }
  0x10   : > { %s189_s16 = scalar_lea.vmem %s441_s0, %s329_s13  ;;  %s199_s19 = scalar_lea.vmem %s442_s1, %s329_s13 }
  0x11   : > { %v211_v0 = vld [vmem:[%s189_s16] sm:$0xff]  ;;  %v212_v1 = vld [vmem:[%s189_s16 + $0x8] sm:$0xff] }
  0x12   : > { %v213_v2 = vld [vmem:[%s199_s19] sm:$0xff]  ;;  %v214_v3 = vld [vmem:[%s199_s19 + $0x8] sm:$0xff] }
  0x13   : > { %v215_v4 = vsub.f32 %v211_v0, %v213_v2  ;;  %v216_v5 = vsub.f32 %v212_v1, %v214_v3 }
  0x15   : > { %v217_v6 = vand.u32 2147483647, %v215_v4  ;;  %v218_v7 = vand.u32 2147483647, %v216_v5 }
  0x17   : > { %v219_v8 = vadd.f32 %v218_v7, %v217_v6 }
  0x19   : > { %220 = vadd.xlane.f32.xlu0 %v219_v8 }
  0xa6   : > { %v221_v10 = vpop.xlane.xlu0 %220 }
  0xa7   : > { %v222_v11 = vrot.slane %v221_v10, 4 }
  0xa9   : > { %v223_v12 = vadd.f32 %v222_v11, %v221_v10 }
  0xab   : > { %v224_v13 = vrot.slane %v223_v12, 2 }
  0xad   : > { %v225_v14 = vadd.f32 %v224_v13, %v223_v12 }
  0xaf   : > { %v226_v15 = vrot.slane %v225_v14, 1 }
  0xb1   : > { %v227_v16 = vadd.f32 %v226_v15, %v225_v14 }
  0xb3   : > { %331 = vpush %v227_v16 }
  0xe4   : > { %s332_s20 = spop %331 }
  0xe5   : > { %v229_v18 = vstv %s332_s20 }
  0xe6   : > { %v230_v19 = vadd.f32 %v229_v18, %v210_v17 }
  0xe8   : > { %232 = vst.msk [vmem:[#allocation2] sm:$0x1] %vm208_vm0, %v230_v19 }
  0xef   : > { %v236_v20 = vld [vmem:[#allocation2] sm:$0x1] }
  0xf0   : > { %v237_v21 = vmul.f32 0.00048828125, %v236_v20 }
  0xf2   : > { %238 = vst.msk [vmem:[%s203_s23] sm:$0x1] %vm208_vm0, %v237_v21 }
  0xf3 PF: > { %s12_s11 = sadd.s32 1, %s380_s11   ;;  %s444_s9 = smov %s376_s10 }
  0xf4   : > { %p9_p5 = scmp.ge.s32.totalorder %s12_s11, 6   ;;  %s445_s10 = smov %s447_s12 }
  0xf6   :  { %11 = sbr.rel (!%p9_p5) target bundleno = 2 (0x2), region = 69 }

// kernel: cyclegan_forward.11
= control target key start
LH: loop header
LB: loop body
LE: loop exit
PB: predicated region body
PF: predicated region fallthrough
CT: control target
= control target key end

     0   :  { %s1218_s23 = smov 0   ;;  %s1547_s0 = inlined_call_operand.vmem [shape: bf16[4,4,460], index: 0, kind: input, shape index: {}]   ;;  %s1548_s1 = inlined_call_operand.vmem [shape: f32[1,380], index: 1, kind: input, shape index: {}]   ;;  %s1549_s2 = inlined_call_operand.vmem [shape: bf16[8,36], index: 2, kind: input, shape index: {}]   ;;  %s1550_s3 = inlined_call_operand.vmem [shape: f32[8,1], index: 3, kind: input, shape index: {}]   ;;  %s1551_s4 = inlined_call_operand.vmem [shape: bf16[1,72], index: 4, kind: input, shape index: {}]   ;;  %s1552_s5 = inlined_call_operand.<no memory space> [shape: f32[1,1], index: 5, kind: input, shape index: {}]   ;;  %s1553_s6 = inlined_call_operand.vmem [shape: f32[4,1,2], index: 6, kind: output, shape index: {}]  }
   0x1   :  { %v11_v0 = vstv %s1552_s5 }
   0x2   :  { %12 = vst [vmem:[#allocation3] sm:$0x1] %v11_v0 }
   0x3 LB: > { %s1062_s24 = sadd.s32 4294967295, %s1165_s23   ;;  %p1066_p0 = scmp.ge.s32.totalorder %s1165_s23, 1  ;;  %s1165_s23 = sphi %s1218_s23, %s18_s23  }
   0x4   : > { %p214_p1 = scmp.lt.s32.totalorder %s1165_s23, 5 }
   0x6   : > { %p215_p2 = pnand %p1066_p0, %p214_p1 }
   0x7   : > { %p242_p3 = scmp.lt.s32.totalorder (!%p215_p2), %s1062_s24, 3  ;;  %v257_v1 = vlaneseq (!%p215_p2)  ;;  %v1167_v2 = vmov (!%p215_p2), 1983009808   ;;  %s1168_s28 = smov (!%p215_p2), 127   ;;  %v1176_v26 = vmov (!%p215_p2), 0.0   ;;  %vm378_vm0 = vcmask (!%p215_p2), 1041408  }
   0x8   : > { %218 = sbr.rel (%p215_p2) target bundleno = 1253 (0x4e5), region = 44  ;;  %v255_v3 = vunpack.c.l.s4 (!%p215_p2), %v1167_v2  ;;  %s1169_s29 = smov (!%p215_p2), 126   ;;  %1095 = vmatprep.subr.bf16.mxu1 (!%p215_p2), %v1176_v26  ;;  %vm287_vm1 = vcmask (!%p215_p2), 1039360   ;;  %vm391_vm2 = vcmask (!%p215_p2), 1043456   ;;  %vm400_vm3 = vcmask (!%p215_p2), 1045504  }
   0x9   : > { %v1228_v4 = vshrl.u32 (!%p215_p2), %v257_v1, 7  ;;  %s1170_s30 = smov (!%p215_p2), 108   ;;  %s1171_s7 = smov (!%p215_p2), 107   ;;  %vm301_vm4 = vcmask (!%p215_p2), 1031168   ;;  %vm314_vm5 = vcmask (!%p215_p2), 883712   ;;  %vm338_vm6 = vcmask (!%p215_p2), 867328  }
   0xa   : > { %v256_v5 = vunpack.c.0.s8 (!%p215_p2), %v255_v3  ;;  %s1172_s8 = smov (!%p215_p2), 106   ;;  %s1173_s9 = smov (!%p215_p2), 88   ;;  %vm350_vm7 = vcmask (!%p215_p2), 719872   ;;  %vm326_vm8 = vcmask (!%p215_p2), 875520   ;;  %vm362_vm9 = vcmask (!%p215_p2), 711680  }
   0xb   : > { %s1174_s10 = smov (!%p215_p2), 87   ;;  %s1175_s11 = smov (!%p215_p2), 86   ;;  %vm374_vm10 = vcmask (!%p215_p2), 703488   ;;  %vm1179_vm11 = vmmov (!%p215_p2), 0   ;;  %vm476_vm12 = vcmask (!%p215_p2), 891904   ;;  %vm492_vm13 = vcmask (!%p215_p2), 293888  }
   0xc   : > { %v259_v6 = vsub.s32 (!%p215_p2), %v256_v5, %v1228_v4  ;;  %s1177_s12 = smov (!%p215_p2), 109   ;;  %1101 = vmatprep.mubr.msk.bf16.mxu1 (!%p215_p2), %vm1179_vm11, %v1176_v26 }
   0xf   : > { %s1555_s24 = smov (!%p242_p3, %s1062_s24), 3 }
  0x10   : > { %s1082_s5 = sshll.u32 %s1555_s24, 3  ;;  %s249_s26 = scalar_lea.vmem %s1553_s6, %s1555_s24 }
  0x11   : > { %s246_s27 = scalar_lea.vmem %s1547_s0, %s1082_s5 }
  0x12   : > { %v251_v7 = vld [vmem:[%s246_s27] sm:$0xff] }
  0x13   : > { %v1235_v8 = vrot.slane %v251_v7, %v259_v6  ;;  %v270_v9 = vcombine.low %v251_v7, %v251_v7  ;;  %v253_v11 = vcombine.high %v251_v7, %v251_v7 }
  0x15   : > { %283 = vrot.lane.b32.xlu0 %v1235_v8, %s1168_s28  ;;  %v1241_v10 = vcombine.high %v1235_v8, %v1235_v8  ;;  %v277_v12 = vrot.slane %v270_v9, %v259_v6  ;;  %v1247_v13 = vrot.slane %v253_v11, %v259_v6  ;;  %v291_v14 = vcombine.low %v1235_v8, %v1235_v8 }
  0x17   : > { %285 = vrot.lane.b32.xlu1 %v1241_v10, %s1168_s28  ;;  %v278_v15 = vcombine.high %v277_v12, %v277_v12  ;;  %v292_v16 = vcombine.low %v1247_v13, %v1247_v13  ;;  %v305_v17 = vcombine.low %v277_v12, %v277_v12  ;;  %v269_v18 = vcombine.high %v1247_v13, %v1247_v13 }
  0x19   : > { %295 = vrot.lane.b32.xlu0 %v1235_v8, %s1169_s29 }
  0x1b   : > { %279 = vrot.lane.b32.xlu1 %v277_v12, %s1168_s28 }
  0x1d   : > { %299 = vrot.lane.b32.xlu0 %v1247_v13, %s1169_s29 }
  0x1f   : > { %293 = vrot.lane.b32.xlu1 %v291_v14, %s1169_s29 }
  0x21   : > { %281 = vrot.lane.b32.xlu0 %v278_v15, %s1168_s28 }
  0x23   : > { %297 = vrot.lane.b32.xlu1 %v292_v16, %s1169_s29 }
  0x25   : > { %308 = vrot.lane.b32.xlu0 %v277_v12, %s1170_s30 }
  0x27   : > { %310 = vrot.lane.b32.xlu1 %v291_v14, %s1170_s30 }
  0x29   : > { %312 = vrot.lane.b32.xlu0 %v1235_v8, %s1170_s30 }
  0x2b   : > { %306 = vrot.lane.b32.xlu1 %v305_v17, %s1170_s30 }
  0x2d   : > { %320 = vrot.lane.b32.xlu0 %v1241_v10, %s1171_s7 }
  0x2f   : > { %322 = vrot.lane.b32.xlu1 %v1247_v13, %s1171_s7 }
  0x31   : > { %324 = vrot.lane.b32.xlu0 %v269_v18, %s1171_s7 }
  0x33   : > { %332 = vrot.lane.b32.xlu1 %v278_v15, %s1172_s8 }
  0x35   : > { %334 = vrot.lane.b32.xlu0 %v1235_v8, %s1172_s8 }
  0x37   : > { %336 = vrot.lane.b32.xlu1 %v1241_v10, %s1172_s8 }
  0x39   : > { %318 = vrot.lane.b32.xlu0 %v1235_v8, %s1171_s7 }
  0x3b   : > { %330 = vrot.lane.b32.xlu1 %v277_v12, %s1172_s8 }
  0x3d   : > { %344 = vrot.lane.b32.xlu0 %v1235_v8, %s1173_s9 }
  0x3f   : > { %346 = vrot.lane.b32.xlu1 %v292_v16, %s1173_s9 }
  0x41   : > { %348 = vrot.lane.b32.xlu0 %v1247_v13, %s1173_s9 }
  0x43   : > { %342 = vrot.lane.b32.xlu1 %v291_v14, %s1173_s9 }
  0x45   : > { %356 = vrot.lane.b32.xlu0 %v277_v12, %s1174_s10 }
  0x47   : > { %358 = vrot.lane.b32.xlu1 %v291_v14, %s1174_s10 }
  0x49   : > { %360 = vrot.lane.b32.xlu0 %v1235_v8, %s1174_s10 }
  0x4b   : > { %354 = vrot.lane.b32.xlu1 %v305_v17, %s1174_s10 }
  0x4d   : > { %366 = vrot.lane.b32.xlu0 %v1235_v8, %s1175_s11 }
  0x4f   : > { %368 = vrot.lane.b32.xlu1 %v1241_v10, %s1175_s11 }
  0x51   : > { %370 = vrot.lane.b32.xlu0 %v1247_v13, %s1175_s11 }
  0x53   : > { %372 = vrot.lane.b32.xlu1 %v269_v18, %s1175_s11 }
  0x87   : > { %v284_v19 = vpop.permute.xlu0 %283 }
  0x89   : > { %v286_v20 = vpop.permute.xlu1 %285 }
  0x8a   : > { %v390_v30 = vsel %vm378_vm0, %v269_v18, %v286_v20  ;;  %v290_v31 = vsel %vm287_vm1, %v284_v19, %v286_v20 }
  0x8b   : > { %v1297_v21 = vpop.permute.xlu0 %295  ;;  %v387_v38 = vsel %vm378_vm0, %v1247_v13, %v290_v31 }
  0x8d   : > { %v1299_v22 = vpop.permute.xlu1 %279 }
  0x8f   : > { %v300_v23 = vpop.permute.xlu0 %299 }
  0x90   : > { %v399_v32 = vsel %vm391_vm2, %v390_v30, %v300_v23  ;;  %v1178_v30 = vmov 0  }
  0x91   : > { %v1301_v24 = vpop.permute.xlu1 %293  ;;  %537 = vmatprep.mubr.bf16.mxu0 %v1178_v30  ;;  %1140 = vset.pattern.permute.xlu0 %v1178_v30 }
  0x92   : > { %1141 = vset.pattern.permute.xlu1 %v1178_v30 }
  0x93   : > { %v1303_v25 = vpop.permute.xlu0 %281 }
  0x94   : > { %v289_v1 = vsel %vm287_vm1, %v1303_v25, %v284_v19  ;;  %v288_v12 = vsel %vm287_vm1, %v1299_v22, %v1303_v25  ;;  %v302_v19 = vsel %vm301_vm4, %v1301_v24, %v1297_v21 }
  0x95   : > { %v298_v27 = vpop.permute.xlu1 %297  ;;  %v384_v7 = vsel %vm378_vm0, %v1241_v10, %v289_v1  ;;  %v381_v16 = vsel %vm378_vm0, %v1235_v8, %v288_v12  ;;  %v1412_v1 = vsub.s32 0, %v1228_v4 }
  0x96   : > { %v304_v34 = vsel %vm301_vm4, %v298_v27, %v300_v23  ;;  %v303_v9 = vsel %vm301_vm4, %v1297_v21, %v298_v27  ;;  %v393_v23 = vsel %vm391_vm2, %v381_v16, %v302_v19 }
  0x97   : > { %v1306_v28 = vpop.permute.xlu0 %308  ;;  %v397_v40 = vsel %vm391_vm2, %v387_v38, %v304_v34  ;;  %v395_v10 = vsel %vm391_vm2, %v384_v7, %v303_v9 }
  0x99   : > { %v311_v29 = vpop.permute.xlu1 %310 }
  0x9a   : > { %v316_v13 = vsel %vm314_vm5, %v1306_v28, %v311_v29 }
  0x9b   : > { %v313_v33 = vpop.permute.xlu0 %312  ;;  %v404_v17 = vsel %vm400_vm3, %v395_v10, %v316_v13 }
  0x9c   : > { %v408_v35 = vsel %vm400_vm3, %v399_v32, %v313_v33  ;;  %v317_v36 = vsel %vm314_vm5, %v311_v29, %v313_v33 }
  0x9d   : > { %v307_v37 = vpop.permute.xlu1 %306  ;;  %458 = vrot.lane.b32.xlu1 %v408_v35, %s1177_s12  ;;  %v406_v41 = vsel %vm400_vm3, %v397_v40, %v317_v36 }
  0x9e   : > { %v315_v18 = vsel %vm314_vm5, %v307_v37, %v1306_v28 }
  0x9f   : > { %v1317_v39 = vpop.permute.xlu0 %320  ;;  %v402_v25 = vsel %vm400_vm3, %v393_v23, %v315_v18 }
  0xa1   : > { %v323_v42 = vpop.permute.xlu1 %322  ;;  %456 = vrot.lane.b32.xlu1 %v406_v41, %s1177_s12 }
  0xa2   : > { %v328_v27 = vsel %vm326_vm8, %v1317_v39, %v323_v42 }
  0xa3   : > { %v325_v43 = vpop.permute.xlu0 %324 }
  0xa4   : > { %v329_v61 = vsel %vm326_vm8, %v323_v42, %v325_v43 }
  0xa5   : > { %v333_v44 = vpop.permute.xlu1 %332 }
  0xa7   : > { %v335_v45 = vpop.permute.xlu0 %334 }
  0xa8   : > { %v340_v22 = vsel %vm338_vm6, %v333_v44, %v335_v45 }
  0xa9   : > { %v337_v46 = vpop.permute.xlu1 %336  ;;  %v414_v21 = vsel %vm378_vm0, %v328_v27, %v340_v22 }
  0xaa   : > { %v420_v55 = vsel %vm378_vm0, %v325_v43, %v337_v46  ;;  %v341_v56 = vsel %vm338_vm6, %v335_v45, %v337_v46 }
  0xab   : > { %v1322_v47 = vpop.permute.xlu0 %318  ;;  %v417_v0 = vsel %vm378_vm0, %v329_v61, %v341_v56 }
  0xac   : > { %v327_v33 = vsel %vm326_vm8, %v1322_v47, %v1317_v39  ;;  %v438_v39 = vld [vmem:[%s1550_s3] sm:$0xff] }
  0xad   : > { %v331_v48 = vpop.permute.xlu1 %330 }
  0xae   : > { %v339_v24 = vsel %vm338_vm6, %v331_v48, %v333_v44 }
  0xaf   : > { %v345_v49 = vpop.permute.xlu0 %344  ;;  %v411_v35 = vsel %vm378_vm0, %v327_v33, %v339_v24 }
  0xb1   : > { %v347_v50 = vpop.permute.xlu1 %346 }
  0xb2   : > { %v352_v8 = vsel %vm350_vm7, %v345_v49, %v347_v50 }
  0xb3   : > { %v349_v51 = vpop.permute.xlu0 %348  ;;  %v424_v29 = vsel %vm391_vm2, %v414_v21, %v352_v8 }
  0xb4   : > { %v428_v57 = vsel %vm391_vm2, %v420_v55, %v349_v51  ;;  %v353_v59 = vsel %vm350_vm7, %v347_v50, %v349_v51 }
  0xb5   : > { %v343_v52 = vpop.permute.xlu1 %342  ;;  %v426_v3 = vsel %vm391_vm2, %v417_v0, %v353_v59 }
  0xb6   : > { %v351_v31 = vsel %vm350_vm7, %v343_v52, %v345_v49 }
  0xb7   : > { %v357_v53 = vpop.permute.xlu0 %356  ;;  %v422_v36 = vsel %vm391_vm2, %v411_v35, %v351_v31 }
  0xb9   : > { %v359_v54 = vpop.permute.xlu1 %358 }
  0xba   : > { %v364_v28 = vsel %vm362_vm9, %v357_v53, %v359_v54 }
  0xbb   : > { %v361_v58 = vpop.permute.xlu0 %360  ;;  %v432_v32 = vsel %vm400_vm3, %v424_v29, %v364_v28 }
  0xbc   : > { %v436_v60 = vsel %vm400_vm3, %v428_v57, %v361_v58  ;;  %v365_v62 = vsel %vm362_vm9, %v359_v54, %v361_v58 }
  0xbd   : > { %v355_v63 = vpop.permute.xlu1 %354  ;;  %466 = vrot.lane.b32.xlu1 %v436_v60, %s1177_s12  ;;  %v434_v5 = vsel %vm400_vm3, %v426_v3, %v365_v62  ;;  %v603_v3 = vsub.s32 1, %v1228_v4 }
  0xbe   : > { %v363_v34 = vsel %vm362_vm9, %v355_v63, %v357_v53  ;;  %v437_v63 = vld [vmem:[%s1549_s2] sm:$0xf] }
  0xbf   : > { %v367_v2 = vpop.permute.xlu0 %366  ;;  %v430_v37 = vsel %vm400_vm3, %v422_v36, %v363_v34  ;;  %vm629_vm3 = vcmask 1010688  }
  0xc1   : > { %v369_v6 = vpop.permute.xlu1 %368  ;;  %464 = vrot.lane.b32.xlu1 %v434_v5, %s1177_s12  ;;  %v595_v5 = vld [vmem:[%s1548_s1] sm:$0x7] }
  0xc2   : > { %v375_v11 = vsel %vm374_vm10, %v367_v2, %v369_v6  ;;  %v607_v2 = vsub.s32 2, %v1228_v4  ;;  %v604_v16 = vrot.slane %v595_v5, %v603_v3 }
  0xc3   : > { %468 = vrot.lane.b32.xlu0 %v375_v11, %s1177_s12  ;;  %v371_v14 = vpop.permute.xlu0 %370 }
  0xc4   : > { %v376_v15 = vsel %vm374_vm10, %v369_v6, %v371_v14 }
  0xc5   : > { %470 = vrot.lane.b32.xlu1 %v376_v15, %s1177_s12  ;;  %v373_v20 = vpop.permute.xlu1 %372  ;;  %v608_v15 = vrot.slane %v595_v5, %v607_v2 }
  0xc6   : > { %v377_v38 = vsel %vm374_vm10, %v371_v14, %v373_v20  ;;  %v600_v14 = vrot.slane %v595_v5, %v1412_v1 }
  0xc7   : > { %454 = vrot.lane.b32.xlu0 %v404_v17, %s1177_s12 }
  0xc9   : > { %474 = vrot.lane.b32.xlu1 %v373_v20, %s1177_s12 }
  0xcb   : > { %452 = vrot.lane.b32.xlu0 %v402_v25, %s1177_s12 }
  0xcf   : > { %462 = vrot.lane.b32.xlu0 %v432_v32, %s1177_s12 }
  0xd3   : > { %460 = vrot.lane.b32.xlu0 %v430_v37, %s1177_s12 }
  0xd7   : > { %472 = vrot.lane.b32.xlu0 %v377_v38, %s1177_s12 }
  0xdb   : > { %441 = vperm.xlu0 %1140, %v438_v39  }
 0x10f   : > { %v459_v40 = vpop.permute.xlu1 %458 }
 0x113   : > { %v457_v41 = vpop.permute.xlu1 %456 }
 0x114   : > { %v479_v42 = vsel %vm476_vm12, %v457_v41, %v459_v40 }
 0x115   : > { %1096 = vmatpush3.bf16.msra.mxu1 %v479_v42 }
 0x116   : > { %1097 = vmatprep.subr.bf16.mxu1 %v1176_v26 }
 0x12f   : > { %v467_v43 = vpop.permute.xlu1 %466 }
 0x133   : > { %v465_v44 = vpop.permute.xlu1 %464 }
 0x134   : > { %v482_v45 = vsel %vm476_vm12, %v465_v44, %v467_v43 }
 0x135   : > { %v469_v46 = vpop.permute.xlu0 %468  ;;  %1098 = vmatpush3.bf16.msra.mxu1 %v482_v45 }
 0x136   : > { %1099 = vmatprep.subr.bf16.mxu1 %v1176_v26 }
 0x137   : > { %v471_v53 = vpop.permute.xlu1 %470 }
 0x138   : > { %v483_v57 = vsel %vm476_vm12, %v469_v46, %v471_v53 }
 0x139   : > { %v455_v47 = vpop.permute.xlu0 %454  ;;  %v497_v61 = vsel %vm378_vm0, %v483_v57, 0 }
 0x13a   : > { %v478_v48 = vsel %vm476_vm12, %v455_v47, %v457_v41 }
 0x13b   : > { %505 = vmatprep.subr.bf16.mxu0 %v478_v48  ;;  %v475_v56 = vpop.permute.xlu1 %474 }
 0x13d   : > { %v453_v49 = vpop.permute.xlu0 %452 }
 0x13e   : > { %v477_v50 = vsel %vm476_vm12, %v453_v49, %v455_v47 }
 0x13f   : > { %506 = vmatpush1.bf16.msra.mxu0 %v477_v50 }
 0x141   : > { %v463_v51 = vpop.permute.xlu0 %462 }
 0x142   : > { %v481_v52 = vsel %vm476_vm12, %v463_v51, %v465_v44 }
 0x143   : > { %507 = vmatprep.subr.bf16.mxu0 %v481_v52 }
 0x145   : > { %v461_v54 = vpop.permute.xlu0 %460 }
 0x146   : > { %v480_v55 = vsel %vm476_vm12, %v461_v54, %v463_v51 }
 0x147   : > { %508 = vmatpush1.bf16.msra.mxu0 %v480_v55 }
 0x149   : > { %v473_v58 = vpop.permute.xlu0 %472 }
 0x14a   : > { %v484_v59 = vsel %vm476_vm12, %v471_v53, %v473_v58  ;;  %v485_v60 = vsel %vm476_vm12, %v473_v58, %v475_v56 }
 0x14b   : > { %1069 = vmatprep.subr.msk.bf16.mxu0 %vm378_vm0, %v484_v59  ;;  %v503_v62 = vsel %vm378_vm0, %v485_v60, 0 }
 0x14c   : > { %510 = vmatpush1.bf16.msra.mxu0 %v497_v61  ;;  %1100 = vmatpush3.bf16.msra.mxu1 %v503_v62 }
 0x14d   : > { %1105 = vmatprep.subr.bf16.mxu1 %v1176_v26 }
 0x14f   : > { %1070 = vmatmul.mubr.msk.bf16.vlgmr.msra.gmra.mrb[0].mxu0 %vm492_vm13, %v437_v63  ;;  %1102 = vmatmul.mubr.msk.bf16.vlgmr.msra.gmra.mrb[0].mxu1 %vm492_vm13, %v437_v63 }
 0x150   : > { %1115 = vmatprep.mubr.msk.bf16.mxu1 %vm1179_vm11, %v1176_v26  ;;  %861 = vmatprep.mubr.bf16.mxu0 %v1178_v30 }
 0x15a   : > { %v442_v0 = vpop.permute.xlu0 %441 }
 0x222   : > { %v539_v6 = vpop.f32.mrb[0].mxu0  ;;  %v580_v7 = vpop.f32.mrb[0].mxu1 }
 0x223   : > { %v540_v9 = vadd.f32 %v539_v6, %v442_v0  ;;  %v581_v11 = vadd.f32 %v580_v7, %v442_v0  ;;  %v541_v12 = vpop.f32.mrb[1].mxu0  ;;  %v1103_v13 = vpop.f32.mrb[1].mxu1 }
 0x224   : > { %v542_v10 = vadd.f32 %v541_v12, %v442_v0  ;;  %v543_v17 = vpop.f32.mrb[2].mxu0  ;;  %v583_v18 = vpop.f32.mrb[2].mxu1 }
 0x225   : > { %vm586_vm14 = vcmp.gt.f32.partialorder %v540_v9, 0.0  ;;  %v589_v19 = vmul.f32 0.2, %v540_v9  ;;  %vm588_vm15 = vcmp.gt.f32.partialorder %v581_v11, 0.0  ;;  %v591_v20 = vmul.f32 0.2, %v581_v11 }
 0x226   : > { %vm587_vm0 = vcmp.gt.f32.partialorder %v542_v10, 0.0  ;;  %v590_v22 = vmul.f32 0.2, %v542_v10  ;;  %v544_v23 = vpop.f32.mrb[3].mxu0  ;;  %v1104_v8 = vpop.f32.mrb[3].mxu1 }
 0x227   : > { %v592_v25 = vsel %vm586_vm14, %v540_v9, %v589_v19  ;;  %v594_v27 = vsel %vm588_vm15, %v581_v11, %v591_v20 }
 0x228   : > { %v612_v28 = vmul.f32 %v600_v14, %v592_v25  ;;  %v614_v21 = vmul.f32 %v608_v15, %v594_v27  ;;  %v593_v24 = vsel %vm587_vm0, %v542_v10, %v590_v22  ;;  %v910_v27 = vld [vmem:[%s1548_s1] sm:$0x7] }
 0x229   : > { %v613_v29 = vmul.f32 %v604_v16, %v593_v24  ;;  %v966_v24 = vrot.slane %v910_v27, %v1412_v1 }
 0x22a   : > { %v1084_v30 = vpack.c.bf16 %v614_v21, %v614_v21  ;;  %v1158_v33 = vpack.c.bf16 %v612_v28, %v612_v28 }
 0x22b   : > { %v1157_v32 = vpack.c.bf16 %v613_v29, %v613_v29  ;;  %v742_v29 = vld [vmem:[#allocation3] sm:$0x1] }
 0x22c   : > { %630 = vst.msk [vmem:[#allocation2 + $0x8] sm:$0xf] %vm629_vm3, %v1084_v30  ;;  %v970_v30 = vrot.slane %v910_v27, %v603_v3 }
 0x233   : > { %v1144_v31 = vld [vmem:[#allocation2 + $0x8] ss:$0 sps:$4 sm:$0xff]  }
 0x234   : > { %653 = vrot.lane.b32.xlu0 %v1144_v31, %s1169_s29  ;;  %645 = vrot.lane.b32.xlu1 %v1144_v31, %s1168_s28 }
 0x238   : > { %661 = vrot.lane.b32.xlu0 %v1144_v31, %s1170_s30  ;;  %643 = vrot.lane.b32.xlu1 %v1157_v32, %s1168_s28 }
 0x23c   : > { %669 = vrot.lane.b32.xlu0 %v1144_v31, %s1171_s7  ;;  %651 = vrot.lane.b32.xlu1 %v1157_v32, %s1169_s29 }
 0x240   : > { %677 = vrot.lane.b32.xlu0 %v1144_v31, %s1172_s8  ;;  %659 = vrot.lane.b32.xlu1 %v1157_v32, %s1170_s30 }
 0x244   : > { %685 = vrot.lane.b32.xlu0 %v1144_v31, %s1173_s9  ;;  %649 = vrot.lane.b32.xlu1 %v1158_v33, %s1169_s29 }
 0x248   : > { %693 = vrot.lane.b32.xlu0 %v1144_v31, %s1174_s10  ;;  %667 = vrot.lane.b32.xlu1 %v1157_v32, %s1171_s7 }
 0x24c   : > { %641 = vrot.lane.b32.xlu0 %v1158_v33, %s1168_s28  ;;  %675 = vrot.lane.b32.xlu1 %v1157_v32, %s1172_s8 }
 0x250   : > { %657 = vrot.lane.b32.xlu0 %v1158_v33, %s1170_s30  ;;  %665 = vrot.lane.b32.xlu1 %v1158_v33, %s1171_s7 }
 0x254   : > { %673 = vrot.lane.b32.xlu0 %v1158_v33, %s1172_s8  ;;  %683 = vrot.lane.b32.xlu1 %v1157_v32, %s1173_s9 }
 0x258   : > { %689 = vrot.lane.b32.xlu0 %v1158_v33, %s1174_s10  ;;  %691 = vrot.lane.b32.xlu1 %v1157_v32, %s1174_s10 }
 0x25c   : > { %699 = vrot.lane.b32.xlu0 %v1157_v32, %s1175_s11  ;;  %681 = vrot.lane.b32.xlu1 %v1158_v33, %s1173_s9 }
 0x260   : > { %697 = vrot.lane.b32.xlu1 %v1158_v33, %s1175_s11 }
 0x264   : > { %701 = vrot.lane.b32.xlu1 %v1144_v31, %s1175_s11 }
 0x2a6   : > { %v654_v34 = vpop.permute.xlu0 %653  ;;  %v646_v35 = vpop.permute.xlu1 %645 }
 0x2a7   : > { %v713_v36 = vsel %vm391_vm2, %v1144_v31, %v646_v35  ;;  %v974_v31 = vrot.slane %v910_v27, %v607_v2 }
 0x2a8   : > { %768 = vrot.lane.b32.xlu1 %v713_v36, %s1168_s28 }
 0x2aa   : > { %v662_v37 = vpop.permute.xlu0 %661  ;;  %v644_v38 = vpop.permute.xlu1 %643 }
 0x2ab   : > { %v722_v39 = vsel %vm391_vm2, %v654_v34, %v662_v37  ;;  %v648_v53 = vsel %vm287_vm1, %v644_v38, %v646_v35 }
 0x2ac   : > { %774 = vrot.lane.b32.xlu0 %v722_v39, %s1168_s28  ;;  %v710_v56 = vsel %vm391_vm2, %v1157_v32, %v648_v53 }
 0x2ae   : > { %v670_v40 = vpop.permute.xlu0 %669  ;;  %v652_v41 = vpop.permute.xlu1 %651 }
 0x2af   : > { %v656_v46 = vsel %vm301_vm4, %v652_v41, %v654_v34 }
 0x2b2   : > { %v678_v42 = vpop.permute.xlu0 %677  ;;  %v660_v43 = vpop.permute.xlu1 %659 }
 0x2b3   : > { %v731_v44 = vsel %vm391_vm2, %v670_v40, %v678_v42  ;;  %v664_v45 = vsel %vm314_vm5, %v660_v43, %v662_v37 }
 0x2b4   : > { %780 = vrot.lane.b32.xlu1 %v731_v44, %s1168_s28  ;;  %v719_v49 = vsel %vm391_vm2, %v656_v46, %v664_v45 }
 0x2b6   : > { %v686_v47 = vpop.permute.xlu0 %685  ;;  %v650_v48 = vpop.permute.xlu1 %649 }
 0x2b7   : > { %v655_v60 = vsel %vm301_vm4, %v650_v48, %v652_v41  ;;  %vm816_vm4 = vcmask 588800  }
 0x2b8   : > { %772 = vrot.lane.b32.xlu1 %v719_v49, %s1168_s28 }
 0x2ba   : > { %v694_v50 = vpop.permute.xlu0 %693  ;;  %v668_v51 = vpop.permute.xlu1 %667 }
 0x2bb   : > { %v740_v52 = vsel %vm391_vm2, %v686_v47, %v694_v50  ;;  %v672_v5 = vsel %vm326_vm8, %v668_v51, %v670_v40 }
 0x2bc   : > { %786 = vrot.lane.b32.xlu0 %v740_v52, %s1168_s28 }
 0x2be   : > { %v642_v54 = vpop.permute.xlu0 %641  ;;  %v676_v55 = vpop.permute.xlu1 %675 }
 0x2bf   : > { %v647_v57 = vsel %vm287_vm1, %v642_v54, %v644_v38  ;;  %v680_v63 = vsel %vm338_vm6, %v676_v55, %v678_v42 }
 0x2c0   : > { %766 = vrot.lane.b32.xlu0 %v710_v56, %s1168_s28  ;;  %v707_v62 = vsel %vm391_vm2, %v1158_v33, %v647_v57  ;;  %v728_v9 = vsel %vm391_vm2, %v672_v5, %v680_v63 }
 0x2c2   : > { %v658_v58 = vpop.permute.xlu0 %657  ;;  %v666_v59 = vpop.permute.xlu1 %665 }
 0x2c3   : > { %v663_v61 = vsel %vm314_vm5, %v658_v58, %v660_v43  ;;  %v671_v12 = vsel %vm326_vm8, %v666_v59, %v668_v51  ;;  %vm994_vm8 = vcmask 516096  }
 0x2c4   : > { %764 = vrot.lane.b32.xlu0 %v707_v62, %s1168_s28  ;;  %v716_v0 = vsel %vm391_vm2, %v655_v60, %v663_v61 }
 0x2c5   : > { %770 = vrot.lane.b32.xlu1 %v716_v0, %s1168_s28 }
 0x2c6   : > { %v674_v6 = vpop.permute.xlu0 %673  ;;  %v684_v7 = vpop.permute.xlu1 %683 }
 0x2c7   : > { %v679_v11 = vsel %vm338_vm6, %v674_v6, %v676_v55  ;;  %v688_v14 = vsel %vm350_vm7, %v684_v7, %v686_v47  ;;  %v741_v55 = vld [vmem:[%s1551_s4] sm:$0x1] }
 0x2c8   : > { %778 = vrot.lane.b32.xlu0 %v728_v9, %s1168_s28  ;;  %v725_v10 = vsel %vm391_vm2, %v671_v12, %v679_v11 }
 0x2ca   : > { %v692_v13 = vpop.permute.xlu1 %691  ;;  %v690_v16 = vpop.permute.xlu0 %689 }
 0x2cb   : > { %v696_v15 = vsel %vm362_vm9, %v692_v13, %v694_v50  ;;  %v695_v19 = vsel %vm362_vm9, %v690_v16, %v692_v13  ;;  %vm1013_vm9 = vcmask 8192  }
 0x2cc   : > { %776 = vrot.lane.b32.xlu0 %v725_v10, %s1168_s28  ;;  %v737_v17 = vsel %vm391_vm2, %v688_v14, %v696_v15 }
 0x2cd   : > { %784 = vrot.lane.b32.xlu1 %v737_v17, %s1168_s28 }
 0x2ce   : > { %v682_v18 = vpop.permute.xlu1 %681  ;;  %v700_v23 = vpop.permute.xlu0 %699 }
 0x2cf   : > { %v687_v20 = vsel %vm350_vm7, %v682_v18, %v684_v7  ;;  %vm990_vm7 = vcmask 1040384  }
 0x2d0   : > { %v734_v22 = vsel %vm391_vm2, %v687_v20, %v695_v19 }
 0x2d1   : > { %782 = vrot.lane.b32.xlu1 %v734_v22, %s1168_s28 }
 0x2d2   : > { %v698_v8 = vpop.permute.xlu1 %697 }
 0x2d3   : > { %v703_v25 = vsel %vm374_vm10, %v698_v8, %v700_v23 }
 0x2d4   : > { %788 = vrot.lane.b32.xlu0 %v703_v25, %s1168_s28 }
 0x2d6   : > { %v702_v28 = vpop.permute.xlu1 %701 }
 0x2d7   : > { %v704_v21 = vsel %vm374_vm10, %v700_v23, %v702_v28 }
 0x2d8   : > { %790 = vrot.lane.b32.xlu1 %v704_v21, %s1168_s28  ;;  %792 = vrot.lane.b32.xlu0 %v702_v28, %s1168_s28 }
 0x2dc   : > { %745 = vperm.xlu1 %1141, %v742_v29   ;;  %975 = vrot.lane.b32.xlu0 %v966_v24, %s1172_s8 }
 0x2e0   : > { %977 = vrot.lane.b32.xlu1 %v970_v30, %s1172_s8  ;;  %979 = vrot.lane.b32.xlu0 %v974_v31, %s1172_s8 }
 0x31a   : > { %v769_v32 = vpop.permute.xlu1 %768 }
 0x31b   : > { %1106 = vmatpush3.bf16.msra.mxu1 %v769_v32 }
 0x31c   : > { %1107 = vmatprep.subr.bf16.mxu1 %v1176_v26 }
 0x31e   : > { %v775_v33 = vpop.permute.xlu0 %774 }
 0x31f   : > { %1108 = vmatpush3.bf16.msra.mxu1 %v775_v33 }
 0x320   : > { %1109 = vmatprep.subr.bf16.mxu1 %v1176_v26 }
 0x326   : > { %v781_v34 = vpop.permute.xlu1 %780 }
 0x327   : > { %1110 = vmatpush3.bf16.msra.mxu1 %v781_v34 }
 0x328   : > { %1111 = vmatprep.subr.bf16.mxu1 %v1176_v26 }
 0x32a   : > { %v773_v35 = vpop.permute.xlu1 %772 }
 0x32b   : > { %v797_v39 = vsel %vm287_vm1, %v773_v35, %v775_v33 }
 0x32e   : > { %v787_v3 = vpop.permute.xlu0 %786 }
 0x32f   : > { %1112 = vmatpush3.bf16.msra.mxu1 %v787_v3 }
 0x330   : > { %1113 = vmatprep.subr.bf16.mxu1 %v1176_v26 }
 0x332   : > { %v767_v4 = vpop.permute.xlu0 %766 }
 0x333   : > { %v795_v2 = vsel %vm287_vm1, %v767_v4, %v769_v32 }
 0x334   : > { %829 = vmatprep.subr.bf16.mxu0 %v795_v2 }
 0x336   : > { %v765_v36 = vpop.permute.xlu0 %764 }
 0x337   : > { %v794_v37 = vsel %vm287_vm1, %v765_v36, %v767_v4  ;;  %v771_v38 = vpop.permute.xlu1 %770 }
 0x338   : > { %830 = vmatpush1.bf16.msra.mxu0 %v794_v37  ;;  %v796_v41 = vsel %vm287_vm1, %v771_v38, %v773_v35 }
 0x339   : > { %831 = vmatprep.subr.bf16.mxu0 %v797_v39 }
 0x33a   : > { %v779_v40 = vpop.permute.xlu0 %778 }
 0x33b   : > { %v799_v42 = vsel %vm287_vm1, %v779_v40, %v781_v34 }
 0x33c   : > { %832 = vmatpush1.bf16.msra.mxu0 %v796_v41 }
 0x33d   : > { %833 = vmatprep.subr.bf16.mxu0 %v799_v42 }
 0x33e   : > { %v777_v26 = vpop.permute.xlu0 %776 }
 0x33f   : > { %v798_v43 = vsel %vm287_vm1, %v777_v26, %v779_v40  ;;  %v785_v44 = vpop.permute.xlu1 %784 }
 0x340   : > { %834 = vmatpush1.bf16.msra.mxu0 %v798_v43  ;;  %v801_v45 = vsel %vm287_vm1, %v785_v44, %v787_v3 }
 0x341   : > { %835 = vmatprep.subr.bf16.mxu0 %v801_v45 }
 0x343   : > { %v783_v46 = vpop.permute.xlu1 %782 }
 0x344   : > { %v800_v47 = vsel %vm287_vm1, %v783_v46, %v785_v44 }
 0x345   : > { %836 = vmatpush1.bf16.msra.mxu0 %v800_v47 }
 0x346   : > { %v789_v48 = vpop.permute.xlu0 %788 }
 0x34a   : > { %v793_v49 = vpop.permute.xlu0 %792  ;;  %v791_v50 = vpop.permute.xlu1 %790 }
 0x34b   : > { %v827_v51 = vsel %vm391_vm2, %v793_v49, 0  ;;  %v802_v52 = vsel %vm287_vm1, %v789_v48, %v791_v50  ;;  %v803_v53 = vsel %vm287_vm1, %v791_v50, %v793_v49 }
 0x34c   : > { %v821_v54 = vsel %vm391_vm2, %v802_v52, 0  ;;  %1077 = vmatprep.subr.msk.bf16.mxu0 %vm391_vm2, %v803_v53  ;;  %1114 = vmatpush3.bf16.msra.mxu1 %v827_v51 }
 0x34d   : > { %838 = vmatpush1.bf16.msra.mxu0 %v821_v54 }
 0x34e   : > { %v976_v21 = vpop.permute.xlu0 %975 }
 0x34f   : > { %1116 = vmatmul.mubr.msk.bf16.vlgmr.msra.gmra.mrb[4].mxu1 %vm816_vm4, %v741_v55 }
 0x350   : > { %1078 = vmatmul.mubr.msk.bf16.vlgmr.msra.gmra.mrb[4].mxu0 %vm816_vm4, %v741_v55 }
 0x352   : > { %v980_v44 = vpop.permute.xlu0 %979 }
 0x35b   : > { %v746_v56 = vpop.permute.xlu1 %745 }
 0x35c   : > { %v751_v57 = vrot.slane %v746_v56, %v1412_v1 }
 0x35f   : > { %v978_v33 = vpop.permute.xlu1 %977 }
 0x360   : > { %v982_v40 = vsel %vm338_vm6, %v976_v21, %v978_v33  ;;  %v983_v53 = vsel %vm338_vm6, %v978_v33, %v980_v44  ;;  %vm1011_vm6 = vcmask 7168  }
 0x422   : > { %v904_v58 = vpop.f32.mrb[4].mxu1 }
 0x423   : > { %v1523_v59 = vadd.f32 %v904_v58, %v751_v57  ;;  %v863_v60 = vpop.f32.mrb[4].mxu0  ;;  %v1117_v61 = vpop.f32.mrb[5].mxu1 }
 0x424   : > { %v1525_v62 = vadd.f32 %v863_v60, %v751_v57  ;;  %v865_v63 = vpop.f32.mrb[5].mxu0  ;;  %v907_v0 = vpop.f32.mrb[6].mxu1 }
 0x425   : > { %v919_v5 = vand.u32 2147483647, %v1523_v59  ;;  %v1528_v6 = vadd.f32 %v865_v63, %v751_v57  ;;  %v867_v7 = vpop.f32.mrb[6].mxu0  ;;  %v1118_v9 = vpop.f32.mrb[7].mxu1  ;;  %v913_v24 = vsub.f32 0.0, %v1523_v59 }
 0x426   : > { %v917_v11 = vand.u32 2147483647, %v1525_v62  ;;  %v868_v12 = vpop.f32.mrb[7].mxu0  ;;  %v911_v31 = vsub.f32 0.0, %v1525_v62 }
 0x427   : > { %v922_v13 = vsub.f32 0.0, %v919_v5  ;;  %v918_v1 = vand.u32 2147483647, %v1528_v6  ;;  %v912_v2 = vsub.f32 0.0, %v1528_v6  ;;  %v916_v37 = vmax.f32 %v913_v24, 0.0 }
 0x428   : > { %v920_v14 = vsub.f32 0.0, %v917_v11  ;;  %v914_v42 = vmax.f32 %v911_v31, 0.0 }
 0x429   : > { %v927_v15 = vmul.f32 1.442695, %v922_v13  ;;  %v921_v10 = vsub.f32 0.0, %v918_v1  ;;  %v915_v49 = vmax.f32 %v912_v2, 0.0 }
 0x42a   : > { %v923_v16 = vmul.f32 1.442695, %v920_v14 }
 0x42b   : > { %1145 = vpow2.f32 %v927_v15  ;;  %v925_v17 = vmul.f32 1.442695, %v921_v10 }
 0x42c   : > { %1147 = vpow2.f32 %v923_v16 }
 0x42d   : > { %1149 = vpow2.f32 %v925_v17 }
 0x435   : > { %v1146_v18 = vpop.eup %1145 }
 0x436   : > { %v1148_v19 = vpop.eup %1147  ;;  %v947_v20 = vadd.f32 1.0, %v1146_v18  ;;  %v950_v25 = vmul.f32 -0.5, %v1146_v18  ;;  %v953_v30 = vand.u32 2147483647, %v1146_v18 }
 0x437   : > { %v1150_v22 = vpop.eup %1149  ;;  %v929_v23 = vadd.f32 1.0, %v1148_v19  ;;  %v932_v27 = vmul.f32 -0.5, %v1148_v19  ;;  %v935_v3 = vand.u32 2147483647, %v1148_v19 }
 0x438   : > { %1151 = vlog2.f32 %v947_v20  ;;  %v938_v8 = vadd.f32 1.0, %v1150_v22  ;;  %v941_v28 = vmul.f32 -0.5, %v1150_v22  ;;  %v951_v29 = vadd.f32 1.0, %v950_v25 }
 0x439   : > { %1153 = vlog2.f32 %v929_v23  ;;  %v933_v32 = vadd.f32 1.0, %v932_v27  ;;  %v944_v35 = vand.u32 2147483647, %v1150_v22  ;;  %vm954_vm1 = vcmp.lt.f32.partialorder %v953_v30, 0.0004427343 }
 0x43a   : > { %1155 = vlog2.f32 %v938_v8  ;;  %v942_v34 = vadd.f32 1.0, %v941_v28  ;;  %v952_v39 = vmul.f32 %v1146_v18, %v951_v29  ;;  %vm936_vm2 = vcmp.lt.f32.partialorder %v935_v3, 0.0004427343 }
 0x43b   : > { %v934_v43 = vmul.f32 %v1148_v19, %v933_v32  ;;  %vm945_vm5 = vcmp.lt.f32.partialorder %v944_v35, 0.0004427343 }
 0x43c   : > { %v943_v47 = vmul.f32 %v1150_v22, %v942_v34 }
 0x442   : > { %v1152_v4 = vpop.eup %1151 }
 0x443   : > { %v1154_v36 = vpop.eup %1153  ;;  %v949_v38 = vmul.f32 0.6931472, %v1152_v4 }
 0x444   : > { %v1156_v41 = vpop.eup %1155  ;;  %v931_v26 = vmul.f32 0.6931472, %v1154_v36 }
 0x445   : > { %v955_v45 = vsel %vm954_vm1, %v952_v39, %v949_v38  ;;  %v940_v46 = vmul.f32 0.6931472, %v1156_v41 }
 0x446   : > { %v958_v48 = vadd.f32 %v955_v45, %v916_v37  ;;  %v937_v50 = vsel %vm936_vm2, %v934_v43, %v931_v26 }
 0x447   : > { %v946_v51 = vsel %vm945_vm5, %v943_v47, %v940_v46  ;;  %v956_v52 = vadd.f32 %v937_v50, %v914_v42 }
 0x448   : > { %v961_v54 = vadd.f32 %v958_v48, %v1523_v59  ;;  %v957_v55 = vadd.f32 %v946_v51, %v915_v49  ;;  %v989_v61 = vmul.f32 %v980_v44, %v958_v48 }
 0x449   : > { %v959_v56 = vadd.f32 %v956_v52, %v1525_v62  ;;  %v987_v57 = vmul.f32 %v982_v40, %v956_v52 }
 0x44a   : > { %v960_v58 = vadd.f32 %v957_v55, %v1528_v6  ;;  %v988_v60 = vmul.f32 %v983_v53, %v957_v55  ;;  %v1002_v7 = vmul.f32 %v980_v44, %v961_v54  ;;  %v995_v13 = vsel %vm994_vm8, %v989_v61, 0.0 }
 0x44b   : > { %v1000_v63 = vmul.f32 %v982_v40, %v959_v56  ;;  %v991_v0 = vsel %vm990_vm7, %v987_v57, 0.0 }
 0x44c   : > { %v1001_v5 = vmul.f32 %v983_v53, %v960_v58  ;;  %v992_v9 = vsel %vm990_vm7, %v988_v60, 0.0  ;;  %v1006_v15 = vsel %vm994_vm8, %v1002_v7, 0.0 }
 0x44d   : > { %v993_v11 = vadd.f32 %v992_v9, %v991_v0  ;;  %v1003_v12 = vsel %vm990_vm7, %v1000_v63, 0.0 }
 0x44e   : > { %v1004_v59 = vsel %vm990_vm7, %v1001_v5, 0.0 }
 0x44f   : > { %v996_v1 = vadd.f32 %v995_v13, %v993_v11  ;;  %v1005_v14 = vadd.f32 %v1004_v59, %v1003_v12 }
 0x451   : > { %997 = vadd.xlane.f32.xlu1 %v996_v1  ;;  %v1007_v62 = vadd.f32 %v1006_v15, %v1005_v14 }
 0x453   : > { %1008 = vadd.xlane.f32.xlu0 %v1007_v62 }
 0x4de   : > { %v998_v6 = vpop.xlane.xlu1 %997 }
 0x4df   : > { %v999_v16 = vmul.f32 0.00390625, %v998_v6 }
 0x4e0   : > { %v1009_v10 = vpop.xlane.xlu0 %1008 }
 0x4e1   : > { %v1010_v17 = vmul.f32 0.00390625, %v1009_v10 }
 0x4e3   : > { %v1012_v18 = vsel %vm1011_vm6, %v999_v16, %v1010_v17 }
 0x4e4   : > { %1014 = vst.msk [vmem:[%s249_s26] sm:$0x1] %vm1013_vm9, %v1012_v18 }
 0x4e5 PF: > { %s18_s23 = sadd.s32 1, %s1165_s23  }
 0x4e6   : > { %p15_p4 = scmp.ge.s32.totalorder %s18_s23, 6  }
 0x4e8   :  { %17 = sbr.rel (!%p15_p4) target bundleno = 3 (0x3), region = 74 }

</bundles_post_ra>
